<compile_context>
chip_gen: v6e
topology: v6e:2x2x1
jax: 0.10.0
libtpu: 0.0.40
codegen_flags: <defaults>
</compile_context>

<pallas_src>
import functools

import jax
import jax.numpy as jnp
from jax import lax
from jax.experimental import pallas as pl
from jax.experimental.pallas import tpu as pltpu

BN_EPS = 1e-5
_MXU_MIN_CH = 32          # below this channel count the VPU scalar-MAC path wins


def _bn_relu(acc, g, b):
    """Training-mode BatchNorm2d + ReLU on an (N, C, HW) slab.

    Per-channel stats over (N, HW); centered (two-pass) variance to avoid
    E[x^2]-E[x]^2 cancellation.  g/b have shape (1, C, 1).
    """
    inv_p = 1.0 / float(acc.shape[0] * acc.shape[2])       # global 1/(N*H*W)
    mean = jnp.sum(jnp.sum(acc, axis=2, keepdims=True),
                   axis=0, keepdims=True) * inv_p
    d = acc - mean                                          # reused for affine
    var = jnp.sum(jnp.sum(d * d, axis=2, keepdims=True),
                  axis=0, keepdims=True) * inv_p
    scale = g * lax.rsqrt(var + BN_EPS)
    return jnp.maximum(d * scale + b, 0.0)


def _mlp_vpu_kernel(channels, w_offs, c_offs, w_sref, x_ref, gb_ref, o_ref):
    """Fused forward, small-channel path (VPU scalar-operand MACs).

    w_sref: (total_w,) f32 in SMEM; layer li starts at w_offs[li], stored
            row-major as (cin, cout).
    x_ref:  (N, C0, HW) f32 in VMEM (HW on the lane axis).
    gb_ref: (total_cout_pad, 2) f32 in VMEM; rows c_offs[li]..+cout hold
            (gamma, beta) of layer li.
    """
    y = x_ref[...]
    for li in range(len(channels) - 1):
        cin, cout = channels[li], channels[li + 1]
        wb, cb = w_offs[li], c_offs[li]

        # --- 1x1 conv: scalar * (N, HW) row MACs; no slab broadcasts --------
        rows = [y[:, i, :] for i in range(cin)]             # each loaded once
        cols = []
        for o in range(cout):
            col = w_sref[wb + o] * rows[0]
            for i in range(1, cin):
                col = col + w_sref[wb + i * cout + o] * rows[i]
            cols.append(col)
        acc = jnp.stack(cols, axis=1)                       # (N, cout, HW)

        # --- BN (train-mode batch stats) + ReLU ------------------------------
        g = gb_ref[cb:cb + cout, 0:1][None]                  # (1, cout, 1)
        b = gb_ref[cb:cb + cout, 1:2][None]
        y = _bn_relu(acc, g, b)

    o_ref[...] = y.astype(o_ref.dtype)


def _mlp_mxu_kernel(channels, c_offs, x_ref, w_ref, gb_ref, o_ref):
    """Fused forward, large-channel path (Cin contraction on the MXU).

    w_ref: (total_cout_pad, max_cin) f32; rows c_offs[li]..+cout hold the
           pre-transposed (cout, cin) weight of layer li.
    """
    y = x_ref[...]
    for li in range(len(channels) - 1):
        cin, cout = channels[li], channels[li + 1]
        cb = c_offs[li]
        wt = w_ref[cb:cb + cout, 0:cin]                      # (cout, cin)
        acc = jnp.stack(
            [jnp.dot(wt, y[n], preferred_element_type=jnp.float32)
             for n in range(y.shape[0])], axis=0)            # (N, cout, HW)
        g = gb_ref[cb:cb + cout, 0:1][None]
        b = gb_ref[cb:cb + cout, 1:2][None]
        y = _bn_relu(acc, g, b)
    o_ref[...] = y.astype(o_ref.dtype)


def init_mlp_params(key, in_channels, out_channels):
    """Parameters matching nn.Conv2d(k=1) + nn.BatchNorm2d shapes/init."""
    channels = [in_channels] + list(out_channels)
    params = []
    for i in range(1, len(channels)):
        cin, cout = channels[i - 1], channels[i]
        key, kw, kb = jax.random.split(key, 3)
        bound = 1.0 / (cin ** 0.5)            # PyTorch conv default init range
        # Conv2d weight (cout, cin, 1, 1) stored pre-transposed as (cin, cout).
        w = jax.random.uniform(kw, (cin, cout), jnp.float32, -bound, bound)
        b = jax.random.uniform(kb, (cout,), jnp.float32, -bound, bound)
        gamma = jnp.ones((cout,), jnp.float32)   # BatchNorm2d default weight
        beta = jnp.zeros((cout,), jnp.float32)   # BatchNorm2d default bias
        params.append((w, b, gamma, beta))
    return params


@jax.jit
def mlp_forward(x_nchw, params):
    N, C, H, W = x_nchw.shape
    HW = H * W
    channels = (C,) + tuple(w.shape[1] for (w, _, _, _) in params)
    c_last = channels[-1]

    # NCHW -> (N, C, H*W): contiguous reshape, no transpose materialized.
    x = x_nchw.reshape(N, C, HW)

    # --- pack per-layer params into two lane-friendly slabs ------------------
    c_offs, off = [], 0
    for co in channels[1:]:
        c_offs.append(off)
        off += co
    total_cout = off
    tc_pad = -(-total_cout // 8) * 8

    # gamma/beta: one (total_cout_pad, 2) VMEM block (single transfer).
    gb = jnp.concatenate(
        [jnp.stack([gamma, beta], axis=1) for (_, _, gamma, beta) in params],
        axis=0)
    gb = jnp.pad(gb, ((0, tc_pad - total_cout), (0, 0)))

    compiler_params = pltpu.CompilerParams(
        # Prefer staying VMEM-resident (the cheapest BN strategy) as slabs grow;
        # 64 MiB is within physical VMEM on all of v5e/v6e/v7x.
        vmem_limit_bytes=64 * 1024 * 1024)

    if max(channels) < _MXU_MIN_CH:
        # --- VPU path: flat weights in SMEM drive scalar-operand MACs --------
        w_offs, woff = [], 0
        for (w, _, _, _) in params:
            w_offs.append(woff)
            woff += int(w.size)
        w_flat = jnp.concatenate([w.reshape(-1) for (w, _, _, _) in params])
        # Conv bias is not passed: it cancels exactly under train-mode BN.
        kernel = functools.partial(_mlp_vpu_kernel, channels,
                                   tuple(w_offs), tuple(c_offs))
        out = pl.pallas_call(
            kernel,
            out_shape=jax.ShapeDtypeStruct((N, c_last, HW), jnp.float32),
            in_specs=[pl.BlockSpec(memory_space=pltpu.MemorySpace.SMEM),
                      pl.BlockSpec(memory_space=pltpu.MemorySpace.VMEM),
                      pl.BlockSpec(memory_space=pltpu.MemorySpace.VMEM)],
            out_specs=pl.BlockSpec(memory_space=pltpu.MemorySpace.VMEM),
            compiler_params=compiler_params,
        )(w_flat, x, gb)
    else:
        # --- MXU path: packed, pre-transposed weight slab in VMEM ------------
        max_cin = max(channels[:-1])
        blocks = [w.T for (w, _, _, _) in params]                 # (cout, cin)
        blocks = [jnp.pad(b, ((0, 0), (0, max_cin - b.shape[1]))) for b in blocks]
        w_slab = jnp.pad(jnp.concatenate(blocks, axis=0),
                         ((0, tc_pad - total_cout), (0, 0)))
        kernel = functools.partial(_mlp_mxu_kernel, channels, tuple(c_offs))
        out = pl.pallas_call(
            kernel,
            out_shape=jax.ShapeDtypeStruct((N, c_last, HW), jnp.float32),
            in_specs=[pl.BlockSpec(memory_space=pltpu.MemorySpace.VMEM)] * 3,
            out_specs=pl.BlockSpec(memory_space=pltpu.MemorySpace.VMEM),
            compiler_params=compiler_params,
        )(x, w_slab, gb)

    return out.reshape(N, c_last, H, W)


def _mlp_reference(x_nchw, params):
    """Pure-JAX reference reproducing the PyTorch forward (training-mode BN),
    including the conv bias (which the kernel drops since it cancels)."""
    x = x_nchw
    for (w, b, gamma, beta) in params:
        y = jnp.einsum("nchw,cd->ndhw", x, w) + b[None, :, None, None]
        mean = jnp.mean(y, axis=(0, 2, 3), keepdims=True)
        var = jnp.mean((y - mean) ** 2, axis=(0, 2, 3), keepdims=True)
        y = (y - mean) / jnp.sqrt(var + BN_EPS)
        y = y * gamma[None, :, None, None] + beta[None, :, None, None]
        x = jnp.maximum(y, 0.0)
    return x


if __name__ == "__main__":
    key = jax.random.PRNGKey(0)
    k_x, k_p = jax.random.split(key)

    # Small shapes consistent with the module: batch=2, in_channels=4, 16x16.
    in_channels = 4
    out_channels = [8, 16]
    x = jax.random.normal(k_x, (2, in_channels, 16, 16), jnp.float32)

    params = init_mlp_params(k_p, in_channels, out_channels)

    out = jax.block_until_ready(mlp_forward(x, params))

    ref = _mlp_reference(x, params)
    assert out.shape == (2, out_channels[-1], 16, 16), out.shape
    assert jnp.allclose(out, ref, atol=1e-4, rtol=1e-4), "mismatch vs reference"

    print("KERNEL_OK")
</pallas_src>

<mosaic_0001>
module attributes {stable_mosaic.version = 11 : i64} {
  func.func @_mlp_vpu_kernel(%arg0: memref<160xf32, #tpu.memory_space<smem>>, %arg1: memref<2x4x256xf32, #tpu.memory_space<vmem>>, %arg2: memref<24x2xf32, #tpu.memory_space<vmem>>, %arg3: memref<2x16x256xf32, #tpu.memory_space<vmem>>) attributes {dimension_semantics = [], scalar_prefetch = 0 : i64, scratch_operands = 0 : i64, tpu.core_type = #tpu.core_type<tc>} {
    %c0 = arith.constant 0 : index
    %c0_0 = arith.constant 0 : index
    %c0_1 = arith.constant 0 : index
    %0 = vector.load %arg1[%c0, %c0_0, %c0_1] : memref<2x4x256xf32, #tpu.memory_space<vmem>>, vector<2x4x256xf32>
    %1 = vector.extract_strided_slice %0 {offsets = [0, 0, 0], sizes = [2, 1, 256], strides = [1, 1, 1]} : vector<2x4x256xf32> to vector<2x1x256xf32>
    %2 = vector.shape_cast %1 : vector<2x1x256xf32> to vector<2x256xf32>
    %3 = vector.extract_strided_slice %0 {offsets = [0, 1, 0], sizes = [2, 1, 256], strides = [1, 1, 1]} : vector<2x4x256xf32> to vector<2x1x256xf32>
    %4 = vector.shape_cast %3 : vector<2x1x256xf32> to vector<2x256xf32>
    %5 = vector.extract_strided_slice %0 {offsets = [0, 2, 0], sizes = [2, 1, 256], strides = [1, 1, 1]} : vector<2x4x256xf32> to vector<2x1x256xf32>
    %6 = vector.shape_cast %5 : vector<2x1x256xf32> to vector<2x256xf32>
    %7 = vector.extract_strided_slice %0 {offsets = [0, 3, 0], sizes = [2, 1, 256], strides = [1, 1, 1]} : vector<2x4x256xf32> to vector<2x1x256xf32>
    %8 = vector.shape_cast %7 : vector<2x1x256xf32> to vector<2x256xf32>
    %c0_2 = arith.constant 0 : index
    %9 = memref.load %arg0[%c0_2] : memref<160xf32, #tpu.memory_space<smem>>
    %10 = vector.broadcast %9 : f32 to vector<2x256xf32>
    %11 = arith.mulf %10, %2 : vector<2x256xf32>
    %c8 = arith.constant 8 : index
    %12 = memref.load %arg0[%c8] : memref<160xf32, #tpu.memory_space<smem>>
    %13 = vector.broadcast %12 : f32 to vector<2x256xf32>
    %14 = arith.mulf %13, %4 : vector<2x256xf32>
    %15 = arith.addf %11, %14 : vector<2x256xf32>
    %c16 = arith.constant 16 : index
    %16 = memref.load %arg0[%c16] : memref<160xf32, #tpu.memory_space<smem>>
    %17 = vector.broadcast %16 : f32 to vector<2x256xf32>
    %18 = arith.mulf %17, %6 : vector<2x256xf32>
    %19 = arith.addf %15, %18 : vector<2x256xf32>
    %c24 = arith.constant 24 : index
    %20 = memref.load %arg0[%c24] : memref<160xf32, #tpu.memory_space<smem>>
    %21 = vector.broadcast %20 : f32 to vector<2x256xf32>
    %22 = arith.mulf %21, %8 : vector<2x256xf32>
    %23 = arith.addf %19, %22 : vector<2x256xf32>
    %c1 = arith.constant 1 : index
    %24 = memref.load %arg0[%c1] : memref<160xf32, #tpu.memory_space<smem>>
    %25 = vector.broadcast %24 : f32 to vector<2x256xf32>
    %26 = arith.mulf %25, %2 : vector<2x256xf32>
    %c9 = arith.constant 9 : index
    %27 = memref.load %arg0[%c9] : memref<160xf32, #tpu.memory_space<smem>>
    %28 = vector.broadcast %27 : f32 to vector<2x256xf32>
    %29 = arith.mulf %28, %4 : vector<2x256xf32>
    %30 = arith.addf %26, %29 : vector<2x256xf32>
    %c17 = arith.constant 17 : index
    %31 = memref.load %arg0[%c17] : memref<160xf32, #tpu.memory_space<smem>>
    %32 = vector.broadcast %31 : f32 to vector<2x256xf32>
    %33 = arith.mulf %32, %6 : vector<2x256xf32>
    %34 = arith.addf %30, %33 : vector<2x256xf32>
    %c25 = arith.constant 25 : index
    %35 = memref.load %arg0[%c25] : memref<160xf32, #tpu.memory_space<smem>>
    %36 = vector.broadcast %35 : f32 to vector<2x256xf32>
    %37 = arith.mulf %36, %8 : vector<2x256xf32>
    %38 = arith.addf %34, %37 : vector<2x256xf32>
    %c2 = arith.constant 2 : index
    %39 = memref.load %arg0[%c2] : memref<160xf32, #tpu.memory_space<smem>>
    %40 = vector.broadcast %39 : f32 to vector<2x256xf32>
    %41 = arith.mulf %40, %2 : vector<2x256xf32>
    %c10 = arith.constant 10 : index
    %42 = memref.load %arg0[%c10] : memref<160xf32, #tpu.memory_space<smem>>
    %43 = vector.broadcast %42 : f32 to vector<2x256xf32>
    %44 = arith.mulf %43, %4 : vector<2x256xf32>
    %45 = arith.addf %41, %44 : vector<2x256xf32>
    %c18 = arith.constant 18 : index
    %46 = memref.load %arg0[%c18] : memref<160xf32, #tpu.memory_space<smem>>
    %47 = vector.broadcast %46 : f32 to vector<2x256xf32>
    %48 = arith.mulf %47, %6 : vector<2x256xf32>
    %49 = arith.addf %45, %48 : vector<2x256xf32>
    %c26 = arith.constant 26 : index
    %50 = memref.load %arg0[%c26] : memref<160xf32, #tpu.memory_space<smem>>
    %51 = vector.broadcast %50 : f32 to vector<2x256xf32>
    %52 = arith.mulf %51, %8 : vector<2x256xf32>
    %53 = arith.addf %49, %52 : vector<2x256xf32>
    %c3 = arith.constant 3 : index
    %54 = memref.load %arg0[%c3] : memref<160xf32, #tpu.memory_space<smem>>
    %55 = vector.broadcast %54 : f32 to vector<2x256xf32>
    %56 = arith.mulf %55, %2 : vector<2x256xf32>
    %c11 = arith.constant 11 : index
    %57 = memref.load %arg0[%c11] : memref<160xf32, #tpu.memory_space<smem>>
    %58 = vector.broadcast %57 : f32 to vector<2x256xf32>
    %59 = arith.mulf %58, %4 : vector<2x256xf32>
    %60 = arith.addf %56, %59 : vector<2x256xf32>
    %c19 = arith.constant 19 : index
    %61 = memref.load %arg0[%c19] : memref<160xf32, #tpu.memory_space<smem>>
    %62 = vector.broadcast %61 : f32 to vector<2x256xf32>
    %63 = arith.mulf %62, %6 : vector<2x256xf32>
    %64 = arith.addf %60, %63 : vector<2x256xf32>
    %c27 = arith.constant 27 : index
    %65 = memref.load %arg0[%c27] : memref<160xf32, #tpu.memory_space<smem>>
    %66 = vector.broadcast %65 : f32 to vector<2x256xf32>
    %67 = arith.mulf %66, %8 : vector<2x256xf32>
    %68 = arith.addf %64, %67 : vector<2x256xf32>
    %c4 = arith.constant 4 : index
    %69 = memref.load %arg0[%c4] : memref<160xf32, #tpu.memory_space<smem>>
    %70 = vector.broadcast %69 : f32 to vector<2x256xf32>
    %71 = arith.mulf %70, %2 : vector<2x256xf32>
    %c12 = arith.constant 12 : index
    %72 = memref.load %arg0[%c12] : memref<160xf32, #tpu.memory_space<smem>>
    %73 = vector.broadcast %72 : f32 to vector<2x256xf32>
    %74 = arith.mulf %73, %4 : vector<2x256xf32>
    %75 = arith.addf %71, %74 : vector<2x256xf32>
    %c20 = arith.constant 20 : index
    %76 = memref.load %arg0[%c20] : memref<160xf32, #tpu.memory_space<smem>>
    %77 = vector.broadcast %76 : f32 to vector<2x256xf32>
    %78 = arith.mulf %77, %6 : vector<2x256xf32>
    %79 = arith.addf %75, %78 : vector<2x256xf32>
    %c28 = arith.constant 28 : index
    %80 = memref.load %arg0[%c28] : memref<160xf32, #tpu.memory_space<smem>>
    %81 = vector.broadcast %80 : f32 to vector<2x256xf32>
    %82 = arith.mulf %81, %8 : vector<2x256xf32>
    %83 = arith.addf %79, %82 : vector<2x256xf32>
    %c5 = arith.constant 5 : index
    %84 = memref.load %arg0[%c5] : memref<160xf32, #tpu.memory_space<smem>>
    %85 = vector.broadcast %84 : f32 to vector<2x256xf32>
    %86 = arith.mulf %85, %2 : vector<2x256xf32>
    %c13 = arith.constant 13 : index
    %87 = memref.load %arg0[%c13] : memref<160xf32, #tpu.memory_space<smem>>
    %88 = vector.broadcast %87 : f32 to vector<2x256xf32>
    %89 = arith.mulf %88, %4 : vector<2x256xf32>
    %90 = arith.addf %86, %89 : vector<2x256xf32>
    %c21 = arith.constant 21 : index
    %91 = memref.load %arg0[%c21] : memref<160xf32, #tpu.memory_space<smem>>
    %92 = vector.broadcast %91 : f32 to vector<2x256xf32>
    %93 = arith.mulf %92, %6 : vector<2x256xf32>
    %94 = arith.addf %90, %93 : vector<2x256xf32>
    %c29 = arith.constant 29 : index
    %95 = memref.load %arg0[%c29] : memref<160xf32, #tpu.memory_space<smem>>
    %96 = vector.broadcast %95 : f32 to vector<2x256xf32>
    %97 = arith.mulf %96, %8 : vector<2x256xf32>
    %98 = arith.addf %94, %97 : vector<2x256xf32>
    %c6 = arith.constant 6 : index
    %99 = memref.load %arg0[%c6] : memref<160xf32, #tpu.memory_space<smem>>
    %100 = vector.broadcast %99 : f32 to vector<2x256xf32>
    %101 = arith.mulf %100, %2 : vector<2x256xf32>
    %c14 = arith.constant 14 : index
    %102 = memref.load %arg0[%c14] : memref<160xf32, #tpu.memory_space<smem>>
    %103 = vector.broadcast %102 : f32 to vector<2x256xf32>
    %104 = arith.mulf %103, %4 : vector<2x256xf32>
    %105 = arith.addf %101, %104 : vector<2x256xf32>
    %c22 = arith.constant 22 : index
    %106 = memref.load %arg0[%c22] : memref<160xf32, #tpu.memory_space<smem>>
    %107 = vector.broadcast %106 : f32 to vector<2x256xf32>
    %108 = arith.mulf %107, %6 : vector<2x256xf32>
    %109 = arith.addf %105, %108 : vector<2x256xf32>
    %c30 = arith.constant 30 : index
    %110 = memref.load %arg0[%c30] : memref<160xf32, #tpu.memory_space<smem>>
    %111 = vector.broadcast %110 : f32 to vector<2x256xf32>
    %112 = arith.mulf %111, %8 : vector<2x256xf32>
    %113 = arith.addf %109, %112 : vector<2x256xf32>
    %c7 = arith.constant 7 : index
    %114 = memref.load %arg0[%c7] : memref<160xf32, #tpu.memory_space<smem>>
    %115 = vector.broadcast %114 : f32 to vector<2x256xf32>
    %116 = arith.mulf %115, %2 : vector<2x256xf32>
    %c15 = arith.constant 15 : index
    %117 = memref.load %arg0[%c15] : memref<160xf32, #tpu.memory_space<smem>>
    %118 = vector.broadcast %117 : f32 to vector<2x256xf32>
    %119 = arith.mulf %118, %4 : vector<2x256xf32>
    %120 = arith.addf %116, %119 : vector<2x256xf32>
    %c23 = arith.constant 23 : index
    %121 = memref.load %arg0[%c23] : memref<160xf32, #tpu.memory_space<smem>>
    %122 = vector.broadcast %121 : f32 to vector<2x256xf32>
    %123 = arith.mulf %122, %6 : vector<2x256xf32>
    %124 = arith.addf %120, %123 : vector<2x256xf32>
    %c31 = arith.constant 31 : index
    %125 = memref.load %arg0[%c31] : memref<160xf32, #tpu.memory_space<smem>>
    %126 = vector.broadcast %125 : f32 to vector<2x256xf32>
    %127 = arith.mulf %126, %8 : vector<2x256xf32>
    %128 = arith.addf %124, %127 : vector<2x256xf32>
    %129 = vector.shape_cast %23 : vector<2x256xf32> to vector<2x1x256xf32>
    %130 = vector.shape_cast %38 : vector<2x256xf32> to vector<2x1x256xf32>
    %131 = vector.shape_cast %53 : vector<2x256xf32> to vector<2x1x256xf32>
    %132 = vector.shape_cast %68 : vector<2x256xf32> to vector<2x1x256xf32>
    %133 = vector.shape_cast %83 : vector<2x256xf32> to vector<2x1x256xf32>
    %134 = vector.shape_cast %98 : vector<2x256xf32> to vector<2x1x256xf32>
    %135 = vector.shape_cast %113 : vector<2x256xf32> to vector<2x1x256xf32>
    %136 = vector.shape_cast %128 : vector<2x256xf32> to vector<2x1x256xf32>
    %137 = tpu.concatenate %129, %130, %131, %132, %133, %134, %135, %136 in 1 : vector<2x1x256xf32>, vector<2x1x256xf32>, vector<2x1x256xf32>, vector<2x1x256xf32>, vector<2x1x256xf32>, vector<2x1x256xf32>, vector<2x1x256xf32>, vector<2x1x256xf32> -> vector<2x8x256xf32>
    %c0_3 = arith.constant 0 : index
    %c0_4 = arith.constant 0 : index
    %138 = vector.load %arg2[%c0_3, %c0_4] : memref<24x2xf32, #tpu.memory_space<vmem>>, vector<8x1xf32>
    %139 = vector.shape_cast %138 : vector<8x1xf32> to vector<1x8x1xf32>
    %c0_5 = arith.constant 0 : index
    %c1_6 = arith.constant 1 : index
    %140 = vector.load %arg2[%c0_5, %c1_6] : memref<24x2xf32, #tpu.memory_space<vmem>>, vector<8x1xf32>
    %141 = vector.shape_cast %140 : vector<8x1xf32> to vector<1x8x1xf32>
    %cst = arith.constant dense<0.000000e+00> : vector<2x8xf32>
    %142 = vector.multi_reduction <add>, %137, %cst [2] : vector<2x8x256xf32> to vector<2x8xf32>
    %143 = vector.shape_cast %142 : vector<2x8xf32> to vector<2x8x1xf32>
    %cst_7 = arith.constant dense<0.000000e+00> : vector<8x1xf32>
    %144 = vector.multi_reduction <add>, %143, %cst_7 [0] : vector<2x8x1xf32> to vector<8x1xf32>
    %145 = vector.shape_cast %144 : vector<8x1xf32> to vector<1x8x1xf32>
    %cst_8 = arith.constant 0.001953125 : f32
    %146 = vector.broadcast %cst_8 : f32 to vector<1x8x1xf32>
    %147 = arith.mulf %145, %146 : vector<1x8x1xf32>
    %148 = vector.broadcast %147 : vector<1x8x1xf32> to vector<2x8x256xf32>
    %149 = arith.subf %137, %148 : vector<2x8x256xf32>
    %150 = arith.mulf %149, %149 : vector<2x8x256xf32>
    %cst_9 = arith.constant dense<0.000000e+00> : vector<2x8xf32>
    %151 = vector.multi_reduction <add>, %150, %cst_9 [2] : vector<2x8x256xf32> to vector<2x8xf32>
    %152 = vector.shape_cast %151 : vector<2x8xf32> to vector<2x8x1xf32>
    %cst_10 = arith.constant dense<0.000000e+00> : vector<8x1xf32>
    %153 = vector.multi_reduction <add>, %152, %cst_10 [0] : vector<2x8x1xf32> to vector<8x1xf32>
    %154 = vector.shape_cast %153 : vector<8x1xf32> to vector<1x8x1xf32>
    %cst_11 = arith.constant 0.001953125 : f32
    %155 = vector.broadcast %cst_11 : f32 to vector<1x8x1xf32>
    %156 = arith.mulf %154, %155 : vector<1x8x1xf32>
    %cst_12 = arith.constant 9.99999974E-6 : f32
    %157 = vector.broadcast %cst_12 : f32 to vector<1x8x1xf32>
    %158 = arith.addf %156, %157 : vector<1x8x1xf32>
    %159 = math.rsqrt %158 : vector<1x8x1xf32>
    %160 = arith.mulf %139, %159 : vector<1x8x1xf32>
    %161 = vector.broadcast %160 : vector<1x8x1xf32> to vector<2x8x256xf32>
    %162 = arith.mulf %149, %161 : vector<2x8x256xf32>
    %163 = vector.broadcast %141 : vector<1x8x1xf32> to vector<2x8x256xf32>
    %164 = arith.addf %162, %163 : vector<2x8x256xf32>
    %cst_13 = arith.constant 0.000000e+00 : f32
    %165 = vector.broadcast %cst_13 : f32 to vector<2x8x256xf32>
    %166 = arith.maximumf %164, %165 : vector<2x8x256xf32>
    %167 = vector.extract_strided_slice %166 {offsets = [0, 0, 0], sizes = [2, 1, 256], strides = [1, 1, 1]} : vector<2x8x256xf32> to vector<2x1x256xf32>
    %168 = vector.shape_cast %167 : vector<2x1x256xf32> to vector<2x256xf32>
    %169 = vector.extract_strided_slice %166 {offsets = [0, 1, 0], sizes = [2, 1, 256], strides = [1, 1, 1]} : vector<2x8x256xf32> to vector<2x1x256xf32>
    %170 = vector.shape_cast %169 : vector<2x1x256xf32> to vector<2x256xf32>
    %171 = vector.extract_strided_slice %166 {offsets = [0, 2, 0], sizes = [2, 1, 256], strides = [1, 1, 1]} : vector<2x8x256xf32> to vector<2x1x256xf32>
    %172 = vector.shape_cast %171 : vector<2x1x256xf32> to vector<2x256xf32>
    %173 = vector.extract_strided_slice %166 {offsets = [0, 3, 0], sizes = [2, 1, 256], strides = [1, 1, 1]} : vector<2x8x256xf32> to vector<2x1x256xf32>
    %174 = vector.shape_cast %173 : vector<2x1x256xf32> to vector<2x256xf32>
    %175 = vector.extract_strided_slice %166 {offsets = [0, 4, 0], sizes = [2, 1, 256], strides = [1, 1, 1]} : vector<2x8x256xf32> to vector<2x1x256xf32>
    %176 = vector.shape_cast %175 : vector<2x1x256xf32> to vector<2x256xf32>
    %177 = vector.extract_strided_slice %166 {offsets = [0, 5, 0], sizes = [2, 1, 256], strides = [1, 1, 1]} : vector<2x8x256xf32> to vector<2x1x256xf32>
    %178 = vector.shape_cast %177 : vector<2x1x256xf32> to vector<2x256xf32>
    %179 = vector.extract_strided_slice %166 {offsets = [0, 6, 0], sizes = [2, 1, 256], strides = [1, 1, 1]} : vector<2x8x256xf32> to vector<2x1x256xf32>
    %180 = vector.shape_cast %179 : vector<2x1x256xf32> to vector<2x256xf32>
    %181 = vector.extract_strided_slice %166 {offsets = [0, 7, 0], sizes = [2, 1, 256], strides = [1, 1, 1]} : vector<2x8x256xf32> to vector<2x1x256xf32>
    %182 = vector.shape_cast %181 : vector<2x1x256xf32> to vector<2x256xf32>
    %c32 = arith.constant 32 : index
    %183 = memref.load %arg0[%c32] : memref<160xf32, #tpu.memory_space<smem>>
    %184 = vector.broadcast %183 : f32 to vector<2x256xf32>
    %185 = arith.mulf %184, %168 : vector<2x256xf32>
    %c48 = arith.constant 48 : index
    %186 = memref.load %arg0[%c48] : memref<160xf32, #tpu.memory_space<smem>>
    %187 = vector.broadcast %186 : f32 to vector<2x256xf32>
    %188 = arith.mulf %187, %170 : vector<2x256xf32>
    %189 = arith.addf %185, %188 : vector<2x256xf32>
    %c64 = arith.constant 64 : index
    %190 = memref.load %arg0[%c64] : memref<160xf32, #tpu.memory_space<smem>>
    %191 = vector.broadcast %190 : f32 to vector<2x256xf32>
    %192 = arith.mulf %191, %172 : vector<2x256xf32>
    %193 = arith.addf %189, %192 : vector<2x256xf32>
    %c80 = arith.constant 80 : index
    %194 = memref.load %arg0[%c80] : memref<160xf32, #tpu.memory_space<smem>>
    %195 = vector.broadcast %194 : f32 to vector<2x256xf32>
    %196 = arith.mulf %195, %174 : vector<2x256xf32>
    %197 = arith.addf %193, %196 : vector<2x256xf32>
    %c96 = arith.constant 96 : index
    %198 = memref.load %arg0[%c96] : memref<160xf32, #tpu.memory_space<smem>>
    %199 = vector.broadcast %198 : f32 to vector<2x256xf32>
    %200 = arith.mulf %199, %176 : vector<2x256xf32>
    %201 = arith.addf %197, %200 : vector<2x256xf32>
    %c112 = arith.constant 112 : index
    %202 = memref.load %arg0[%c112] : memref<160xf32, #tpu.memory_space<smem>>
    %203 = vector.broadcast %202 : f32 to vector<2x256xf32>
    %204 = arith.mulf %203, %178 : vector<2x256xf32>
    %205 = arith.addf %201, %204 : vector<2x256xf32>
    %c128 = arith.constant 128 : index
    %206 = memref.load %arg0[%c128] : memref<160xf32, #tpu.memory_space<smem>>
    %207 = vector.broadcast %206 : f32 to vector<2x256xf32>
    %208 = arith.mulf %207, %180 : vector<2x256xf32>
    %209 = arith.addf %205, %208 : vector<2x256xf32>
    %c144 = arith.constant 144 : index
    %210 = memref.load %arg0[%c144] : memref<160xf32, #tpu.memory_space<smem>>
    %211 = vector.broadcast %210 : f32 to vector<2x256xf32>
    %212 = arith.mulf %211, %182 : vector<2x256xf32>
    %213 = arith.addf %209, %212 : vector<2x256xf32>
    %c33 = arith.constant 33 : index
    %214 = memref.load %arg0[%c33] : memref<160xf32, #tpu.memory_space<smem>>
    %215 = vector.broadcast %214 : f32 to vector<2x256xf32>
    %216 = arith.mulf %215, %168 : vector<2x256xf32>
    %c49 = arith.constant 49 : index
    %217 = memref.load %arg0[%c49] : memref<160xf32, #tpu.memory_space<smem>>
    %218 = vector.broadcast %217 : f32 to vector<2x256xf32>
    %219 = arith.mulf %218, %170 : vector<2x256xf32>
    %220 = arith.addf %216, %219 : vector<2x256xf32>
    %c65 = arith.constant 65 : index
    %221 = memref.load %arg0[%c65] : memref<160xf32, #tpu.memory_space<smem>>
    %222 = vector.broadcast %221 : f32 to vector<2x256xf32>
    %223 = arith.mulf %222, %172 : vector<2x256xf32>
    %224 = arith.addf %220, %223 : vector<2x256xf32>
    %c81 = arith.constant 81 : index
    %225 = memref.load %arg0[%c81] : memref<160xf32, #tpu.memory_space<smem>>
    %226 = vector.broadcast %225 : f32 to vector<2x256xf32>
    %227 = arith.mulf %226, %174 : vector<2x256xf32>
    %228 = arith.addf %224, %227 : vector<2x256xf32>
    %c97 = arith.constant 97 : index
    %229 = memref.load %arg0[%c97] : memref<160xf32, #tpu.memory_space<smem>>
    %230 = vector.broadcast %229 : f32 to vector<2x256xf32>
    %231 = arith.mulf %230, %176 : vector<2x256xf32>
    %232 = arith.addf %228, %231 : vector<2x256xf32>
    %c113 = arith.constant 113 : index
    %233 = memref.load %arg0[%c113] : memref<160xf32, #tpu.memory_space<smem>>
    %234 = vector.broadcast %233 : f32 to vector<2x256xf32>
    %235 = arith.mulf %234, %178 : vector<2x256xf32>
    %236 = arith.addf %232, %235 : vector<2x256xf32>
    %c129 = arith.constant 129 : index
    %237 = memref.load %arg0[%c129] : memref<160xf32, #tpu.memory_space<smem>>
    %238 = vector.broadcast %237 : f32 to vector<2x256xf32>
    %239 = arith.mulf %238, %180 : vector<2x256xf32>
    %240 = arith.addf %236, %239 : vector<2x256xf32>
    %c145 = arith.constant 145 : index
    %241 = memref.load %arg0[%c145] : memref<160xf32, #tpu.memory_space<smem>>
    %242 = vector.broadcast %241 : f32 to vector<2x256xf32>
    %243 = arith.mulf %242, %182 : vector<2x256xf32>
    %244 = arith.addf %240, %243 : vector<2x256xf32>
    %c34 = arith.constant 34 : index
    %245 = memref.load %arg0[%c34] : memref<160xf32, #tpu.memory_space<smem>>
    %246 = vector.broadcast %245 : f32 to vector<2x256xf32>
    %247 = arith.mulf %246, %168 : vector<2x256xf32>
    %c50 = arith.constant 50 : index
    %248 = memref.load %arg0[%c50] : memref<160xf32, #tpu.memory_space<smem>>
    %249 = vector.broadcast %248 : f32 to vector<2x256xf32>
    %250 = arith.mulf %249, %170 : vector<2x256xf32>
    %251 = arith.addf %247, %250 : vector<2x256xf32>
    %c66 = arith.constant 66 : index
    %252 = memref.load %arg0[%c66] : memref<160xf32, #tpu.memory_space<smem>>
    %253 = vector.broadcast %252 : f32 to vector<2x256xf32>
    %254 = arith.mulf %253, %172 : vector<2x256xf32>
    %255 = arith.addf %251, %254 : vector<2x256xf32>
    %c82 = arith.constant 82 : index
    %256 = memref.load %arg0[%c82] : memref<160xf32, #tpu.memory_space<smem>>
    %257 = vector.broadcast %256 : f32 to vector<2x256xf32>
    %258 = arith.mulf %257, %174 : vector<2x256xf32>
    %259 = arith.addf %255, %258 : vector<2x256xf32>
    %c98 = arith.constant 98 : index
    %260 = memref.load %arg0[%c98] : memref<160xf32, #tpu.memory_space<smem>>
    %261 = vector.broadcast %260 : f32 to vector<2x256xf32>
    %262 = arith.mulf %261, %176 : vector<2x256xf32>
    %263 = arith.addf %259, %262 : vector<2x256xf32>
    %c114 = arith.constant 114 : index
    %264 = memref.load %arg0[%c114] : memref<160xf32, #tpu.memory_space<smem>>
    %265 = vector.broadcast %264 : f32 to vector<2x256xf32>
    %266 = arith.mulf %265, %178 : vector<2x256xf32>
    %267 = arith.addf %263, %266 : vector<2x256xf32>
    %c130 = arith.constant 130 : index
    %268 = memref.load %arg0[%c130] : memref<160xf32, #tpu.memory_space<smem>>
    %269 = vector.broadcast %268 : f32 to vector<2x256xf32>
    %270 = arith.mulf %269, %180 : vector<2x256xf32>
    %271 = arith.addf %267, %270 : vector<2x256xf32>
    %c146 = arith.constant 146 : index
    %272 = memref.load %arg0[%c146] : memref<160xf32, #tpu.memory_space<smem>>
    %273 = vector.broadcast %272 : f32 to vector<2x256xf32>
    %274 = arith.mulf %273, %182 : vector<2x256xf32>
    %275 = arith.addf %271, %274 : vector<2x256xf32>
    %c35 = arith.constant 35 : index
    %276 = memref.load %arg0[%c35] : memref<160xf32, #tpu.memory_space<smem>>
    %277 = vector.broadcast %276 : f32 to vector<2x256xf32>
    %278 = arith.mulf %277, %168 : vector<2x256xf32>
    %c51 = arith.constant 51 : index
    %279 = memref.load %arg0[%c51] : memref<160xf32, #tpu.memory_space<smem>>
    %280 = vector.broadcast %279 : f32 to vector<2x256xf32>
    %281 = arith.mulf %280, %170 : vector<2x256xf32>
    %282 = arith.addf %278, %281 : vector<2x256xf32>
    %c67 = arith.constant 67 : index
    %283 = memref.load %arg0[%c67] : memref<160xf32, #tpu.memory_space<smem>>
    %284 = vector.broadcast %283 : f32 to vector<2x256xf32>
    %285 = arith.mulf %284, %172 : vector<2x256xf32>
    %286 = arith.addf %282, %285 : vector<2x256xf32>
    %c83 = arith.constant 83 : index
    %287 = memref.load %arg0[%c83] : memref<160xf32, #tpu.memory_space<smem>>
    %288 = vector.broadcast %287 : f32 to vector<2x256xf32>
    %289 = arith.mulf %288, %174 : vector<2x256xf32>
    %290 = arith.addf %286, %289 : vector<2x256xf32>
    %c99 = arith.constant 99 : index
    %291 = memref.load %arg0[%c99] : memref<160xf32, #tpu.memory_space<smem>>
    %292 = vector.broadcast %291 : f32 to vector<2x256xf32>
    %293 = arith.mulf %292, %176 : vector<2x256xf32>
    %294 = arith.addf %290, %293 : vector<2x256xf32>
    %c115 = arith.constant 115 : index
    %295 = memref.load %arg0[%c115] : memref<160xf32, #tpu.memory_space<smem>>
    %296 = vector.broadcast %295 : f32 to vector<2x256xf32>
    %297 = arith.mulf %296, %178 : vector<2x256xf32>
    %298 = arith.addf %294, %297 : vector<2x256xf32>
    %c131 = arith.constant 131 : index
    %299 = memref.load %arg0[%c131] : memref<160xf32, #tpu.memory_space<smem>>
    %300 = vector.broadcast %299 : f32 to vector<2x256xf32>
    %301 = arith.mulf %300, %180 : vector<2x256xf32>
    %302 = arith.addf %298, %301 : vector<2x256xf32>
    %c147 = arith.constant 147 : index
    %303 = memref.load %arg0[%c147] : memref<160xf32, #tpu.memory_space<smem>>
    %304 = vector.broadcast %303 : f32 to vector<2x256xf32>
    %305 = arith.mulf %304, %182 : vector<2x256xf32>
    %306 = arith.addf %302, %305 : vector<2x256xf32>
    %c36 = arith.constant 36 : index
    %307 = memref.load %arg0[%c36] : memref<160xf32, #tpu.memory_space<smem>>
    %308 = vector.broadcast %307 : f32 to vector<2x256xf32>
    %309 = arith.mulf %308, %168 : vector<2x256xf32>
    %c52 = arith.constant 52 : index
    %310 = memref.load %arg0[%c52] : memref<160xf32, #tpu.memory_space<smem>>
    %311 = vector.broadcast %310 : f32 to vector<2x256xf32>
    %312 = arith.mulf %311, %170 : vector<2x256xf32>
    %313 = arith.addf %309, %312 : vector<2x256xf32>
    %c68 = arith.constant 68 : index
    %314 = memref.load %arg0[%c68] : memref<160xf32, #tpu.memory_space<smem>>
    %315 = vector.broadcast %314 : f32 to vector<2x256xf32>
    %316 = arith.mulf %315, %172 : vector<2x256xf32>
    %317 = arith.addf %313, %316 : vector<2x256xf32>
    %c84 = arith.constant 84 : index
    %318 = memref.load %arg0[%c84] : memref<160xf32, #tpu.memory_space<smem>>
    %319 = vector.broadcast %318 : f32 to vector<2x256xf32>
    %320 = arith.mulf %319, %174 : vector<2x256xf32>
    %321 = arith.addf %317, %320 : vector<2x256xf32>
    %c100 = arith.constant 100 : index
    %322 = memref.load %arg0[%c100] : memref<160xf32, #tpu.memory_space<smem>>
    %323 = vector.broadcast %322 : f32 to vector<2x256xf32>
    %324 = arith.mulf %323, %176 : vector<2x256xf32>
    %325 = arith.addf %321, %324 : vector<2x256xf32>
    %c116 = arith.constant 116 : index
    %326 = memref.load %arg0[%c116] : memref<160xf32, #tpu.memory_space<smem>>
    %327 = vector.broadcast %326 : f32 to vector<2x256xf32>
    %328 = arith.mulf %327, %178 : vector<2x256xf32>
    %329 = arith.addf %325, %328 : vector<2x256xf32>
    %c132 = arith.constant 132 : index
    %330 = memref.load %arg0[%c132] : memref<160xf32, #tpu.memory_space<smem>>
    %331 = vector.broadcast %330 : f32 to vector<2x256xf32>
    %332 = arith.mulf %331, %180 : vector<2x256xf32>
    %333 = arith.addf %329, %332 : vector<2x256xf32>
    %c148 = arith.constant 148 : index
    %334 = memref.load %arg0[%c148] : memref<160xf32, #tpu.memory_space<smem>>
    %335 = vector.broadcast %334 : f32 to vector<2x256xf32>
    %336 = arith.mulf %335, %182 : vector<2x256xf32>
    %337 = arith.addf %333, %336 : vector<2x256xf32>
    %c37 = arith.constant 37 : index
    %338 = memref.load %arg0[%c37] : memref<160xf32, #tpu.memory_space<smem>>
    %339 = vector.broadcast %338 : f32 to vector<2x256xf32>
    %340 = arith.mulf %339, %168 : vector<2x256xf32>
    %c53 = arith.constant 53 : index
    %341 = memref.load %arg0[%c53] : memref<160xf32, #tpu.memory_space<smem>>
    %342 = vector.broadcast %341 : f32 to vector<2x256xf32>
    %343 = arith.mulf %342, %170 : vector<2x256xf32>
    %344 = arith.addf %340, %343 : vector<2x256xf32>
    %c69 = arith.constant 69 : index
    %345 = memref.load %arg0[%c69] : memref<160xf32, #tpu.memory_space<smem>>
    %346 = vector.broadcast %345 : f32 to vector<2x256xf32>
    %347 = arith.mulf %346, %172 : vector<2x256xf32>
    %348 = arith.addf %344, %347 : vector<2x256xf32>
    %c85 = arith.constant 85 : index
    %349 = memref.load %arg0[%c85] : memref<160xf32, #tpu.memory_space<smem>>
    %350 = vector.broadcast %349 : f32 to vector<2x256xf32>
    %351 = arith.mulf %350, %174 : vector<2x256xf32>
    %352 = arith.addf %348, %351 : vector<2x256xf32>
    %c101 = arith.constant 101 : index
    %353 = memref.load %arg0[%c101] : memref<160xf32, #tpu.memory_space<smem>>
    %354 = vector.broadcast %353 : f32 to vector<2x256xf32>
    %355 = arith.mulf %354, %176 : vector<2x256xf32>
    %356 = arith.addf %352, %355 : vector<2x256xf32>
    %c117 = arith.constant 117 : index
    %357 = memref.load %arg0[%c117] : memref<160xf32, #tpu.memory_space<smem>>
    %358 = vector.broadcast %357 : f32 to vector<2x256xf32>
    %359 = arith.mulf %358, %178 : vector<2x256xf32>
    %360 = arith.addf %356, %359 : vector<2x256xf32>
    %c133 = arith.constant 133 : index
    %361 = memref.load %arg0[%c133] : memref<160xf32, #tpu.memory_space<smem>>
    %362 = vector.broadcast %361 : f32 to vector<2x256xf32>
    %363 = arith.mulf %362, %180 : vector<2x256xf32>
    %364 = arith.addf %360, %363 : vector<2x256xf32>
    %c149 = arith.constant 149 : index
    %365 = memref.load %arg0[%c149] : memref<160xf32, #tpu.memory_space<smem>>
    %366 = vector.broadcast %365 : f32 to vector<2x256xf32>
    %367 = arith.mulf %366, %182 : vector<2x256xf32>
    %368 = arith.addf %364, %367 : vector<2x256xf32>
    %c38 = arith.constant 38 : index
    %369 = memref.load %arg0[%c38] : memref<160xf32, #tpu.memory_space<smem>>
    %370 = vector.broadcast %369 : f32 to vector<2x256xf32>
    %371 = arith.mulf %370, %168 : vector<2x256xf32>
    %c54 = arith.constant 54 : index
    %372 = memref.load %arg0[%c54] : memref<160xf32, #tpu.memory_space<smem>>
    %373 = vector.broadcast %372 : f32 to vector<2x256xf32>
    %374 = arith.mulf %373, %170 : vector<2x256xf32>
    %375 = arith.addf %371, %374 : vector<2x256xf32>
    %c70 = arith.constant 70 : index
    %376 = memref.load %arg0[%c70] : memref<160xf32, #tpu.memory_space<smem>>
    %377 = vector.broadcast %376 : f32 to vector<2x256xf32>
    %378 = arith.mulf %377, %172 : vector<2x256xf32>
    %379 = arith.addf %375, %378 : vector<2x256xf32>
    %c86 = arith.constant 86 : index
    %380 = memref.load %arg0[%c86] : memref<160xf32, #tpu.memory_space<smem>>
    %381 = vector.broadcast %380 : f32 to vector<2x256xf32>
    %382 = arith.mulf %381, %174 : vector<2x256xf32>
    %383 = arith.addf %379, %382 : vector<2x256xf32>
    %c102 = arith.constant 102 : index
    %384 = memref.load %arg0[%c102] : memref<160xf32, #tpu.memory_space<smem>>
    %385 = vector.broadcast %384 : f32 to vector<2x256xf32>
    %386 = arith.mulf %385, %176 : vector<2x256xf32>
    %387 = arith.addf %383, %386 : vector<2x256xf32>
    %c118 = arith.constant 118 : index
    %388 = memref.load %arg0[%c118] : memref<160xf32, #tpu.memory_space<smem>>
    %389 = vector.broadcast %388 : f32 to vector<2x256xf32>
    %390 = arith.mulf %389, %178 : vector<2x256xf32>
    %391 = arith.addf %387, %390 : vector<2x256xf32>
    %c134 = arith.constant 134 : index
    %392 = memref.load %arg0[%c134] : memref<160xf32, #tpu.memory_space<smem>>
    %393 = vector.broadcast %392 : f32 to vector<2x256xf32>
    %394 = arith.mulf %393, %180 : vector<2x256xf32>
    %395 = arith.addf %391, %394 : vector<2x256xf32>
    %c150 = arith.constant 150 : index
    %396 = memref.load %arg0[%c150] : memref<160xf32, #tpu.memory_space<smem>>
    %397 = vector.broadcast %396 : f32 to vector<2x256xf32>
    %398 = arith.mulf %397, %182 : vector<2x256xf32>
    %399 = arith.addf %395, %398 : vector<2x256xf32>
    %c39 = arith.constant 39 : index
    %400 = memref.load %arg0[%c39] : memref<160xf32, #tpu.memory_space<smem>>
    %401 = vector.broadcast %400 : f32 to vector<2x256xf32>
    %402 = arith.mulf %401, %168 : vector<2x256xf32>
    %c55 = arith.constant 55 : index
    %403 = memref.load %arg0[%c55] : memref<160xf32, #tpu.memory_space<smem>>
    %404 = vector.broadcast %403 : f32 to vector<2x256xf32>
    %405 = arith.mulf %404, %170 : vector<2x256xf32>
    %406 = arith.addf %402, %405 : vector<2x256xf32>
    %c71 = arith.constant 71 : index
    %407 = memref.load %arg0[%c71] : memref<160xf32, #tpu.memory_space<smem>>
    %408 = vector.broadcast %407 : f32 to vector<2x256xf32>
    %409 = arith.mulf %408, %172 : vector<2x256xf32>
    %410 = arith.addf %406, %409 : vector<2x256xf32>
    %c87 = arith.constant 87 : index
    %411 = memref.load %arg0[%c87] : memref<160xf32, #tpu.memory_space<smem>>
    %412 = vector.broadcast %411 : f32 to vector<2x256xf32>
    %413 = arith.mulf %412, %174 : vector<2x256xf32>
    %414 = arith.addf %410, %413 : vector<2x256xf32>
    %c103 = arith.constant 103 : index
    %415 = memref.load %arg0[%c103] : memref<160xf32, #tpu.memory_space<smem>>
    %416 = vector.broadcast %415 : f32 to vector<2x256xf32>
    %417 = arith.mulf %416, %176 : vector<2x256xf32>
    %418 = arith.addf %414, %417 : vector<2x256xf32>
    %c119 = arith.constant 119 : index
    %419 = memref.load %arg0[%c119] : memref<160xf32, #tpu.memory_space<smem>>
    %420 = vector.broadcast %419 : f32 to vector<2x256xf32>
    %421 = arith.mulf %420, %178 : vector<2x256xf32>
    %422 = arith.addf %418, %421 : vector<2x256xf32>
    %c135 = arith.constant 135 : index
    %423 = memref.load %arg0[%c135] : memref<160xf32, #tpu.memory_space<smem>>
    %424 = vector.broadcast %423 : f32 to vector<2x256xf32>
    %425 = arith.mulf %424, %180 : vector<2x256xf32>
    %426 = arith.addf %422, %425 : vector<2x256xf32>
    %c151 = arith.constant 151 : index
    %427 = memref.load %arg0[%c151] : memref<160xf32, #tpu.memory_space<smem>>
    %428 = vector.broadcast %427 : f32 to vector<2x256xf32>
    %429 = arith.mulf %428, %182 : vector<2x256xf32>
    %430 = arith.addf %426, %429 : vector<2x256xf32>
    %c40 = arith.constant 40 : index
    %431 = memref.load %arg0[%c40] : memref<160xf32, #tpu.memory_space<smem>>
    %432 = vector.broadcast %431 : f32 to vector<2x256xf32>
    %433 = arith.mulf %432, %168 : vector<2x256xf32>
    %c56 = arith.constant 56 : index
    %434 = memref.load %arg0[%c56] : memref<160xf32, #tpu.memory_space<smem>>
    %435 = vector.broadcast %434 : f32 to vector<2x256xf32>
    %436 = arith.mulf %435, %170 : vector<2x256xf32>
    %437 = arith.addf %433, %436 : vector<2x256xf32>
    %c72 = arith.constant 72 : index
    %438 = memref.load %arg0[%c72] : memref<160xf32, #tpu.memory_space<smem>>
    %439 = vector.broadcast %438 : f32 to vector<2x256xf32>
    %440 = arith.mulf %439, %172 : vector<2x256xf32>
    %441 = arith.addf %437, %440 : vector<2x256xf32>
    %c88 = arith.constant 88 : index
    %442 = memref.load %arg0[%c88] : memref<160xf32, #tpu.memory_space<smem>>
    %443 = vector.broadcast %442 : f32 to vector<2x256xf32>
    %444 = arith.mulf %443, %174 : vector<2x256xf32>
    %445 = arith.addf %441, %444 : vector<2x256xf32>
    %c104 = arith.constant 104 : index
    %446 = memref.load %arg0[%c104] : memref<160xf32, #tpu.memory_space<smem>>
    %447 = vector.broadcast %446 : f32 to vector<2x256xf32>
    %448 = arith.mulf %447, %176 : vector<2x256xf32>
    %449 = arith.addf %445, %448 : vector<2x256xf32>
    %c120 = arith.constant 120 : index
    %450 = memref.load %arg0[%c120] : memref<160xf32, #tpu.memory_space<smem>>
    %451 = vector.broadcast %450 : f32 to vector<2x256xf32>
    %452 = arith.mulf %451, %178 : vector<2x256xf32>
    %453 = arith.addf %449, %452 : vector<2x256xf32>
    %c136 = arith.constant 136 : index
    %454 = memref.load %arg0[%c136] : memref<160xf32, #tpu.memory_space<smem>>
    %455 = vector.broadcast %454 : f32 to vector<2x256xf32>
    %456 = arith.mulf %455, %180 : vector<2x256xf32>
    %457 = arith.addf %453, %456 : vector<2x256xf32>
    %c152 = arith.constant 152 : index
    %458 = memref.load %arg0[%c152] : memref<160xf32, #tpu.memory_space<smem>>
    %459 = vector.broadcast %458 : f32 to vector<2x256xf32>
    %460 = arith.mulf %459, %182 : vector<2x256xf32>
    %461 = arith.addf %457, %460 : vector<2x256xf32>
    %c41 = arith.constant 41 : index
    %462 = memref.load %arg0[%c41] : memref<160xf32, #tpu.memory_space<smem>>
    %463 = vector.broadcast %462 : f32 to vector<2x256xf32>
    %464 = arith.mulf %463, %168 : vector<2x256xf32>
    %c57 = arith.constant 57 : index
    %465 = memref.load %arg0[%c57] : memref<160xf32, #tpu.memory_space<smem>>
    %466 = vector.broadcast %465 : f32 to vector<2x256xf32>
    %467 = arith.mulf %466, %170 : vector<2x256xf32>
    %468 = arith.addf %464, %467 : vector<2x256xf32>
    %c73 = arith.constant 73 : index
    %469 = memref.load %arg0[%c73] : memref<160xf32, #tpu.memory_space<smem>>
    %470 = vector.broadcast %469 : f32 to vector<2x256xf32>
    %471 = arith.mulf %470, %172 : vector<2x256xf32>
    %472 = arith.addf %468, %471 : vector<2x256xf32>
    %c89 = arith.constant 89 : index
    %473 = memref.load %arg0[%c89] : memref<160xf32, #tpu.memory_space<smem>>
    %474 = vector.broadcast %473 : f32 to vector<2x256xf32>
    %475 = arith.mulf %474, %174 : vector<2x256xf32>
    %476 = arith.addf %472, %475 : vector<2x256xf32>
    %c105 = arith.constant 105 : index
    %477 = memref.load %arg0[%c105] : memref<160xf32, #tpu.memory_space<smem>>
    %478 = vector.broadcast %477 : f32 to vector<2x256xf32>
    %479 = arith.mulf %478, %176 : vector<2x256xf32>
    %480 = arith.addf %476, %479 : vector<2x256xf32>
    %c121 = arith.constant 121 : index
    %481 = memref.load %arg0[%c121] : memref<160xf32, #tpu.memory_space<smem>>
    %482 = vector.broadcast %481 : f32 to vector<2x256xf32>
    %483 = arith.mulf %482, %178 : vector<2x256xf32>
    %484 = arith.addf %480, %483 : vector<2x256xf32>
    %c137 = arith.constant 137 : index
    %485 = memref.load %arg0[%c137] : memref<160xf32, #tpu.memory_space<smem>>
    %486 = vector.broadcast %485 : f32 to vector<2x256xf32>
    %487 = arith.mulf %486, %180 : vector<2x256xf32>
    %488 = arith.addf %484, %487 : vector<2x256xf32>
    %c153 = arith.constant 153 : index
    %489 = memref.load %arg0[%c153] : memref<160xf32, #tpu.memory_space<smem>>
    %490 = vector.broadcast %489 : f32 to vector<2x256xf32>
    %491 = arith.mulf %490, %182 : vector<2x256xf32>
    %492 = arith.addf %488, %491 : vector<2x256xf32>
    %c42 = arith.constant 42 : index
    %493 = memref.load %arg0[%c42] : memref<160xf32, #tpu.memory_space<smem>>
    %494 = vector.broadcast %493 : f32 to vector<2x256xf32>
    %495 = arith.mulf %494, %168 : vector<2x256xf32>
    %c58 = arith.constant 58 : index
    %496 = memref.load %arg0[%c58] : memref<160xf32, #tpu.memory_space<smem>>
    %497 = vector.broadcast %496 : f32 to vector<2x256xf32>
    %498 = arith.mulf %497, %170 : vector<2x256xf32>
    %499 = arith.addf %495, %498 : vector<2x256xf32>
    %c74 = arith.constant 74 : index
    %500 = memref.load %arg0[%c74] : memref<160xf32, #tpu.memory_space<smem>>
    %501 = vector.broadcast %500 : f32 to vector<2x256xf32>
    %502 = arith.mulf %501, %172 : vector<2x256xf32>
    %503 = arith.addf %499, %502 : vector<2x256xf32>
    %c90 = arith.constant 90 : index
    %504 = memref.load %arg0[%c90] : memref<160xf32, #tpu.memory_space<smem>>
    %505 = vector.broadcast %504 : f32 to vector<2x256xf32>
    %506 = arith.mulf %505, %174 : vector<2x256xf32>
    %507 = arith.addf %503, %506 : vector<2x256xf32>
    %c106 = arith.constant 106 : index
    %508 = memref.load %arg0[%c106] : memref<160xf32, #tpu.memory_space<smem>>
    %509 = vector.broadcast %508 : f32 to vector<2x256xf32>
    %510 = arith.mulf %509, %176 : vector<2x256xf32>
    %511 = arith.addf %507, %510 : vector<2x256xf32>
    %c122 = arith.constant 122 : index
    %512 = memref.load %arg0[%c122] : memref<160xf32, #tpu.memory_space<smem>>
    %513 = vector.broadcast %512 : f32 to vector<2x256xf32>
    %514 = arith.mulf %513, %178 : vector<2x256xf32>
    %515 = arith.addf %511, %514 : vector<2x256xf32>
    %c138 = arith.constant 138 : index
    %516 = memref.load %arg0[%c138] : memref<160xf32, #tpu.memory_space<smem>>
    %517 = vector.broadcast %516 : f32 to vector<2x256xf32>
    %518 = arith.mulf %517, %180 : vector<2x256xf32>
    %519 = arith.addf %515, %518 : vector<2x256xf32>
    %c154 = arith.constant 154 : index
    %520 = memref.load %arg0[%c154] : memref<160xf32, #tpu.memory_space<smem>>
    %521 = vector.broadcast %520 : f32 to vector<2x256xf32>
    %522 = arith.mulf %521, %182 : vector<2x256xf32>
    %523 = arith.addf %519, %522 : vector<2x256xf32>
    %c43 = arith.constant 43 : index
    %524 = memref.load %arg0[%c43] : memref<160xf32, #tpu.memory_space<smem>>
    %525 = vector.broadcast %524 : f32 to vector<2x256xf32>
    %526 = arith.mulf %525, %168 : vector<2x256xf32>
    %c59 = arith.constant 59 : index
    %527 = memref.load %arg0[%c59] : memref<160xf32, #tpu.memory_space<smem>>
    %528 = vector.broadcast %527 : f32 to vector<2x256xf32>
    %529 = arith.mulf %528, %170 : vector<2x256xf32>
    %530 = arith.addf %526, %529 : vector<2x256xf32>
    %c75 = arith.constant 75 : index
    %531 = memref.load %arg0[%c75] : memref<160xf32, #tpu.memory_space<smem>>
    %532 = vector.broadcast %531 : f32 to vector<2x256xf32>
    %533 = arith.mulf %532, %172 : vector<2x256xf32>
    %534 = arith.addf %530, %533 : vector<2x256xf32>
    %c91 = arith.constant 91 : index
    %535 = memref.load %arg0[%c91] : memref<160xf32, #tpu.memory_space<smem>>
    %536 = vector.broadcast %535 : f32 to vector<2x256xf32>
    %537 = arith.mulf %536, %174 : vector<2x256xf32>
    %538 = arith.addf %534, %537 : vector<2x256xf32>
    %c107 = arith.constant 107 : index
    %539 = memref.load %arg0[%c107] : memref<160xf32, #tpu.memory_space<smem>>
    %540 = vector.broadcast %539 : f32 to vector<2x256xf32>
    %541 = arith.mulf %540, %176 : vector<2x256xf32>
    %542 = arith.addf %538, %541 : vector<2x256xf32>
    %c123 = arith.constant 123 : index
    %543 = memref.load %arg0[%c123] : memref<160xf32, #tpu.memory_space<smem>>
    %544 = vector.broadcast %543 : f32 to vector<2x256xf32>
    %545 = arith.mulf %544, %178 : vector<2x256xf32>
    %546 = arith.addf %542, %545 : vector<2x256xf32>
    %c139 = arith.constant 139 : index
    %547 = memref.load %arg0[%c139] : memref<160xf32, #tpu.memory_space<smem>>
    %548 = vector.broadcast %547 : f32 to vector<2x256xf32>
    %549 = arith.mulf %548, %180 : vector<2x256xf32>
    %550 = arith.addf %546, %549 : vector<2x256xf32>
    %c155 = arith.constant 155 : index
    %551 = memref.load %arg0[%c155] : memref<160xf32, #tpu.memory_space<smem>>
    %552 = vector.broadcast %551 : f32 to vector<2x256xf32>
    %553 = arith.mulf %552, %182 : vector<2x256xf32>
    %554 = arith.addf %550, %553 : vector<2x256xf32>
    %c44 = arith.constant 44 : index
    %555 = memref.load %arg0[%c44] : memref<160xf32, #tpu.memory_space<smem>>
    %556 = vector.broadcast %555 : f32 to vector<2x256xf32>
    %557 = arith.mulf %556, %168 : vector<2x256xf32>
    %c60 = arith.constant 60 : index
    %558 = memref.load %arg0[%c60] : memref<160xf32, #tpu.memory_space<smem>>
    %559 = vector.broadcast %558 : f32 to vector<2x256xf32>
    %560 = arith.mulf %559, %170 : vector<2x256xf32>
    %561 = arith.addf %557, %560 : vector<2x256xf32>
    %c76 = arith.constant 76 : index
    %562 = memref.load %arg0[%c76] : memref<160xf32, #tpu.memory_space<smem>>
    %563 = vector.broadcast %562 : f32 to vector<2x256xf32>
    %564 = arith.mulf %563, %172 : vector<2x256xf32>
    %565 = arith.addf %561, %564 : vector<2x256xf32>
    %c92 = arith.constant 92 : index
    %566 = memref.load %arg0[%c92] : memref<160xf32, #tpu.memory_space<smem>>
    %567 = vector.broadcast %566 : f32 to vector<2x256xf32>
    %568 = arith.mulf %567, %174 : vector<2x256xf32>
    %569 = arith.addf %565, %568 : vector<2x256xf32>
    %c108 = arith.constant 108 : index
    %570 = memref.load %arg0[%c108] : memref<160xf32, #tpu.memory_space<smem>>
    %571 = vector.broadcast %570 : f32 to vector<2x256xf32>
    %572 = arith.mulf %571, %176 : vector<2x256xf32>
    %573 = arith.addf %569, %572 : vector<2x256xf32>
    %c124 = arith.constant 124 : index
    %574 = memref.load %arg0[%c124] : memref<160xf32, #tpu.memory_space<smem>>
    %575 = vector.broadcast %574 : f32 to vector<2x256xf32>
    %576 = arith.mulf %575, %178 : vector<2x256xf32>
    %577 = arith.addf %573, %576 : vector<2x256xf32>
    %c140 = arith.constant 140 : index
    %578 = memref.load %arg0[%c140] : memref<160xf32, #tpu.memory_space<smem>>
    %579 = vector.broadcast %578 : f32 to vector<2x256xf32>
    %580 = arith.mulf %579, %180 : vector<2x256xf32>
    %581 = arith.addf %577, %580 : vector<2x256xf32>
    %c156 = arith.constant 156 : index
    %582 = memref.load %arg0[%c156] : memref<160xf32, #tpu.memory_space<smem>>
    %583 = vector.broadcast %582 : f32 to vector<2x256xf32>
    %584 = arith.mulf %583, %182 : vector<2x256xf32>
    %585 = arith.addf %581, %584 : vector<2x256xf32>
    %c45 = arith.constant 45 : index
    %586 = memref.load %arg0[%c45] : memref<160xf32, #tpu.memory_space<smem>>
    %587 = vector.broadcast %586 : f32 to vector<2x256xf32>
    %588 = arith.mulf %587, %168 : vector<2x256xf32>
    %c61 = arith.constant 61 : index
    %589 = memref.load %arg0[%c61] : memref<160xf32, #tpu.memory_space<smem>>
    %590 = vector.broadcast %589 : f32 to vector<2x256xf32>
    %591 = arith.mulf %590, %170 : vector<2x256xf32>
    %592 = arith.addf %588, %591 : vector<2x256xf32>
    %c77 = arith.constant 77 : index
    %593 = memref.load %arg0[%c77] : memref<160xf32, #tpu.memory_space<smem>>
    %594 = vector.broadcast %593 : f32 to vector<2x256xf32>
    %595 = arith.mulf %594, %172 : vector<2x256xf32>
    %596 = arith.addf %592, %595 : vector<2x256xf32>
    %c93 = arith.constant 93 : index
    %597 = memref.load %arg0[%c93] : memref<160xf32, #tpu.memory_space<smem>>
    %598 = vector.broadcast %597 : f32 to vector<2x256xf32>
    %599 = arith.mulf %598, %174 : vector<2x256xf32>
    %600 = arith.addf %596, %599 : vector<2x256xf32>
    %c109 = arith.constant 109 : index
    %601 = memref.load %arg0[%c109] : memref<160xf32, #tpu.memory_space<smem>>
    %602 = vector.broadcast %601 : f32 to vector<2x256xf32>
    %603 = arith.mulf %602, %176 : vector<2x256xf32>
    %604 = arith.addf %600, %603 : vector<2x256xf32>
    %c125 = arith.constant 125 : index
    %605 = memref.load %arg0[%c125] : memref<160xf32, #tpu.memory_space<smem>>
    %606 = vector.broadcast %605 : f32 to vector<2x256xf32>
    %607 = arith.mulf %606, %178 : vector<2x256xf32>
    %608 = arith.addf %604, %607 : vector<2x256xf32>
    %c141 = arith.constant 141 : index
    %609 = memref.load %arg0[%c141] : memref<160xf32, #tpu.memory_space<smem>>
    %610 = vector.broadcast %609 : f32 to vector<2x256xf32>
    %611 = arith.mulf %610, %180 : vector<2x256xf32>
    %612 = arith.addf %608, %611 : vector<2x256xf32>
    %c157 = arith.constant 157 : index
    %613 = memref.load %arg0[%c157] : memref<160xf32, #tpu.memory_space<smem>>
    %614 = vector.broadcast %613 : f32 to vector<2x256xf32>
    %615 = arith.mulf %614, %182 : vector<2x256xf32>
    %616 = arith.addf %612, %615 : vector<2x256xf32>
    %c46 = arith.constant 46 : index
    %617 = memref.load %arg0[%c46] : memref<160xf32, #tpu.memory_space<smem>>
    %618 = vector.broadcast %617 : f32 to vector<2x256xf32>
    %619 = arith.mulf %618, %168 : vector<2x256xf32>
    %c62 = arith.constant 62 : index
    %620 = memref.load %arg0[%c62] : memref<160xf32, #tpu.memory_space<smem>>
    %621 = vector.broadcast %620 : f32 to vector<2x256xf32>
    %622 = arith.mulf %621, %170 : vector<2x256xf32>
    %623 = arith.addf %619, %622 : vector<2x256xf32>
    %c78 = arith.constant 78 : index
    %624 = memref.load %arg0[%c78] : memref<160xf32, #tpu.memory_space<smem>>
    %625 = vector.broadcast %624 : f32 to vector<2x256xf32>
    %626 = arith.mulf %625, %172 : vector<2x256xf32>
    %627 = arith.addf %623, %626 : vector<2x256xf32>
    %c94 = arith.constant 94 : index
    %628 = memref.load %arg0[%c94] : memref<160xf32, #tpu.memory_space<smem>>
    %629 = vector.broadcast %628 : f32 to vector<2x256xf32>
    %630 = arith.mulf %629, %174 : vector<2x256xf32>
    %631 = arith.addf %627, %630 : vector<2x256xf32>
    %c110 = arith.constant 110 : index
    %632 = memref.load %arg0[%c110] : memref<160xf32, #tpu.memory_space<smem>>
    %633 = vector.broadcast %632 : f32 to vector<2x256xf32>
    %634 = arith.mulf %633, %176 : vector<2x256xf32>
    %635 = arith.addf %631, %634 : vector<2x256xf32>
    %c126 = arith.constant 126 : index
    %636 = memref.load %arg0[%c126] : memref<160xf32, #tpu.memory_space<smem>>
    %637 = vector.broadcast %636 : f32 to vector<2x256xf32>
    %638 = arith.mulf %637, %178 : vector<2x256xf32>
    %639 = arith.addf %635, %638 : vector<2x256xf32>
    %c142 = arith.constant 142 : index
    %640 = memref.load %arg0[%c142] : memref<160xf32, #tpu.memory_space<smem>>
    %641 = vector.broadcast %640 : f32 to vector<2x256xf32>
    %642 = arith.mulf %641, %180 : vector<2x256xf32>
    %643 = arith.addf %639, %642 : vector<2x256xf32>
    %c158 = arith.constant 158 : index
    %644 = memref.load %arg0[%c158] : memref<160xf32, #tpu.memory_space<smem>>
    %645 = vector.broadcast %644 : f32 to vector<2x256xf32>
    %646 = arith.mulf %645, %182 : vector<2x256xf32>
    %647 = arith.addf %643, %646 : vector<2x256xf32>
    %c47 = arith.constant 47 : index
    %648 = memref.load %arg0[%c47] : memref<160xf32, #tpu.memory_space<smem>>
    %649 = vector.broadcast %648 : f32 to vector<2x256xf32>
    %650 = arith.mulf %649, %168 : vector<2x256xf32>
    %c63 = arith.constant 63 : index
    %651 = memref.load %arg0[%c63] : memref<160xf32, #tpu.memory_space<smem>>
    %652 = vector.broadcast %651 : f32 to vector<2x256xf32>
    %653 = arith.mulf %652, %170 : vector<2x256xf32>
    %654 = arith.addf %650, %653 : vector<2x256xf32>
    %c79 = arith.constant 79 : index
    %655 = memref.load %arg0[%c79] : memref<160xf32, #tpu.memory_space<smem>>
    %656 = vector.broadcast %655 : f32 to vector<2x256xf32>
    %657 = arith.mulf %656, %172 : vector<2x256xf32>
    %658 = arith.addf %654, %657 : vector<2x256xf32>
    %c95 = arith.constant 95 : index
    %659 = memref.load %arg0[%c95] : memref<160xf32, #tpu.memory_space<smem>>
    %660 = vector.broadcast %659 : f32 to vector<2x256xf32>
    %661 = arith.mulf %660, %174 : vector<2x256xf32>
    %662 = arith.addf %658, %661 : vector<2x256xf32>
    %c111 = arith.constant 111 : index
    %663 = memref.load %arg0[%c111] : memref<160xf32, #tpu.memory_space<smem>>
    %664 = vector.broadcast %663 : f32 to vector<2x256xf32>
    %665 = arith.mulf %664, %176 : vector<2x256xf32>
    %666 = arith.addf %662, %665 : vector<2x256xf32>
    %c127 = arith.constant 127 : index
    %667 = memref.load %arg0[%c127] : memref<160xf32, #tpu.memory_space<smem>>
    %668 = vector.broadcast %667 : f32 to vector<2x256xf32>
    %669 = arith.mulf %668, %178 : vector<2x256xf32>
    %670 = arith.addf %666, %669 : vector<2x256xf32>
    %c143 = arith.constant 143 : index
    %671 = memref.load %arg0[%c143] : memref<160xf32, #tpu.memory_space<smem>>
    %672 = vector.broadcast %671 : f32 to vector<2x256xf32>
    %673 = arith.mulf %672, %180 : vector<2x256xf32>
    %674 = arith.addf %670, %673 : vector<2x256xf32>
    %c159 = arith.constant 159 : index
    %675 = memref.load %arg0[%c159] : memref<160xf32, #tpu.memory_space<smem>>
    %676 = vector.broadcast %675 : f32 to vector<2x256xf32>
    %677 = arith.mulf %676, %182 : vector<2x256xf32>
    %678 = arith.addf %674, %677 : vector<2x256xf32>
    %679 = vector.shape_cast %213 : vector<2x256xf32> to vector<2x1x256xf32>
    %680 = vector.shape_cast %244 : vector<2x256xf32> to vector<2x1x256xf32>
    %681 = vector.shape_cast %275 : vector<2x256xf32> to vector<2x1x256xf32>
    %682 = vector.shape_cast %306 : vector<2x256xf32> to vector<2x1x256xf32>
    %683 = vector.shape_cast %337 : vector<2x256xf32> to vector<2x1x256xf32>
    %684 = vector.shape_cast %368 : vector<2x256xf32> to vector<2x1x256xf32>
    %685 = vector.shape_cast %399 : vector<2x256xf32> to vector<2x1x256xf32>
    %686 = vector.shape_cast %430 : vector<2x256xf32> to vector<2x1x256xf32>
    %687 = vector.shape_cast %461 : vector<2x256xf32> to vector<2x1x256xf32>
    %688 = vector.shape_cast %492 : vector<2x256xf32> to vector<2x1x256xf32>
    %689 = vector.shape_cast %523 : vector<2x256xf32> to vector<2x1x256xf32>
    %690 = vector.shape_cast %554 : vector<2x256xf32> to vector<2x1x256xf32>
    %691 = vector.shape_cast %585 : vector<2x256xf32> to vector<2x1x256xf32>
    %692 = vector.shape_cast %616 : vector<2x256xf32> to vector<2x1x256xf32>
    %693 = vector.shape_cast %647 : vector<2x256xf32> to vector<2x1x256xf32>
    %694 = vector.shape_cast %678 : vector<2x256xf32> to vector<2x1x256xf32>
    %695 = tpu.concatenate %679, %680, %681, %682, %683, %684, %685, %686, %687, %688, %689, %690, %691, %692, %693, %694 in 1 : vector<2x1x256xf32>, vector<2x1x256xf32>, vector<2x1x256xf32>, vector<2x1x256xf32>, vector<2x1x256xf32>, vector<2x1x256xf32>, vector<2x1x256xf32>, vector<2x1x256xf32>, vector<2x1x256xf32>, vector<2x1x256xf32>, vector<2x1x256xf32>, vector<2x1x256xf32>, vector<2x1x256xf32>, vector<2x1x256xf32>, vector<2x1x256xf32>, vector<2x1x256xf32> -> vector<2x16x256xf32>
    %c8_14 = arith.constant 8 : index
    %c0_15 = arith.constant 0 : index
    %696 = vector.load %arg2[%c8_14, %c0_15] : memref<24x2xf32, #tpu.memory_space<vmem>>, vector<16x1xf32>
    %697 = vector.shape_cast %696 : vector<16x1xf32> to vector<1x16x1xf32>
    %c8_16 = arith.constant 8 : index
    %c1_17 = arith.constant 1 : index
    %698 = vector.load %arg2[%c8_16, %c1_17] : memref<24x2xf32, #tpu.memory_space<vmem>>, vector<16x1xf32>
    %699 = vector.shape_cast %698 : vector<16x1xf32> to vector<1x16x1xf32>
    %cst_18 = arith.constant dense<0.000000e+00> : vector<2x16xf32>
    %700 = vector.multi_reduction <add>, %695, %cst_18 [2] : vector<2x16x256xf32> to vector<2x16xf32>
    %701 = vector.shape_cast %700 : vector<2x16xf32> to vector<2x16x1xf32>
    %cst_19 = arith.constant dense<0.000000e+00> : vector<16x1xf32>
    %702 = vector.multi_reduction <add>, %701, %cst_19 [0] : vector<2x16x1xf32> to vector<16x1xf32>
    %703 = vector.shape_cast %702 : vector<16x1xf32> to vector<1x16x1xf32>
    %cst_20 = arith.constant 0.001953125 : f32
    %704 = vector.broadcast %cst_20 : f32 to vector<1x16x1xf32>
    %705 = arith.mulf %703, %704 : vector<1x16x1xf32>
    %706 = vector.broadcast %705 : vector<1x16x1xf32> to vector<2x16x256xf32>
    %707 = arith.subf %695, %706 : vector<2x16x256xf32>
    %708 = arith.mulf %707, %707 : vector<2x16x256xf32>
    %cst_21 = arith.constant dense<0.000000e+00> : vector<2x16xf32>
    %709 = vector.multi_reduction <add>, %708, %cst_21 [2] : vector<2x16x256xf32> to vector<2x16xf32>
    %710 = vector.shape_cast %709 : vector<2x16xf32> to vector<2x16x1xf32>
    %cst_22 = arith.constant dense<0.000000e+00> : vector<16x1xf32>
    %711 = vector.multi_reduction <add>, %710, %cst_22 [0] : vector<2x16x1xf32> to vector<16x1xf32>
    %712 = vector.shape_cast %711 : vector<16x1xf32> to vector<1x16x1xf32>
    %cst_23 = arith.constant 0.001953125 : f32
    %713 = vector.broadcast %cst_23 : f32 to vector<1x16x1xf32>
    %714 = arith.mulf %712, %713 : vector<1x16x1xf32>
    %cst_24 = arith.constant 9.99999974E-6 : f32
    %715 = vector.broadcast %cst_24 : f32 to vector<1x16x1xf32>
    %716 = arith.addf %714, %715 : vector<1x16x1xf32>
    %717 = math.rsqrt %716 : vector<1x16x1xf32>
    %718 = arith.mulf %697, %717 : vector<1x16x1xf32>
    %719 = vector.broadcast %718 : vector<1x16x1xf32> to vector<2x16x256xf32>
    %720 = arith.mulf %707, %719 : vector<2x16x256xf32>
    %721 = vector.broadcast %699 : vector<1x16x1xf32> to vector<2x16x256xf32>
    %722 = arith.addf %720, %721 : vector<2x16x256xf32>
    %cst_25 = arith.constant 0.000000e+00 : f32
    %723 = vector.broadcast %cst_25 : f32 to vector<2x16x256xf32>
    %724 = arith.maximumf %722, %723 : vector<2x16x256xf32>
    %c0_26 = arith.constant 0 : index
    %c0_27 = arith.constant 0 : index
    %c0_28 = arith.constant 0 : index
    %725 = vector.load %arg3[%c0_26, %c0_27, %c0_28] : memref<2x16x256xf32, #tpu.memory_space<vmem>>, vector<2x16x256xf32>
    tpu.vector_store %arg3[%c0_26, %c0_27, %c0_28], %724 {strides = array<i32>} : memref<2x16x256xf32, #tpu.memory_space<vmem>>, vector<2x16x256xf32>,
    return
  }
}

</mosaic_0001>

<bundles_post_ra>
// kernel: mlp_forward.1
= control target key start
LH: loop header
LB: loop body
LE: loop exit
PB: predicated region body
PF: predicated region fallthrough
CT: control target
= control target key end

     0   :  { %s6178_s0 = inlined_call_operand.vmem [shape: f32[160], index: 0, kind: input, shape index: {}]   ;;  %s6179_s1 = inlined_call_operand.vmem [shape: f32[2,4,256], index: 1, kind: input, shape index: {}]   ;;  %s6180_s2 = inlined_call_operand.vmem [shape: f32[24,2], index: 2, kind: input, shape index: {}]   ;;  %s6181_s3 = inlined_call_operand.vmem [shape: f32[2,16,256], index: 3, kind: output, shape index: {}]  }
   0x1   :  { %6417 = sst [smem:[#allocation152_spill]] %s6180_s2 }
   0x2   :  { %6418 = sst [smem:[#allocation153_spill]] %s6181_s3 }
   0x3   :  { %8 = vsyncpa [#allocation3], 0  ;;  %s15_s14 = sshll.u32 %s6178_s0, 4  ;;  %s16_s14 = int_to_ptr.vmem [resolvable:$true] %s15_s14 }
   0x4   :  { %s3776_s15 = scalar_lea.vmem %s16_s14, 32  ;;  %p3781_p1 = scmp.lt.s32.totalorder %s16_s14, %s16_s14 }
   0x5   :  { %p3777_p0 = scmp.ne.s32.totalorder %s16_s14, %s3776_s15  ;;  %p3782_p2 = scmp.lt.s32.totalorder %s3776_s15, %s3776_s15 }
   0x7   :  { %p3783_p3 = por %p3782_p2, %p3781_p1 }
   0x9   :  { %p3784_p4 = pnand %p3783_p3, %p3777_p0 }
   0xb   :  { %3787 = shalt.err (!%p3784_p4)
}
   0xc   :  { %s3790_s16 = smov [#allocation2]  }
   0xd   :  { %18 = dma.vmem_to_smem %s16_s14, 32, %s3790_s16, [#allocation3]  }
   0xe   :  { %3788 = dma.done.wait [#allocation3], 32  }
   0xf   :  { %3789 = vsyncadd [#allocation3], 4294967264 }
  0x10   :  { %26 = sfence }
  0x11   :  { %s29_s17 = sld [smem:[#allocation2]]  ;;  %v399_v0 = vlaneseq  ;;  %v3823_v2 = vld [vmem:[%s6179_s1] sm:$0xff]  ;;  %v3830_v3 = vld [vmem:[%s6179_s1 + $0x8] sm:$0xff]  ;;  %vm573_vm0 = vcmask 1040384   ;;  %vm578_vm1 = vcmask 1041408   ;;  %vm583_vm2 = vcmask 1042432  }
  0x12   :  { %s3555_s18 = sld [smem:[#allocation2 + $0x8]]  ;;  %vm588_vm3 = vcmask 1043456   ;;  %vm593_vm4 = vcmask 1044480   ;;  %vm598_vm5 = vcmask 1045504   ;;  %vm603_vm6 = vcmask 1046528  }
  0x13   :  { %s3558_s19 = sld [smem:[#allocation2 + $0x10]]  ;;  %v400_v1 = vshrl.u32 %v399_v0, 7 }
  0x14   :  { %s3816_s20 = sld [smem:[#allocation2 + $0x18]] }
  0x15   :  { %s3818_s0 = sld [smem:[#allocation2 + $0x1]]  ;;  %v3836_v6 = vsub.s32 0, %v400_v1  ;;  %v3838_v7 = vsub.s32 4, %v400_v1 }
  0x16   :  { %s3825_s23 = sld [smem:[#allocation2 + $0x9]] }
  0x17   :  { %v30_v4 = vstv %s29_s17  ;;  %s3832_s26 = sld [smem:[#allocation2 + $0x11]] }
  0x18   :  { %v34_v5 = vstv %s3555_s18  ;;  %s3834_s27 = sld [smem:[#allocation2 + $0x19]]  ;;  %v31_v8 = vmul.f32 %v30_v4, %v3823_v2  ;;  %v32_v14 = vmul.f32 %v30_v4, %v3830_v3 }
  0x19   :  { %v35_v9 = vmul.f32 %v34_v5, %v3823_v2  ;;  %v48_v10 = vstv %s3558_s19  ;;  %s3842_s28 = sld [smem:[#allocation2 + $0x2]]  ;;  %v36_v11 = vmul.f32 %v34_v5, %v3830_v3 }
  0x1a   :  { %v49_v12 = vmul.f32 %v48_v10, %v3823_v2  ;;  %v62_v13 = vstv %s3816_s20  ;;  %s3847_s1 = sld [smem:[#allocation2 + $0xa]]  ;;  %v50_v15 = vmul.f32 %v48_v10, %v3830_v3 }
  0x1b   :  { %v3556_v16 = vrot.slane %v35_v9, 9  ;;  %v63_v17 = vmul.f32 %v62_v13, %v3823_v2  ;;  %v76_v18 = vstv %s3818_s0  ;;  %s3853_s29 = sld [smem:[#allocation2 + $0x12]]  ;;  %v3557_v19 = vrot.slane %v36_v11, 9 }
  0x1c   :  { %v3559_v20 = vrot.slane %v49_v12, 10  ;;  %v77_v21 = vmul.f32 %v76_v18, %v3823_v2  ;;  %v80_v22 = vstv %s3825_s23  ;;  %s3857_s30 = sld [smem:[#allocation2 + $0x1a]]  ;;  %v3560_v23 = vrot.slane %v50_v15, 10 }
  0x1d   :  { %v45_v24 = vadd.f32 %v3556_v16, %v31_v8  ;;  %v3562_v25 = vrot.slane %v63_v17, 11  ;;  %v81_v26 = vmul.f32 %v80_v22, %v3823_v2  ;;  %v94_v27 = vstv %s3832_s26  ;;  %s3863_s4 = sld [smem:[#allocation2 + $0x3]] }
  0x1e   :  { %v95_v28 = vmul.f32 %v94_v27, %v3823_v2  ;;  %v108_v29 = vstv %s3834_s27  ;;  %s3869_s5 = sld [smem:[#allocation2 + $0xb]]  ;;  %v46_v30 = vadd.f32 %v3557_v19, %v32_v14  ;;  %v3872_v31 = vmul.f32 %v62_v13, %v3830_v3 }
  0x1f   :  { %v59_v32 = vadd.f32 %v3559_v20, %v45_v24  ;;  %v3566_v33 = vrot.slane %v81_v26, 9  ;;  %v109_v34 = vmul.f32 %v108_v29, %v3823_v2  ;;  %v122_v35 = vstv %s3842_s28  ;;  %s3878_s6 = sld [smem:[#allocation2 + $0x13]] }
  0x20   :  { %v3569_v36 = vrot.slane %v95_v28, 10  ;;  %v123_v37 = vmul.f32 %v122_v35, %v3823_v2  ;;  %v126_v38 = vstv %s3847_s1  ;;  %s3884_s7 = sld [smem:[#allocation2 + $0x1b]]  ;;  %v3886_v39 = vadd.f32 %v3560_v23, %v46_v30 }
  0x21   :  { %v3888_v40 = vadd.f32 %v3562_v25, %v59_v32  ;;  %v91_v41 = vadd.f32 %v3566_v33, %v77_v21  ;;  %v3572_v42 = vrot.slane %v109_v34, 11  ;;  %v127_v43 = vmul.f32 %v126_v38, %v3823_v2  ;;  %s3893_s8 = sld [smem:[#allocation2 + $0x4]] }
  0x22   :  { %v140_v44 = vstv %s3853_s29  ;;  %v154_v45 = vstv %s3857_s30  ;;  %s3897_s9 = sld [smem:[#allocation2 + $0xc]]  ;;  %v3563_v46 = vrot.slane %v3872_v31, 11  ;;  %v3901_v47 = vmul.f32 %v76_v18, %v3830_v3 }
  0x23   :  { %v105_v48 = vadd.f32 %v3569_v36, %v91_v41  ;;  %v3576_v49 = vrot.slane %v127_v43, 9  ;;  %v141_v50 = vmul.f32 %v140_v44, %v3823_v2  ;;  %v155_v51 = vmul.f32 %v154_v45, %v3823_v2  ;;  %s3909_s10 = sld [smem:[#allocation2 + $0x14]] }
  0x24   :  { %v168_v52 = vstv %s3863_s4  ;;  %v172_v53 = vstv %s3869_s5  ;;  %s3913_s11 = sld [smem:[#allocation2 + $0x1c]]  ;;  %v402_v54 = vrot.slane %v3888_v40, %v3836_v6  ;;  %v406_v55 = vrot.slane %v3888_v40, %v3838_v7 }
  0x25   :  { %v3919_v56 = vadd.f32 %v3572_v42, %v105_v48  ;;  %v137_v57 = vadd.f32 %v3576_v49, %v123_v37  ;;  %v3579_v58 = vrot.slane %v141_v50, 10  ;;  %v3582_v59 = vrot.slane %v155_v51, 11  ;;  %s3921_s12 = sld [smem:[#allocation2 + $0x5]] }
  0x26   :  { %v169_v60 = vmul.f32 %v168_v52, %v3823_v2  ;;  %v173_v61 = vmul.f32 %v172_v53, %v3823_v2  ;;  %v186_v62 = vstv %s3878_s6  ;;  %v200_v63 = vstv %s3884_s7  ;;  %s3931_s13 = sld [smem:[#allocation2 + $0xd]] }
  0x27   :  { %v151_v0 = vadd.f32 %v3579_v58, %v137_v57  ;;  %v187_v1 = vmul.f32 %v186_v62, %v3823_v2  ;;  %v201_v4 = vmul.f32 %v200_v63, %v3823_v2  ;;  %v214_v5 = vstv %s3893_s8  ;;  %s3940_s14 = sld [smem:[#allocation2 + $0x15]] }
  0x28   :  { %v3586_v8 = vrot.slane %v173_v61, 9  ;;  %v215_v9 = vmul.f32 %v214_v5, %v3823_v2  ;;  %v218_v10 = vstv %s3897_s9  ;;  %s3946_s15 = sld [smem:[#allocation2 + $0x1d]]  ;;  %v424_v11 = vrot.slane %v3919_v56, %v3836_v6 }
  0x29   :  { %v3950_v12 = vadd.f32 %v3582_v59, %v151_v0  ;;  %v3589_v13 = vrot.slane %v187_v1, 10  ;;  %v3592_v14 = vrot.slane %v201_v4, 11  ;;  %v219_v15 = vmul.f32 %v218_v10, %v3823_v2  ;;  %s3955_s16 = sld [smem:[#allocation2 + $0x6]] }
  0x2a   :  { %v183_v16 = vadd.f32 %v3586_v8, %v169_v60  ;;  %v232_v17 = vstv %s3909_s10  ;;  %v246_v18 = vstv %s3913_s11  ;;  %s3959_s17 = sld [smem:[#allocation2 + $0xe]]  ;;  %v428_v19 = vrot.slane %v3919_v56, %v3838_v7 }
  0x2b   :  { %v3596_v20 = vrot.slane %v219_v15, 9  ;;  %v233_v21 = vmul.f32 %v232_v17, %v3823_v2  ;;  %v247_v23 = vmul.f32 %v246_v18, %v3823_v2  ;;  %v260_v24 = vstv %s3921_s12  ;;  %s3970_s18 = sld [smem:[#allocation2 + $0x16]] }
  0x2c   :  { %v197_v25 = vadd.f32 %v3589_v13, %v183_v16  ;;  %v261_v26 = vmul.f32 %v260_v24, %v3823_v2  ;;  %v264_v28 = vstv %s3931_s13  ;;  %s3976_s19 = sld [smem:[#allocation2 + $0x1e]]  ;;  %v446_v30 = vrot.slane %v3950_v12, %v3836_v6 }
  0x2d   :  { %v229_v32 = vadd.f32 %v3596_v20, %v215_v9  ;;  %v3599_v33 = vrot.slane %v233_v21, 10  ;;  %v3602_v34 = vrot.slane %v247_v23, 11  ;;  %v265_v36 = vmul.f32 %v264_v28, %v3823_v2  ;;  %s3983_s20 = sld [smem:[#allocation2 + $0x7]] }
  0x2e   :  { %v3985_v37 = vadd.f32 %v3592_v14, %v197_v25  ;;  %v278_v41 = vstv %s3940_s14  ;;  %v292_v42 = vstv %s3946_s15  ;;  %s3989_s0 = sld [smem:[#allocation2 + $0xf]]  ;;  %v450_v43 = vrot.slane %v3950_v12, %v3838_v7 }
  0x2f   :  { %v243_v48 = vadd.f32 %v3599_v33, %v229_v32  ;;  %v3606_v49 = vrot.slane %v265_v36, 9  ;;  %v279_v50 = vmul.f32 %v278_v41, %v3823_v2  ;;  %v293_v51 = vmul.f32 %v292_v42, %v3823_v2  ;;  %s3999_s21 = sld [smem:[#allocation2 + $0x17]] }
  0x30   :  { %v306_v57 = vstv %s3955_s16  ;;  %v310_v58 = vstv %s3959_s17  ;;  %s4003_s22 = sld [smem:[#allocation2 + $0x1f]]  ;;  %v468_v59 = vrot.slane %v3985_v37, %v3836_v6  ;;  %v472_v60 = vrot.slane %v3985_v37, %v3838_v7 }
  0x31   :  { %v257_v61 = vadd.f32 %v3602_v34, %v243_v48  ;;  %v275_v0 = vadd.f32 %v3606_v49, %v261_v26  ;;  %v3609_v1 = vrot.slane %v279_v50, 10  ;;  %v3612_v4 = vrot.slane %v293_v51, 11  ;;  %s4227_s25 = sld [smem:[#allocation2 + $0x28]] }
  0x32   :  { %v307_v8 = vmul.f32 %v306_v57, %v3823_v2  ;;  %v311_v9 = vmul.f32 %v310_v58, %v3823_v2  ;;  %v324_v13 = vstv %s3970_s18  ;;  %v338_v14 = vstv %s3976_s19  ;;  %s4229_s26 = sld [smem:[#allocation2 + $0x38]] }
  0x33   :  { %v289_v15 = vadd.f32 %v3609_v1, %v275_v0  ;;  %v325_v16 = vmul.f32 %v324_v13, %v3823_v2  ;;  %v339_v20 = vmul.f32 %v338_v14, %v3823_v2  ;;  %v352_v21 = vstv %s3983_s20  ;;  %s4231_s27 = sld [smem:[#allocation2 + $0x48]] }
  0x34   :  { %v3616_v23 = vrot.slane %v311_v9, 9  ;;  %v353_v25 = vmul.f32 %v352_v21, %v3823_v2  ;;  %v356_v26 = vstv %s3989_s0  ;;  %v490_v32 = vrot.slane %v257_v61, %v3836_v6  ;;  %s4233_s28 = sld [smem:[#allocation2 + $0x58]] }
  0x35   :  { %v303_v33 = vadd.f32 %v3612_v4, %v289_v15  ;;  %v3619_v34 = vrot.slane %v325_v16, 10  ;;  %v3622_v36 = vrot.slane %v339_v20, 11  ;;  %v357_v37 = vmul.f32 %v356_v26, %v3823_v2  ;;  %s4235_s1 = sld [smem:[#allocation2 + $0x68]] }
  0x36   :  { %v321_v48 = vadd.f32 %v3616_v23, %v307_v8  ;;  %v370_v49 = vstv %s3999_s21  ;;  %v384_v50 = vstv %s4003_s22  ;;  %v494_v51 = vrot.slane %v257_v61, %v3838_v7  ;;  %s4237_s29 = sld [smem:[#allocation2 + $0x78]] }
  0x37   :  { %v3626_v0 = vrot.slane %v357_v37, 9  ;;  %v371_v1 = vmul.f32 %v370_v49, %v3823_v2  ;;  %v385_v9 = vmul.f32 %v384_v50, %v3823_v2  ;;  %v512_v4 = vrot.slane %v303_v33, %v3836_v6  ;;  %s4239_s30 = sld [smem:[#allocation2 + $0x88]] }
  0x38   :  { %v335_v15 = vadd.f32 %v3619_v34, %v321_v48  ;;  %v516_v16 = vrot.slane %v303_v33, %v3838_v7  ;;  %v574_v61 = vsel %vm573_vm0, %v402_v54, %v424_v11  ;;  %v575_v2 = vsel %vm573_vm0, %v406_v55, %v428_v19  ;;  %s4241_s4 = sld [smem:[#allocation2 + $0x98]] }
  0x39   :  { %v367_v8 = vadd.f32 %v3626_v0, %v353_v25  ;;  %v3629_v20 = vrot.slane %v371_v1, 10  ;;  %v3632_v23 = vrot.slane %v385_v9, 11  ;;  %v579_v33 = vsel %vm578_vm1, %v574_v61, %v446_v30  ;;  %s4243_s5 = sld [smem:[#allocation2 + $0x29]] }
  0x3a   :  { %v349_v34 = vadd.f32 %v3622_v36, %v335_v15  ;;  %v580_v54 = vsel %vm578_vm1, %v575_v2, %v450_v43  ;;  %v584_v11 = vsel %vm583_vm2, %v579_v33, %v468_v59  ;;  %v4066_v40 = vadd.f32 %v3563_v46, %v3886_v39  ;;  %s4245_s6 = sld [smem:[#allocation2 + $0x39]] }
  0x3b   :  { %v381_v55 = vadd.f32 %v3629_v20, %v367_v8  ;;  %v585_v56 = vsel %vm583_vm2, %v580_v54, %v472_v60  ;;  %v589_v12 = vsel %vm588_vm3, %v584_v11, %v490_v32  ;;  %v82_v19 = vmul.f32 %v80_v22, %v3830_v3  ;;  %s4247_s7 = sld [smem:[#allocation2 + $0x49]] }
  0x3c   :  { %v534_v30 = vrot.slane %v349_v34, %v3836_v6  ;;  %v538_v43 = vrot.slane %v349_v34, %v3838_v7  ;;  %v590_v59 = vsel %vm588_vm3, %v585_v56, %v494_v51  ;;  %v594_v31 = vsel %vm593_vm4, %v589_v12, %v512_v4  ;;  %s4249_s8 = sld [smem:[#allocation2 + $0x59]] }
  0x3d   :  { %v395_v39 = vadd.f32 %v3632_v23, %v381_v55  ;;  %v595_v46 = vsel %vm593_vm4, %v590_v59, %v516_v16  ;;  %v3567_v60 = vrot.slane %v82_v19, 9  ;;  %v96_v25 = vmul.f32 %v94_v27, %v3830_v3  ;;  %s4251_s9 = sld [smem:[#allocation2 + $0x69]] }
  0x3e   :  { %v599_v22 = vsel %vm598_vm5, %v594_v31, %v534_v30  ;;  %v600_v32 = vsel %vm598_vm5, %v595_v46, %v538_v43  ;;  %v110_v36 = vmul.f32 %v108_v29, %v3830_v3  ;;  %v124_v37 = vmul.f32 %v122_v35, %v3830_v3  ;;  %s4253_s10 = sld [smem:[#allocation2 + $0x79]] }
  0x3f   :  { %v556_v48 = vrot.slane %v395_v39, %v3836_v6  ;;  %v560_v51 = vrot.slane %v395_v39, %v3838_v7  ;;  %v92_v0 = vadd.f32 %v3567_v60, %v3901_v47  ;;  %v3570_v27 = vrot.slane %v96_v25, 10  ;;  %s4255_s11 = sld [smem:[#allocation2 + $0x89]] }
  0x40   :  { %v3573_v1 = vrot.slane %v110_v36, 11  ;;  %v128_v9 = vmul.f32 %v126_v38, %v3830_v3  ;;  %v142_v29 = vmul.f32 %v140_v44, %v3830_v3  ;;  %v156_v35 = vmul.f32 %v154_v45, %v3830_v3  ;;  %s4257_s12 = sld [smem:[#allocation2 + $0x99]] }
  0x41   :  { %v4102_v4 = vsel %vm603_vm6, %v599_v22, %v556_v48  ;;  %v4105_v47 = vsel %vm603_vm6, %v600_v32, %v560_v51  ;;  %v106_v15 = vadd.f32 %v3570_v27, %v92_v0  ;;  %v170_v16 = vmul.f32 %v168_v52, %v3830_v3  ;;  %s4259_s13 = sld [smem:[#allocation2 + $0x2a]] }
  0x42   :  { %v609_v38 = vadd.f32 %v4105_v47, %v4102_v4  ;;  %v3577_v44 = vrot.slane %v128_v9, 9  ;;  %v3580_v61 = vrot.slane %v142_v29, 10  ;;  %v3583_v2 = vrot.slane %v156_v35, 11  ;;  %s4261_s14 = sld [smem:[#allocation2 + $0x3a]] }
  0x43   :  { %v4112_v45 = vadd.f32 %v3573_v1, %v106_v15  ;;  %v174_v8 = vmul.f32 %v172_v53, %v3830_v3  ;;  %v188_v20 = vmul.f32 %v186_v62, %v3830_v3  ;;  %v202_v23 = vmul.f32 %v200_v63, %v3830_v3  ;;  %s4263_s15 = sld [smem:[#allocation2 + $0x4a]] }
  0x44   :  { %610 = vadd.xlane.f32.xlu0 %v609_v38  ;;  %v138_v52 = vadd.f32 %v3577_v44, %v124_v37  ;;  %v216_v33 = vmul.f32 %v214_v5, %v3830_v3  ;;  %v220_v34 = vmul.f32 %v218_v10, %v3830_v3  ;;  %v234_v53 = vmul.f32 %v232_v17, %v3830_v3  ;;  %s4265_s16 = sld [smem:[#allocation2 + $0x5a]] }
  0x45   :  { %v3587_v54 = vrot.slane %v174_v8, 9  ;;  %v3590_v62 = vrot.slane %v188_v20, 10  ;;  %v3593_v11 = vrot.slane %v202_v23, 11  ;;  %v248_v63 = vmul.f32 %v246_v18, %v3830_v3  ;;  %s4267_s17 = sld [smem:[#allocation2 + $0x6a]] }
  0x46   :  { %v152_v55 = vadd.f32 %v3580_v61, %v138_v52  ;;  %v3597_v56 = vrot.slane %v220_v34, 9  ;;  %v3600_v12 = vrot.slane %v234_v53, 10  ;;  %v262_v5 = vmul.f32 %v260_v24, %v3830_v3  ;;  %s4269_s18 = sld [smem:[#allocation2 + $0x7a]] }
  0x47   :  { %v184_v10 = vadd.f32 %v3587_v54, %v170_v16  ;;  %v3603_v19 = vrot.slane %v248_v63, 11  ;;  %v266_v17 = vmul.f32 %v264_v28, %v3830_v3  ;;  %v280_v30 = vmul.f32 %v278_v41, %v3830_v3  ;;  %s4271_s19 = sld [smem:[#allocation2 + $0x8a]] }
  0x48   :  { %v166_v43 = vadd.f32 %v3583_v2, %v152_v55  ;;  %v230_v18 = vadd.f32 %v3597_v56, %v216_v33  ;;  %v294_v59 = vmul.f32 %v292_v42, %v3830_v3  ;;  %v308_v31 = vmul.f32 %v306_v57, %v3830_v3  ;;  %s4273_s20 = sld [smem:[#allocation2 + $0x9a]] }
  0x49   :  { %v198_v24 = vadd.f32 %v3590_v62, %v184_v10  ;;  %v3607_v39 = vrot.slane %v266_v17, 9  ;;  %v3610_v46 = vrot.slane %v280_v30, 10  ;;  %v312_v28 = vmul.f32 %v310_v58, %v3830_v3  ;;  %s4275_s0 = sld [smem:[#allocation2 + $0x2b]] }
  0x4a   :  { %v244_v60 = vadd.f32 %v3600_v12, %v230_v18  ;;  %v3613_v41 = vrot.slane %v294_v59, 11  ;;  %v326_v25 = vmul.f32 %v324_v13, %v3830_v3  ;;  %v340_v42 = vmul.f32 %v338_v14, %v3830_v3  ;;  %s4277_s21 = sld [smem:[#allocation2 + $0x3b]] }
  0x4b   :  { %v212_v22 = vadd.f32 %v3593_v11, %v198_v24  ;;  %v276_v32 = vadd.f32 %v3607_v39, %v262_v5  ;;  %v3617_v57 = vrot.slane %v312_v28, 9  ;;  %v354_v36 = vmul.f32 %v352_v21, %v3830_v3  ;;  %6419 = sst [smem:[#allocation5_spill]] %s4267_s17 }
  0x4c   :  { %v258_v37 = vadd.f32 %v3603_v19, %v244_v60  ;;  %v3620_v48 = vrot.slane %v326_v25, 10  ;;  %v3623_v51 = vrot.slane %v340_v42, 11  ;;  %v358_v58 = vmul.f32 %v356_v26, %v3830_v3  ;;  %6420 = sst [smem:[#allocation6_spill]] %s4269_s18 }
  0x4d   :  { %v290_v0 = vadd.f32 %v3610_v46, %v276_v32  ;;  %v322_v27 = vadd.f32 %v3617_v57, %v308_v31  ;;  %v372_v13 = vmul.f32 %v370_v49, %v3830_v3  ;;  %v386_v14 = vmul.f32 %v384_v50, %v3830_v3  ;;  %6421 = sst [smem:[#allocation7_spill]] %s4271_s19 }
  0x4e   :  { %v3627_v1 = vrot.slane %v358_v58, 9  ;;  %v410_v9 = vrot.slane %v4066_v40, %v3836_v6  ;;  %v414_v21 = vrot.slane %v4066_v40, %v3838_v7  ;;  %v432_v29 = vrot.slane %v4112_v45, %v3836_v6  ;;  %6422 = sst [smem:[#allocation8_spill]] %s4273_s20 }
  0x4f   :  { %v304_v35 = vadd.f32 %v3613_v41, %v290_v0  ;;  %v336_v26 = vadd.f32 %v3620_v48, %v322_v27  ;;  %v3630_v15 = vrot.slane %v372_v13, 10  ;;  %v3633_v16 = vrot.slane %v386_v14, 11  ;;  %6423 = sst [smem:[#allocation9_spill]] %s4275_s0 }
  0x50   :  { %v368_v38 = vadd.f32 %v3627_v1, %v354_v36  ;;  %v436_v49 = vrot.slane %v4112_v45, %v3838_v7  ;;  %v454_v3 = vrot.slane %v166_v43, %v3836_v6  ;;  %v458_v50 = vrot.slane %v166_v43, %v3838_v7  ;;  %v608_v36 = vld [vmem:[%s6180_s2] sm:$0xff]  ;;  %6424 = sst [smem:[#allocation10_spill]] %s4277_s21 }
  0x51   :  { %v350_v44 = vadd.f32 %v3623_v51, %v336_v26  ;;  %v476_v61 = vrot.slane %v212_v22, %v3836_v6  ;;  %v480_v40 = vrot.slane %v212_v22, %v3838_v7  ;;  %v498_v8 = vrot.slane %v258_v37, %v3836_v6  ;;  %s4279_s22 = sld [smem:[#allocation2 + $0x4b]] }
  0x52   :  { %v382_v2 = vadd.f32 %v3630_v15, %v368_v38  ;;  %v502_v20 = vrot.slane %v258_v37, %v3838_v7  ;;  %v520_v23 = vrot.slane %v304_v35, %v3836_v6  ;;  %v524_v52 = vrot.slane %v304_v35, %v3838_v7  ;;  %s4281_s23 = sld [smem:[#allocation2 + $0x5b]] }
  0x53   :  { %v542_v45 = vrot.slane %v350_v44, %v3836_v6  ;;  %v576_v33 = vsel %vm573_vm0, %v410_v9, %v432_v29  ;;  %v577_v34 = vsel %vm573_vm0, %v414_v21, %v436_v49  ;;  %v546_v54 = vrot.slane %v350_v44, %v3838_v7  ;;  %s4283_s24 = sld [smem:[#allocation2 + $0x6b]] }
  0x54   :  { %v396_v53 = vadd.f32 %v3633_v16, %v382_v2  ;;  %v581_v62 = vsel %vm578_vm1, %v576_v33, %v454_v3  ;;  %v582_v11 = vsel %vm578_vm1, %v577_v34, %v458_v50  ;;  %v3791_v57 = vmov 0   ;;  %s4285_s3 = sld [smem:[#allocation2 + $0x7b]] }
  0x55   :  { %v586_v63 = vsel %vm583_vm2, %v581_v62, %v476_v61  ;;  %v587_v55 = vsel %vm583_vm2, %v582_v11, %v480_v40  ;;  %3765 = vset.pattern.permute.xlu0 %v3791_v57  ;;  %v6185_v37 = vmov 1   ;;  %s4287_s2 = sld [smem:[#allocation2 + $0x8b]]  ;;  %v4372_v1 = vstv %s4227_s25 }
  0x56   :  { %v564_v56 = vrot.slane %v396_v53, %v3836_v6  ;;  %v568_v12 = vrot.slane %v396_v53, %v3838_v7  ;;  %v591_v5 = vsel %vm588_vm3, %v586_v63, %v498_v8  ;;  %v592_v10 = vsel %vm588_vm3, %v587_v55, %v502_v20  ;;  %3766 = vset.pattern.permute.xlu1 %v6185_v37  ;;  %s4289_s17 = sld [smem:[#allocation2 + $0x9b]] }
  0x57   :  { %v596_v19 = vsel %vm593_vm4, %v591_v5, %v520_v23  ;;  %v597_v17 = vsel %vm593_vm4, %v592_v10, %v524_v52  ;;  %6425 = sst [smem:[#allocation11_spill]] %s4279_s22  ;;  %6461 = vst [vmem:[#allocation47_spill] sm:$0xff] %v4372_v1  ;;  %v4375_v9 = vstv %s4229_s26  ;;  %v4378_v21 = vstv %s4231_s27 }
  0x58   :  { %v601_v30 = vsel %vm598_vm5, %v596_v19, %v542_v45  ;;  %v602_v43 = vsel %vm598_vm5, %v597_v17, %v546_v54  ;;  %6426 = sst [smem:[#allocation12_spill]] %s4281_s23  ;;  %6462 = vst [vmem:[#allocation48_spill] sm:$0xff] %v4375_v9  ;;  %6463 = vst [vmem:[#allocation49_spill] sm:$0xff] %v4378_v21  ;;  %v4381_v29 = vstv %s4233_s28  ;;  %v4386_v35 = vstv %s4235_s1 }
  0x59   :  { %v606_v18 = vsel %vm603_vm6, %v601_v30, %v564_v56  ;;  %v607_v59 = vsel %vm603_vm6, %v602_v43, %v568_v12  ;;  %6427 = sst [smem:[#allocation13_spill]] %s4283_s24  ;;  %6464 = vst [vmem:[#allocation50_spill] sm:$0xff] %v4381_v29  ;;  %6465 = vst [vmem:[#allocation51_spill] sm:$0xff] %v4386_v35  ;;  %v4389_v26 = vstv %s4237_s29  ;;  %v4392_v15 = vstv %s4239_s30 }
  0x5a   :  { %v612_v31 = vadd.f32 %v607_v59, %v606_v18  ;;  %6428 = sst [smem:[#allocation14_spill]] %s4285_s3  ;;  %6466 = vst [vmem:[#allocation52_spill] sm:$0xff] %v4389_v26  ;;  %6467 = vst [vmem:[#allocation53_spill] sm:$0xff] %v4392_v15  ;;  %v4395_v16 = vstv %s4241_s4  ;;  %v4400_v38 = vstv %s4243_s5  ;;  %v4403_v49 = vstv %s4245_s6 }
  0x5b   :  { %6429 = sst [smem:[#allocation15_spill]] %s4287_s2  ;;  %6468 = vst [vmem:[#allocation54_spill] sm:$0xff] %v4395_v16  ;;  %6471 = vst [vmem:[#allocation56_spill] sm:$0xff] %v4400_v38  ;;  %v4406_v3 = vstv %s4247_s7  ;;  %v4409_v50 = vstv %s4249_s8  ;;  %v4414_v44 = vstv %s4251_s9  ;;  %v4417_v61 = vstv %s4253_s10 }
  0x5c   :  { %613 = vadd.xlane.f32.xlu0 %v612_v31  ;;  %6430 = sst [smem:[#allocation16_spill]] %s4289_s17  ;;  %6473 = vst [vmem:[#allocation57_spill] sm:$0xff] %v4403_v49  ;;  %6475 = vst [vmem:[#allocation58_spill] sm:$0xff] %v4406_v3  ;;  %v4420_v40 = vstv %s4255_s11  ;;  %v4423_v2 = vstv %s4257_s12  ;;  %v4428_v8 = vstv %s4259_s13  ;;  %v4431_v20 = vstv %s4261_s14 }
  0x5d   :  { %s4291_s18 = sld [smem:[#allocation2 + $0x2c]]  ;;  %6477 = vst [vmem:[#allocation59_spill] sm:$0xff] %v4409_v50  ;;  %6480 = vst [vmem:[#allocation60_spill] sm:$0xff] %v4414_v44  ;;  %v4434_v23 = vstv %s4263_s15  ;;  %v4437_v52 = vstv %s4265_s16 }
  0x5e   :  { %s4293_s19 = sld [smem:[#allocation2 + $0x3c]]  ;;  %6482 = vst [vmem:[#allocation61_spill] sm:$0xff] %v4417_v61  ;;  %6484 = vst [vmem:[#allocation62_spill] sm:$0xff] %v4420_v40 }
  0x5f   :  { %s4295_s20 = sld [smem:[#allocation2 + $0x4c]]  ;;  %6486 = vst [vmem:[#allocation63_spill] sm:$0xff] %v4423_v2  ;;  %6489 = vst [vmem:[#allocation64_spill] sm:$0xff] %v4428_v8 }
  0x60   :  { %s4297_s0 = sld [smem:[#allocation2 + $0x5c]]  ;;  %6491 = vst [vmem:[#allocation65_spill] sm:$0xff] %v4431_v20  ;;  %6493 = vst [vmem:[#allocation66_spill] sm:$0xff] %v4434_v23 }
  0x61   :  { %s4299_s21 = sld [smem:[#allocation2 + $0x6c]]  ;;  %6495 = vst [vmem:[#allocation67_spill] sm:$0xff] %v4437_v52 }
  0x62   :  { %s4301_s22 = sld [smem:[#allocation2 + $0x7c]] }
  0x63   :  { %6431 = sst [smem:[#allocation17_spill]] %s4291_s18 }
  0x64   :  { %6432 = sst [smem:[#allocation18_spill]] %s4293_s19 }
  0x65   :  { %6433 = sst [smem:[#allocation19_spill]] %s4295_s20 }
  0x66   :  { %6434 = sst [smem:[#allocation20_spill]] %s4297_s0 }
  0x67   :  { %6435 = sst [smem:[#allocation21_spill]] %s4299_s21 }
  0x68   :  { %6436 = sst [smem:[#allocation22_spill]] %s4301_s22 }
  0x69   :  { %s4303_s23 = sld [smem:[#allocation2 + $0x8c]] }
  0x6a   :  { %s4305_s24 = sld [smem:[#allocation2 + $0x9c]] }
  0x6b   :  { %s4307_s3 = sld [smem:[#allocation2 + $0x2d]] }
  0x6c   :  { %s4309_s2 = sld [smem:[#allocation2 + $0x3d]] }
  0x6d   :  { %s4311_s17 = sld [smem:[#allocation2 + $0x4d]] }
  0x6e   :  { %s4313_s18 = sld [smem:[#allocation2 + $0x5d]] }
  0x6f   :  { %6437 = sst [smem:[#allocation23_spill]] %s4303_s23 }
  0x70   :  { %6438 = sst [smem:[#allocation24_spill]] %s4305_s24 }
  0x71   :  { %6439 = sst [smem:[#allocation25_spill]] %s4307_s3 }
  0x72   :  { %6440 = sst [smem:[#allocation26_spill]] %s4309_s2 }
  0x73   :  { %6441 = sst [smem:[#allocation27_spill]] %s4311_s17 }
  0x74   :  { %6442 = sst [smem:[#allocation28_spill]] %s4313_s18 }
  0x75   :  { %s4315_s19 = sld [smem:[#allocation2 + $0x6d]] }
  0x76   :  { %s4317_s20 = sld [smem:[#allocation2 + $0x7d]] }
  0x77   :  { %s4319_s0 = sld [smem:[#allocation2 + $0x8d]] }
  0x78   :  { %s4321_s21 = sld [smem:[#allocation2 + $0x9d]] }
  0x79   :  { %s4323_s22 = sld [smem:[#allocation2 + $0x2e]] }
  0x7a   :  { %s4325_s23 = sld [smem:[#allocation2 + $0x3e]] }
  0x7b   :  { %6443 = sst [smem:[#allocation29_spill]] %s4315_s19 }
  0x7c   :  { %6444 = sst [smem:[#allocation30_spill]] %s4317_s20 }
  0x7d   :  { %s4327_s24 = sld [smem:[#allocation2 + $0x4e]] }
  0x7e   :  { %6445 = sst [smem:[#allocation31_spill]] %s4321_s21 }
  0x7f   :  { %6446 = sst [smem:[#allocation32_spill]] %s4323_s22 }
  0x80   :  { %s4329_s3 = sld [smem:[#allocation2 + $0x5e]] }
  0x81   :  { %s4331_s2 = sld [smem:[#allocation2 + $0x6e]] }
  0x82   :  { %s4333_s17 = sld [smem:[#allocation2 + $0x7e]] }
  0x83   :  { %6447 = sst [smem:[#allocation33_spill]] %s4327_s24 }
  0x84   :  { %s4335_s18 = sld [smem:[#allocation2 + $0x8e]] }
  0x85   :  { %s4337_s19 = sld [smem:[#allocation2 + $0x9e]] }
  0x86   :  { %6448 = sst [smem:[#allocation34_spill]] %s4329_s3 }
  0x87   :  { %6449 = sst [smem:[#allocation35_spill]] %s4331_s2 }
  0x88   :  { %s4339_s20 = sld [smem:[#allocation2 + $0x2f]] }
  0x89   :  { %s4341_s21 = sld [smem:[#allocation2 + $0x3f]] }
  0x8a   :  { %6450 = sst [smem:[#allocation36_spill]] %s4335_s18 }
  0x8b   :  { %6451 = sst [smem:[#allocation37_spill]] %s4337_s19 }
  0x8c   :  { %s4343_s22 = sld [smem:[#allocation2 + $0x4f]] }
  0x8d   :  { %s4345_s24 = sld [smem:[#allocation2 + $0x5f]] }
  0x8e   :  { %6452 = sst [smem:[#allocation38_spill]] %s4339_s20 }
  0x8f   :  { %6453 = sst [smem:[#allocation39_spill]] %s4341_s21 }
  0x90   :  { %s4347_s3 = sld [smem:[#allocation2 + $0x6f]] }
  0x91   :  { %s4349_s2 = sld [smem:[#allocation2 + $0x7f]] }
  0x92   :  { %6454 = sst [smem:[#allocation40_spill]] %s4343_s22 }
  0x93   :  { %6455 = sst [smem:[#allocation41_spill]] %s4345_s24 }
  0x94   :  { %s4351_s18 = sld [smem:[#allocation2 + $0x8f]] }
  0x95   :  { %s4353_s19 = sld [smem:[#allocation2 + $0x9f]] }
  0x96   :  { %6456 = sst [smem:[#allocation42_spill]] %s4347_s3 }
  0x97   :  { %6457 = sst [smem:[#allocation43_spill]] %s4349_s2 }
  0x98   :  { %s4355_s20 = sld [smem:[#allocation2 + $0x20]] }
  0x99   :  { %s4357_s21 = sld [smem:[#allocation2 + $0x30]] }
  0x9a   :  { %6458 = sst [smem:[#allocation44_spill]] %s4351_s18 }
  0x9b   :  { %6459 = sst [smem:[#allocation45_spill]] %s4353_s19 }
  0x9c   :  { %s4359_s22 = sld [smem:[#allocation2 + $0x40]] }
  0x9d   :  { %s4361_s24 = sld [smem:[#allocation2 + $0x50]] }
  0x9e   :  { %s4363_s3 = sld [smem:[#allocation2 + $0x60]] }
  0x9f   :  { %s4365_s2 = sld [smem:[#allocation2 + $0x70]] }
  0xa0   :  { %s4367_s18 = sld [smem:[#allocation2 + $0x80]] }
  0xa1   :  { %s4369_s19 = sld [smem:[#allocation2 + $0x90]] }
  0xa2   :  { %s4397_s25 = sld [smem:[#allocation2 + $0x31]] }
  0xa3   :  { %s6470_s26 = sld [smem:[#allocation5_spill]] }
  0xa4   :  { %6460 = sst [smem:[#allocation46_spill]] %s4363_s3 }
  0xa5   :  { %s4383_s3 = sld [smem:[#allocation2 + $0x21]] }
  0xa6   :  { %s6472_s27 = sld [smem:[#allocation6_spill]] }
  0xa7   :  { %s6474_s28 = sld [smem:[#allocation7_spill]] }
  0xa8   :  { %6469 = sst [smem:[#allocation55_spill]] %s4397_s25 }
  0xa9   :  { %s6476_s1 = sld [smem:[#allocation8_spill]]  ;;  %v4442_v45 = vstv %s6470_s26 }
  0xaa   :  { %s4411_s29 = sld [smem:[#allocation2 + $0x41]]  ;;  %6498 = vst [vmem:[#allocation68_spill] sm:$0xff] %v4442_v45 }
  0xab   :  { %s6479_s30 = sld [smem:[#allocation9_spill]] }
  0xac   :  { %s6481_s4 = sld [smem:[#allocation10_spill]]  ;;  %v4445_v33 = vstv %s6472_s27 }
  0xad   :  { %s6483_s25 = sld [smem:[#allocation11_spill]]  ;;  %6500 = vst [vmem:[#allocation69_spill] sm:$0xff] %v4445_v33  ;;  %v4448_v34 = vstv %s6474_s28 }
  0xae   :  { %s6485_s5 = sld [smem:[#allocation12_spill]]  ;;  %6502 = vst [vmem:[#allocation70_spill] sm:$0xff] %v4448_v34 }
  0xaf   :  { %s4425_s6 = sld [smem:[#allocation2 + $0x51]]  ;;  %v4451_v53 = vstv %s6476_s1 }
  0xb0   :  { %6478 = sst [smem:[#allocation5_spill]] %s4411_s29  ;;  %6504 = vst [vmem:[#allocation71_spill] sm:$0xff] %v4451_v53 }
  0xb1   :  { %s6488_s7 = sld [smem:[#allocation13_spill]]  ;;  %v4456_v54 = vstv %s6479_s30 }
  0xb2   :  { %s6490_s8 = sld [smem:[#allocation14_spill]]  ;;  %6507 = vst [vmem:[#allocation72_spill] sm:$0xff] %v4456_v54  ;;  %v4459_v62 = vstv %s6481_s4 }
  0xb3   :  { %s6492_s29 = sld [smem:[#allocation15_spill]]  ;;  %6509 = vst [vmem:[#allocation73_spill] sm:$0xff] %v4459_v62  ;;  %v4462_v11 = vstv %s6483_s25 }
  0xb4   :  { %s6494_s9 = sld [smem:[#allocation16_spill]]  ;;  %6511 = vst [vmem:[#allocation74_spill] sm:$0xff] %v4462_v11  ;;  %v4465_v63 = vstv %s6485_s5 }
  0xb5   :  { %6487 = sst [smem:[#allocation6_spill]] %s4425_s6  ;;  %6513 = vst [vmem:[#allocation75_spill] sm:$0xff] %v4465_v63 }
  0xb6   :  { %s4439_s10 = sld [smem:[#allocation2 + $0x61]] }
  0xb7   :  { %s6497_s11 = sld [smem:[#allocation17_spill]]  ;;  %v4470_v55 = vstv %s6488_s7 }
  0xb8   :  { %s6499_s12 = sld [smem:[#allocation18_spill]]  ;;  %6515 = vst [vmem:[#allocation76_spill] sm:$0xff] %v4470_v55  ;;  %v4473_v56 = vstv %s6490_s8 }
  0xb9   :  { %s6501_s6 = sld [smem:[#allocation19_spill]]  ;;  %6517 = vst [vmem:[#allocation77_spill] sm:$0xff] %v4473_v56  ;;  %v4476_v12 = vstv %s6492_s29 }
  0xba   :  { %s6503_s13 = sld [smem:[#allocation20_spill]]  ;;  %6519 = vst [vmem:[#allocation78_spill] sm:$0xff] %v4476_v12  ;;  %v4479_v5 = vstv %s6494_s9 }
  0xbb   :  { %s4453_s14 = sld [smem:[#allocation2 + $0x71]]  ;;  %6521 = vst [vmem:[#allocation79_spill] sm:$0xff] %v4479_v5 }
  0xbc   :  { %6496 = sst [smem:[#allocation7_spill]] %s4439_s10 }
  0xbd   :  { %s6506_s15 = sld [smem:[#allocation21_spill]]  ;;  %v4484_v10 = vstv %s6497_s11 }
  0xbe   :  { %s6508_s16 = sld [smem:[#allocation22_spill]]  ;;  %6523 = vst [vmem:[#allocation80_spill] sm:$0xff] %v4484_v10  ;;  %v4487_v19 = vstv %s6499_s12 }
  0xbf   :  { %s6510_s10 = sld [smem:[#allocation23_spill]]  ;;  %6525 = vst [vmem:[#allocation81_spill] sm:$0xff] %v4487_v19  ;;  %v4490_v17 = vstv %s6501_s6 }
  0xc0   :  { %s6512_s26 = sld [smem:[#allocation24_spill]]  ;;  %6526 = vst [vmem:[#allocation82_spill] sm:$0xff] %v4490_v17  ;;  %v4493_v30 = vstv %s6503_s13 }
  0xc1   :  { %6505 = sst [smem:[#allocation8_spill]] %s4453_s14  ;;  %6528 = vst [vmem:[#allocation83_spill] sm:$0xff] %v4493_v30 }
  0xc2   :  { %s4467_s27 = sld [smem:[#allocation2 + $0x81]] }
  0xc3   :  { %s6514_s28 = sld [smem:[#allocation25_spill]]  ;;  %v4498_v43 = vstv %s6506_s15 }
  0xc4   :  { %s6516_s1 = sld [smem:[#allocation26_spill]]  ;;  %6530 = vst [vmem:[#allocation84_spill] sm:$0xff] %v4498_v43 }
  0xc5   :  { %s6518_s14 = sld [smem:[#allocation27_spill]] }
  0xc6   :  { %s6520_s30 = sld [smem:[#allocation28_spill]]  ;;  %v4507_v31 = vstv %s6512_s26 }
  0xc7   :  { %s4481_s4 = sld [smem:[#allocation2 + $0x91]]  ;;  %6535 = vst [vmem:[#allocation87_spill] sm:$0xff] %v4507_v31 }
  0xc8   :  { %s6522_s25 = sld [smem:[#allocation29_spill]] }
  0xc9   :  { %s6524_s5 = sld [smem:[#allocation30_spill]] }
  0xca   :  { %s6527_s7 = sld [smem:[#allocation31_spill]] }
  0xcb   :  { %s4495_s8 = sld [smem:[#allocation2 + $0x22]] }
  0xcc   :  { %s6529_s29 = sld [smem:[#allocation32_spill]] }
  0xcd   :  { %v611_v6 = vpop.xlane.xlu0 %610  ;;  %s6532_s9 = sld [smem:[#allocation33_spill]] }
  0xce   :  { %s6534_s11 = sld [smem:[#allocation34_spill]] }
  0xcf   :  { %s4509_s12 = sld [smem:[#allocation2 + $0x32]] }
  0xd0   :  { %s6537_s6 = sld [smem:[#allocation35_spill]] }
  0xd1   :  { %s6540_s13 = sld [smem:[#allocation36_spill]] }
  0xd2   :  { %s6542_s15 = sld [smem:[#allocation37_spill]] }
  0xd3   :  { %s6547_s26 = sld [smem:[#allocation39_spill]] }
  0xd5   :  { %6536 = sst [smem:[#allocation9_spill]] %s4509_s12 }
  0xd6   :  { %s6549_s12 = sld [smem:[#allocation40_spill]] }
  0xe5   :  { %v614_v7 = vpop.xlane.xlu0 %613 }
  0xe6   :  { %v615_v24 = vadd.f32 %v614_v7, %v611_v6  ;;  %v4512_v6 = vstv %s6514_s28  ;;  %v4515_v7 = vstv %s6516_s1  ;;  %s6551_s28 = sld [smem:[#allocation41_spill]] }
  0xe7   :  { %6538 = vst [vmem:[#allocation88_spill] sm:$0xff] %v4512_v6  ;;  %6539 = vst [vmem:[#allocation89_spill] sm:$0xff] %v4515_v7  ;;  %s4537_s1 = sld [smem:[#allocation2 + $0x52]] }
  0xe8   :  { %v616_v39 = vmul.f32 0.001953125, %v615_v24  ;;  %v4518_v24 = vstv %s6518_s14  ;;  %s6553_s14 = sld [smem:[#allocation42_spill]] }
  0xe9   :  { %6541 = vst [vmem:[#allocation90_spill] sm:$0xff] %v4518_v24 }
  0xea   :  { %v4206_v46 = vsub.f32 %v4102_v4, %v616_v39  ;;  %v4209_v28 = vsub.f32 %v4105_v47, %v616_v39  ;;  %v4211_v60 = vsub.f32 %v606_v18, %v616_v39  ;;  %v4213_v41 = vsub.f32 %v607_v59, %v616_v39 }
  0xeb   :  { %v4501_v18 = vstv %s6508_s16  ;;  %v4504_v59 = vstv %s6510_s10  ;;  %v4521_v39 = vstv %s6520_s30  ;;  %s4523_s16 = sld [smem:[#allocation2 + $0x42]] }
  0xec   :  { %v621_v25 = vmul.f32 %v4206_v46, %v4206_v46  ;;  %v622_v42 = vmul.f32 %v4209_v28, %v4209_v28  ;;  %v623_v32 = vmul.f32 %v4211_v60, %v4211_v60  ;;  %v624_v4 = vmul.f32 %v4213_v41, %v4213_v41  ;;  %6531 = vst [vmem:[#allocation85_spill] sm:$0xff] %v4501_v18  ;;  %s6545_s10 = sld [smem:[#allocation38_spill]] }
  0xed   :  { %6533 = vst [vmem:[#allocation86_spill] sm:$0xff] %v4504_v59  ;;  %6543 = vst [vmem:[#allocation91_spill] sm:$0xff] %v4521_v39  ;;  %s6555_s30 = sld [smem:[#allocation43_spill]]  ;;  %v4577_v37 = vstv %s6551_s28 }
  0xee   :  { %v625_v22 = vadd.f32 %v622_v42, %v621_v25  ;;  %v628_v47 = vadd.f32 %v624_v4, %v623_v32  ;;  %v4526_v25 = vstv %s6522_s25  ;;  %v4529_v42 = vstv %s6524_s5  ;;  %s6559_s25 = sld [smem:[#allocation45_spill]]  ;;  %6569 = vst [vmem:[#allocation107_spill] sm:$0xff] %v4577_v37 }
  0xef   :  { %6546 = vst [vmem:[#allocation92_spill] sm:$0xff] %v4526_v25  ;;  %6548 = vst [vmem:[#allocation93_spill] sm:$0xff] %v4529_v42  ;;  %v4535_v32 = vstv %s6527_s7  ;;  %v4540_v4 = vstv %s6529_s29  ;;  %s4551_s5 = sld [smem:[#allocation2 + $0x62]]  ;;  %v4602_v37 = vstv %s4359_s22 }
  0xf0   :  { %626 = vadd.xlane.f32.xlu1 %v625_v22  ;;  %v4532_v22 = vstv %s4319_s0  ;;  %6552 = vst [vmem:[#allocation95_spill] sm:$0xff] %v4535_v32  ;;  %6554 = vst [vmem:[#allocation96_spill] sm:$0xff] %v4540_v4  ;;  %s4565_s0 = sld [smem:[#allocation2 + $0x72]] }
  0xf1   :  { %6544 = sst [smem:[#allocation10_spill]] %s4523_s16  ;;  %6550 = vst [vmem:[#allocation94_spill] sm:$0xff] %v4532_v22  ;;  %6580 = vst [vmem:[#allocation114_spill] sm:$0xff] %v4602_v37 }
  0xf2   :  { %s6557_s16 = sld [smem:[#allocation44_spill]] }
  0xf3   :  { %s6571_s7 = sld [smem:[#allocation55_spill]] }
  0xf4   :  { %629 = vadd.xlane.f32.xlu1 %v628_v47  ;;  %v4543_v47 = vstv %s4325_s23  ;;  %s6565_s23 = sld [smem:[#allocation46_spill]] }
  0xf5   :  { %6556 = vst [vmem:[#allocation97_spill] sm:$0xff] %v4543_v47  ;;  %s6573_s29 = sld [smem:[#allocation5_spill]]  ;;  %v4664_v22 = vstv %s4551_s5 }
  0xf6   :  { %s6591_s22 = sld [smem:[#allocation10_spill]]  ;;  %6601 = vst [vmem:[#allocation132_spill] sm:$0xff] %v4664_v22 }
  0xf7   :  { %s5176_s28 = sld [smem:[#allocation2 + $0x84]] }
  0xf8   :  { %s5232_s5 = sld [smem:[#allocation2 + $0x55]] }
  0xf9   :  { %v4627_v37 = vstv %s6571_s7  ;;  %s5272_s7 = sld [smem:[#allocation2 + $0x95]] }
  0xfa   :  { %6588 = vst [vmem:[#allocation121_spill] sm:$0xff] %v4627_v37 }
 0x105   :  { %647 = vperm.xlu1 %3766, %v608_v36  }
 0x109   :  { %3767 = vset.pattern.permute.xlu1 %v3791_v57  ;;  %v4546_v57 = vstv %s6532_s9  ;;  %s6575_s9 = sld [smem:[#allocation6_spill]] }
 0x10a   :  { %6558 = vst [vmem:[#allocation98_spill] sm:$0xff] %v4546_v57 }
 0x179   :  { %v627_v48 = vpop.xlane.xlu1 %626 }
 0x17d   :  { %v630_v51 = vpop.xlane.xlu1 %629 }
 0x17e   :  { %v631_v58 = vadd.f32 %v630_v51, %v627_v48  ;;  %v4554_v48 = vstv %s6537_s6  ;;  %v4557_v51 = vstv %s4333_s17  ;;  %s4579_s17 = sld [smem:[#allocation2 + $0x82]] }
 0x17f   :  { %6561 = vst [vmem:[#allocation100_spill] sm:$0xff] %v4554_v48  ;;  %6562 = vst [vmem:[#allocation101_spill] sm:$0xff] %v4557_v51  ;;  %v4588_v51 = vstv %s6557_s16  ;;  %s6581_s6 = sld [smem:[#allocation8_spill]]  ;;  %v4619_v48 = vstv %s4369_s19 }
 0x180   :  { %v632_v0 = vmul.f32 0.001953125, %v631_v58  ;;  %v4560_v58 = vstv %s6540_s13  ;;  %6574 = vst [vmem:[#allocation110_spill] sm:$0xff] %v4588_v51  ;;  %s4607_s13 = sld [smem:[#allocation2 + $0x23]]  ;;  %v4610_v51 = vstv %s6565_s23  ;;  %6586 = vst [vmem:[#allocation119_spill] sm:$0xff] %v4619_v48 }
 0x181   :  { %6563 = vst [vmem:[#allocation102_spill] sm:$0xff] %v4560_v58  ;;  %v4582_v58 = vstv %s6553_s14  ;;  %6583 = vst [vmem:[#allocation116_spill] sm:$0xff] %v4610_v51  ;;  %v648_v51 = vpop.permute.xlu1 %647  ;;  %s5109_s19 = sld [smem:[#allocation2 + $0x73]] }
 0x182   :  { %v633_v27 = vadd.f32 1e-05, %v632_v0  ;;  %v4563_v0 = vstv %s6542_s15  ;;  %6570 = vst [vmem:[#allocation108_spill] sm:$0xff] %v4582_v58  ;;  %v4605_v58 = vstv %s4361_s24  ;;  %s5115_s24 = sld [smem:[#allocation2 + $0x83]] }
 0x183   :  { %6564 = vst [vmem:[#allocation103_spill] sm:$0xff] %v4563_v0  ;;  %v4585_v0 = vstv %s6555_s30  ;;  %6582 = vst [vmem:[#allocation115_spill] sm:$0xff] %v4605_v58  ;;  %v4630_v58 = vstv %s6573_s29  ;;  %s5140_s15 = sld [smem:[#allocation2 + $0x44]] }
 0x184   :  { %3770 = vrsqrt.f32 %v633_v27  ;;  %v4568_v27 = vstv %s6545_s10  ;;  %6572 = vst [vmem:[#allocation109_spill] sm:$0xff] %v4585_v0  ;;  %v4613_v0 = vstv %s4365_s2  ;;  %6590 = vst [vmem:[#allocation122_spill] sm:$0xff] %v4630_v58  ;;  %s3660_s2 = sld [smem:[#allocation2 + $0x43]] }
 0x185   :  { %6566 = vst [vmem:[#allocation104_spill] sm:$0xff] %v4568_v27  ;;  %v4591_v27 = vstv %s6559_s25  ;;  %6584 = vst [vmem:[#allocation117_spill] sm:$0xff] %v4613_v0  ;;  %v4639_v48 = vstv %s6581_s6  ;;  %s5156_s16 = sld [smem:[#allocation2 + $0x54]] }
 0x186   :  { %6576 = vst [vmem:[#allocation111_spill] sm:$0xff] %v4591_v27  ;;  %v4616_v27 = vstv %s4367_s18  ;;  %6594 = vst [vmem:[#allocation125_spill] sm:$0xff] %v4639_v48  ;;  %v4652_v48 = vstv %s4495_s8  ;;  %s5105_s18 = sld [smem:[#allocation2 + $0x63]] }
 0x187   :  { %6585 = vst [vmem:[#allocation118_spill] sm:$0xff] %v4616_v27  ;;  %6597 = vst [vmem:[#allocation128_spill] sm:$0xff] %v4652_v48  ;;  %s5135_s8 = sld [smem:[#allocation2 + $0x34]] }
 0x188   :  { %s5162_s10 = sld [smem:[#allocation2 + $0x64]] }
 0x189   :  { %s5202_s14 = sld [smem:[#allocation2 + $0x25]] }
 0x18a   :  { %s5214_s30 = sld [smem:[#allocation2 + $0x35]] }
 0x18b   :  { %s5220_s25 = sld [smem:[#allocation2 + $0x45]] }
 0x18c   :  { %s5250_s23 = sld [smem:[#allocation2 + $0x75]] }
 0x18d   :  { %s5278_s29 = sld [smem:[#allocation2 + $0x26]] }
 0x18e   :  { %s5314_s6 = sld [smem:[#allocation2 + $0x66]] }
 0x191   :  { %v3771_v13 = vpop.eup %3770 }
 0x192   :  { %v635_v14 = vmul.f32 %v3771_v13, %v608_v36  ;;  %v4549_v36 = vstv %s6534_s11  ;;  %v4571_v13 = vstv %s6547_s26  ;;  %s4593_s11 = sld [smem:[#allocation2 + $0x92]] }
 0x193   :  { %6560 = vst [vmem:[#allocation99_spill] sm:$0xff] %v4549_v36  ;;  %6567 = vst [vmem:[#allocation105_spill] sm:$0xff] %v4571_v13  ;;  %v4599_v13 = vstv %s4357_s21  ;;  %s6589_s21 = sld [smem:[#allocation9_spill]]  ;;  %v4642_v36 = vstv %s4467_s27 }
 0x194   :  { %638 = vperm.xlu0 %3765, %v635_v14   ;;  %v4574_v14 = vstv %s6549_s12  ;;  %6578 = vst [vmem:[#allocation113_spill] sm:$0xff] %v4599_v13  ;;  %s6579_s12 = sld [smem:[#allocation7_spill]]  ;;  %v4624_v13 = vstv %s4383_s3  ;;  %6595 = vst [vmem:[#allocation126_spill] sm:$0xff] %v4642_v36  ;;  %v4658_v36 = vstv %s6591_s22 }
 0x195   :  { %6568 = vst [vmem:[#allocation106_spill] sm:$0xff] %v4574_v14  ;;  %v4596_v14 = vstv %s4355_s20  ;;  %s4621_s20 = sld [smem:[#allocation2 + $0x33]]  ;;  %6587 = vst [vmem:[#allocation120_spill] sm:$0xff] %v4624_v13  ;;  %v4645_v13 = vstv %s4481_s4 }
 0x196   :  { %6577 = vst [vmem:[#allocation112_spill] sm:$0xff] %v4596_v14  ;;  %v4633_v14 = vstv %s6575_s9  ;;  %6596 = vst [vmem:[#allocation127_spill] sm:$0xff] %v4645_v13  ;;  %s3661_s3 = sld [smem:[#allocation2 + $0x53]]  ;;  %v4661_v13 = vstv %s4537_s1 }
 0x197   :  { %6592 = vst [vmem:[#allocation123_spill] sm:$0xff] %v4633_v14  ;;  %6599 = vst [vmem:[#allocation130_spill] sm:$0xff] %v4658_v36  ;;  %s5125_s27 = sld [smem:[#allocation2 + $0x93]] }
 0x198   :  { %6600 = vst [vmem:[#allocation131_spill] sm:$0xff] %v4661_v13  ;;  %s5131_s4 = sld [smem:[#allocation2 + $0x24]] }
 0x199   :  { %v4655_v57 = vstv %s6589_s21  ;;  %s5174_s26 = sld [smem:[#allocation2 + $0x74]] }
 0x19a   :  { %v4636_v27 = vstv %s6579_s12  ;;  %6598 = vst [vmem:[#allocation129_spill] sm:$0xff] %v4655_v57  ;;  %v4680_v57 = vstv %s4607_s13  ;;  %s5196_s1 = sld [smem:[#allocation2 + $0x94]] }
 0x19b   :  { %6593 = vst [vmem:[#allocation124_spill] sm:$0xff] %v4636_v27  ;;  %6605 = vst [vmem:[#allocation136_spill] sm:$0xff] %v4680_v57  ;;  %v4683_v36 = vstv %s4621_s20  ;;  %s5290_s9 = sld [smem:[#allocation2 + $0x36]] }
 0x19c   :  { %6606 = vst [vmem:[#allocation137_spill] sm:$0xff] %v4683_v36  ;;  %s5308_s12 = sld [smem:[#allocation2 + $0x56]] }
 0x19d   :  { %s5326_s13 = sld [smem:[#allocation2 + $0x76]] }
 0x19e   :  { %s5328_s20 = sld [smem:[#allocation2 + $0x86]] }
 0x19f   :  { %s5348_s21 = sld [smem:[#allocation2 + $0x96]] }
 0x1a0   :  { %s5354_s22 = sld [smem:[#allocation2 + $0x27]] }
 0x20f   :  { %v639_v0 = vpop.permute.xlu0 %638 }
 0x210   :  { %v641_v58 = vmul.f32 %v639_v0, %v4206_v46  ;;  %v642_v14 = vmul.f32 %v639_v0, %v4209_v28  ;;  %v643_v37 = vmul.f32 %v639_v0, %v4211_v60  ;;  %v644_v27 = vmul.f32 %v639_v0, %v4213_v41 }
 0x211   :  { %v4667_v28 = vstv %s4565_s0  ;;  %v4670_v60 = vstv %s4579_s17  ;;  %v4673_v41 = vstv %s4593_s11  ;;  %s5238_s0 = sld [smem:[#allocation2 + $0x65]] }
 0x212   :  { %v650_v47 = vadd.f32 %v648_v51, %v641_v58  ;;  %v651_v4 = vadd.f32 %v648_v51, %v642_v14  ;;  %v652_v32 = vadd.f32 %v648_v51, %v643_v37  ;;  %v653_v46 = vadd.f32 %v648_v51, %v644_v27  ;;  %6602 = vst [vmem:[#allocation133_spill] sm:$0xff] %v4667_v28  ;;  %s5252_s17 = sld [smem:[#allocation2 + $0x85]] }
 0x213   :  { %6603 = vst [vmem:[#allocation134_spill] sm:$0xff] %v4670_v60  ;;  %6604 = vst [vmem:[#allocation135_spill] sm:$0xff] %v4673_v41  ;;  %v4689_v51 = vstv %s3660_s2  ;;  %v4691_v27 = vstv %s3661_s3  ;;  %s5296_s11 = sld [smem:[#allocation2 + $0x46]] }
 0x214   :  { %v4675_v0 = vmax.f32 %v650_v47, 0.0  ;;  %v4677_v48 = vmax.f32 %v651_v4, 0.0  ;;  %v4685_v58 = vmax.f32 %v652_v32, 0.0  ;;  %v4687_v37 = vmax.f32 %v653_v46, 0.0  ;;  %6609 = vst [vmem:[#allocation140_spill] sm:$0xff] %v4689_v51  ;;  %6610 = vst [vmem:[#allocation141_spill] sm:$0xff] %v4691_v27 }
 0x215   :  { %s5366_s2 = sld [smem:[#allocation2 + $0x37]] }
 0x216   :  { %6607 = vst [vmem:[#allocation138_spill] sm:$0xff] %v4685_v58  ;;  %6608 = vst [vmem:[#allocation139_spill] sm:$0xff] %v4687_v37  ;;  %v1940_v14 = vmul.f32 %v4372_v1, %v4675_v0  ;;  %v1941_v47 = vmul.f32 %v4372_v1, %v4677_v48  ;;  %v1946_v4 = vmul.f32 %v4375_v9, %v4675_v0  ;;  %s5372_s3 = sld [smem:[#allocation2 + $0x47]] }
 0x217   :  { %v1947_v36 = vmul.f32 %v4375_v9, %v4677_v48  ;;  %v1968_v32 = vmul.f32 %v4378_v21, %v4675_v0  ;;  %v1969_v46 = vmul.f32 %v4378_v21, %v4677_v48  ;;  %v1990_v37 = vmul.f32 %v4381_v29, %v4675_v0 }
 0x218   :  { %v1991_v58 = vmul.f32 %v4381_v29, %v4677_v48  ;;  %v1954_v27 = vrot.slane %v1946_v4, 1  ;;  %v2012_v51 = vmul.f32 %v4386_v35, %v4675_v0  ;;  %v2013_v9 = vmul.f32 %v4386_v35, %v4677_v48 }
 0x219   :  { %v1955_v1 = vrot.slane %v1947_v36, 1  ;;  %v1976_v57 = vrot.slane %v1968_v32, 2  ;;  %v1977_v41 = vrot.slane %v1969_v46, 2  ;;  %v1998_v60 = vrot.slane %v1990_v37, 3 }
 0x21a   :  { %v1999_v28 = vrot.slane %v1991_v58, 3  ;;  %v1962_v22 = vadd.f32 %v1954_v27, %v1940_v14  ;;  %v2020_v13 = vrot.slane %v2012_v51, 4  ;;  %v2021_v42 = vrot.slane %v2013_v9, 4 }
 0x21b   :  { %v1963_v21 = vadd.f32 %v1955_v1, %v1941_v47  ;;  %v2034_v25 = vmul.f32 %v4389_v26, %v4675_v0  ;;  %v2035_v36 = vmul.f32 %v4389_v26, %v4677_v48  ;;  %v2056_v4 = vmul.f32 %v4392_v15, %v4675_v0 }
 0x21c   :  { %v2057_v35 = vmul.f32 %v4392_v15, %v4677_v48  ;;  %v1984_v32 = vadd.f32 %v1976_v57, %v1962_v22  ;;  %v2078_v58 = vmul.f32 %v4395_v16, %v4675_v0  ;;  %v2079_v1 = vmul.f32 %v4395_v16, %v4677_v48 }
 0x21d   :  { %v1985_v46 = vadd.f32 %v1977_v41, %v1963_v21  ;;  %v2042_v9 = vrot.slane %v2034_v25, 5  ;;  %v2043_v37 = vrot.slane %v2035_v36, 5  ;;  %v2064_v51 = vrot.slane %v2056_v4, 6 }
 0x21e   :  { %v2065_v27 = vrot.slane %v2057_v35, 6  ;;  %v2006_v14 = vadd.f32 %v1998_v60, %v1984_v32  ;;  %v2086_v26 = vrot.slane %v2078_v58, 7  ;;  %v2087_v29 = vrot.slane %v2079_v1, 7 }
 0x21f   :  { %v2007_v47 = vadd.f32 %v1999_v28, %v1985_v46  ;;  %v2100_v39 = vmul.f32 %v4400_v38, %v4675_v0  ;;  %v2101_v21 = vmul.f32 %v4400_v38, %v4677_v48  ;;  %v2106_v22 = vmul.f32 %v4403_v49, %v4675_v0 }
 0x220   :  { %v2107_v57 = vmul.f32 %v4403_v49, %v4677_v48  ;;  %v2028_v25 = vadd.f32 %v2020_v13, %v2006_v14  ;;  %v2128_v35 = vmul.f32 %v4406_v3, %v4675_v0  ;;  %v2129_v28 = vmul.f32 %v4406_v3, %v4677_v48 }
 0x221   :  { %v2029_v41 = vadd.f32 %v2021_v42, %v2007_v47  ;;  %v2114_v60 = vrot.slane %v2106_v22, 1  ;;  %v2150_v4 = vmul.f32 %v4409_v50, %v4675_v0  ;;  %v2151_v32 = vmul.f32 %v4409_v50, %v4677_v48 }
 0x222   :  { %v2115_v36 = vrot.slane %v2107_v57, 1  ;;  %v2050_v46 = vadd.f32 %v2042_v9, %v2028_v25  ;;  %v2136_v1 = vrot.slane %v2128_v35, 2  ;;  %v2137_v49 = vrot.slane %v2129_v28, 2 }
 0x223   :  { %v2051_v58 = vadd.f32 %v2043_v37, %v2029_v41  ;;  %v2122_v13 = vadd.f32 %v2114_v60, %v2100_v39  ;;  %v2158_v14 = vrot.slane %v2150_v4, 3  ;;  %v2159_v47 = vrot.slane %v2151_v32, 3 }
 0x224   :  { %v2123_v42 = vadd.f32 %v2115_v36, %v2101_v21  ;;  %v2072_v38 = vadd.f32 %v2064_v51, %v2050_v46  ;;  %v2172_v22 = vmul.f32 %v4414_v44, %v4675_v0  ;;  %v2173_v57 = vmul.f32 %v4414_v44, %v4677_v48 }
 0x225   :  { %v2073_v16 = vadd.f32 %v2065_v27, %v2051_v58  ;;  %v2144_v3 = vadd.f32 %v2136_v1, %v2122_v13  ;;  %v2194_v9 = vmul.f32 %v4417_v61, %v4675_v0  ;;  %v2195_v37 = vmul.f32 %v4417_v61, %v4677_v48 }
 0x226   :  { %v2145_v15 = vadd.f32 %v2137_v49, %v2123_v42  ;;  %v4749_v39 = vadd.f32 %v2086_v26, %v2072_v38  ;;  %v2180_v51 = vrot.slane %v2172_v22, 4  ;;  %v2181_v27 = vrot.slane %v2173_v57, 4 }
 0x227   :  { %v4751_v21 = vadd.f32 %v2087_v29, %v2073_v16  ;;  %v2166_v25 = vadd.f32 %v2158_v14, %v2144_v3  ;;  %v2202_v35 = vrot.slane %v2194_v9, 5  ;;  %v2203_v28 = vrot.slane %v2195_v37, 5 }
 0x228   :  { %v2167_v41 = vadd.f32 %v2159_v47, %v2145_v15  ;;  %v2216_v60 = vmul.f32 %v4420_v40, %v4675_v0  ;;  %v2217_v49 = vmul.f32 %v4420_v40, %v4677_v48  ;;  %v2238_v36 = vmul.f32 %v4423_v2, %v4675_v0 }
 0x229   :  { %v2239_v26 = vmul.f32 %v4423_v2, %v4677_v48  ;;  %v2188_v29 = vadd.f32 %v2180_v51, %v2166_v25  ;;  %v2260_v38 = vmul.f32 %v4428_v8, %v4675_v0  ;;  %v2261_v15 = vmul.f32 %v4428_v8, %v4677_v48 }
 0x22a   :  { %v2189_v16 = vadd.f32 %v2181_v27, %v2167_v41  ;;  %v2224_v3 = vrot.slane %v2216_v60, 6  ;;  %v2225_v4 = vrot.slane %v2217_v49, 6  ;;  %v2246_v32 = vrot.slane %v2238_v36, 7 }
 0x22b   :  { %v2247_v46 = vrot.slane %v2239_v26, 7  ;;  %v2210_v58 = vadd.f32 %v2202_v35, %v2188_v29  ;;  %v2266_v13 = vmul.f32 %v4431_v20, %v4675_v0  ;;  %v2267_v42 = vmul.f32 %v4431_v20, %v4677_v48 }
 0x22c   :  { %v2211_v1 = vadd.f32 %v2203_v28, %v2189_v16  ;;  %v2288_v14 = vmul.f32 %v4434_v23, %v4675_v0  ;;  %v2289_v47 = vmul.f32 %v4434_v23, %v4677_v48  ;;  %v2310_v22 = vmul.f32 %v4437_v52, %v4675_v0 }
 0x22d   :  { %v2311_v57 = vmul.f32 %v4437_v52, %v4677_v48  ;;  %v2232_v9 = vadd.f32 %v2224_v3, %v2210_v58  ;;  %v2274_v51 = vrot.slane %v2266_v13, 1  ;;  %v2275_v27 = vrot.slane %v2267_v42, 1 }
 0x22e   :  { %v2233_v37 = vadd.f32 %v2225_v4, %v2211_v1  ;;  %v2296_v25 = vrot.slane %v2288_v14, 2  ;;  %v2297_v41 = vrot.slane %v2289_v47, 2  ;;  %v2318_v35 = vrot.slane %v2310_v22, 3 }
 0x22f   :  { %v2319_v28 = vrot.slane %v2311_v57, 3  ;;  %v4777_v60 = vadd.f32 %v2246_v32, %v2232_v9  ;;  %v2282_v36 = vadd.f32 %v2274_v51, %v2260_v38  ;;  %v2283_v26 = vadd.f32 %v2275_v27, %v2261_v15 }
 0x230   :  { %v4779_v49 = vadd.f32 %v2247_v46, %v2233_v37  ;;  %v2332_v29 = vmul.f32 %v4442_v45, %v4675_v0  ;;  %v2333_v16 = vmul.f32 %v4442_v45, %v4677_v48  ;;  %v2354_v3 = vmul.f32 %v4445_v33, %v4675_v0 }
 0x231   :  { %v2355_v4 = vmul.f32 %v4445_v33, %v4677_v48  ;;  %v2304_v58 = vadd.f32 %v2296_v25, %v2282_v36  ;;  %v2305_v1 = vadd.f32 %v2297_v41, %v2283_v26  ;;  %v2376_v32 = vmul.f32 %v4448_v34, %v4675_v0 }
 0x232   :  { %v2377_v38 = vmul.f32 %v4448_v34, %v4677_v48  ;;  %v2340_v15 = vrot.slane %v2332_v29, 4  ;;  %v2341_v46 = vrot.slane %v2333_v16, 4  ;;  %v2362_v13 = vrot.slane %v2354_v3, 5 }
 0x233   :  { %v2363_v42 = vrot.slane %v2355_v4, 5  ;;  %v2326_v14 = vadd.f32 %v2318_v35, %v2304_v58  ;;  %v2327_v47 = vadd.f32 %v2319_v28, %v2305_v1  ;;  %v2384_v22 = vrot.slane %v2376_v32, 6 }
 0x234   :  { %v2385_v57 = vrot.slane %v2377_v38, 6  ;;  %v2398_v9 = vmul.f32 %v4451_v53, %v4675_v0  ;;  %v2399_v37 = vmul.f32 %v4451_v53, %v4677_v48  ;;  %v2420_v51 = vmul.f32 %v4456_v54, %v4675_v0 }
 0x235   :  { %v2421_v27 = vmul.f32 %v4456_v54, %v4677_v48  ;;  %v2348_v25 = vadd.f32 %v2340_v15, %v2326_v14  ;;  %v2349_v41 = vadd.f32 %v2341_v46, %v2327_v47  ;;  %v2426_v35 = vmul.f32 %v4459_v62, %v4675_v0 }
 0x236   :  { %v2427_v28 = vmul.f32 %v4459_v62, %v4677_v48  ;;  %v2406_v36 = vrot.slane %v2398_v9, 7  ;;  %v2407_v26 = vrot.slane %v2399_v37, 7  ;;  %v2448_v29 = vmul.f32 %v4462_v11, %v4675_v0 }
 0x237   :  { %v2449_v16 = vmul.f32 %v4462_v11, %v4677_v48  ;;  %v2370_v3 = vadd.f32 %v2362_v13, %v2348_v25  ;;  %v2371_v4 = vadd.f32 %v2363_v42, %v2349_v41  ;;  %v2434_v58 = vrot.slane %v2426_v35, 1 }
 0x238   :  { %v2435_v1 = vrot.slane %v2427_v28, 1  ;;  %v2456_v32 = vrot.slane %v2448_v29, 2  ;;  %v2470_v15 = vmul.f32 %v4465_v63, %v4675_v0  ;;  %v2471_v46 = vmul.f32 %v4465_v63, %v4677_v48 }
 0x239   :  { %v2457_v38 = vrot.slane %v2449_v16, 2  ;;  %v2392_v14 = vadd.f32 %v2384_v22, %v2370_v3  ;;  %v2393_v47 = vadd.f32 %v2385_v57, %v2371_v4  ;;  %v2442_v9 = vadd.f32 %v2434_v58, %v2420_v51 }
 0x23a   :  { %v2443_v37 = vadd.f32 %v2435_v1, %v2421_v27  ;;  %v2478_v54 = vrot.slane %v2470_v15, 3  ;;  %v2479_v62 = vrot.slane %v2471_v46, 3  ;;  %v2492_v13 = vmul.f32 %v4470_v55, %v4675_v0 }
 0x23b   :  { %v2493_v42 = vmul.f32 %v4470_v55, %v4677_v48  ;;  %v4817_v25 = vadd.f32 %v2406_v36, %v2392_v14  ;;  %v4819_v41 = vadd.f32 %v2407_v26, %v2393_v47  ;;  %v2464_v35 = vadd.f32 %v2456_v32, %v2442_v9 }
 0x23c   :  { %v2465_v28 = vadd.f32 %v2457_v38, %v2443_v37  ;;  %v2500_v29 = vrot.slane %v2492_v13, 4  ;;  %v2514_v22 = vmul.f32 %v4473_v56, %v4675_v0  ;;  %v2515_v57 = vmul.f32 %v4473_v56, %v4677_v48 }
 0x23d   :  { %v2501_v16 = vrot.slane %v2493_v42, 4  ;;  %v2486_v51 = vadd.f32 %v2478_v54, %v2464_v35  ;;  %v2536_v3 = vmul.f32 %v4476_v12, %v4675_v0  ;;  %v2537_v36 = vmul.f32 %v4476_v12, %v4677_v48 }
 0x23e   :  { %v2487_v27 = vadd.f32 %v2479_v62, %v2465_v28  ;;  %v2522_v26 = vrot.slane %v2514_v22, 5  ;;  %v2523_v4 = vrot.slane %v2515_v57, 5  ;;  %v2558_v58 = vmul.f32 %v4479_v5, %v4675_v0 }
 0x23f   :  { %v2559_v1 = vmul.f32 %v4479_v5, %v4677_v48  ;;  %v2508_v32 = vadd.f32 %v2500_v29, %v2486_v51  ;;  %v2544_v15 = vrot.slane %v2536_v3, 6  ;;  %v2545_v46 = vrot.slane %v2537_v36, 6 }
 0x240   :  { %v2509_v38 = vadd.f32 %v2501_v16, %v2487_v27  ;;  %v2566_v54 = vrot.slane %v2558_v58, 7  ;;  %v2580_v14 = vmul.f32 %v4484_v10, %v4675_v0  ;;  %v2581_v47 = vmul.f32 %v4484_v10, %v4677_v48 }
 0x241   :  { %v2567_v62 = vrot.slane %v2559_v1, 7  ;;  %v2530_v9 = vadd.f32 %v2522_v26, %v2508_v32  ;;  %v2586_v13 = vmul.f32 %v4487_v19, %v4675_v0  ;;  %v2587_v42 = vmul.f32 %v4487_v19, %v4677_v48 }
 0x242   :  { %v2531_v37 = vadd.f32 %v2523_v4, %v2509_v38  ;;  %v2608_v35 = vmul.f32 %v4490_v17, %v4675_v0  ;;  %v2609_v28 = vmul.f32 %v4490_v17, %v4677_v48  ;;  %v2630_v29 = vmul.f32 %v4493_v30, %v4675_v0 }
 0x243   :  { %v2631_v16 = vmul.f32 %v4493_v30, %v4677_v48  ;;  %v2552_v22 = vadd.f32 %v2544_v15, %v2530_v9  ;;  %v2594_v51 = vrot.slane %v2586_v13, 1  ;;  %v2595_v27 = vrot.slane %v2587_v42, 1 }
 0x244   :  { %v2553_v57 = vadd.f32 %v2545_v46, %v2531_v37  ;;  %v2616_v3 = vrot.slane %v2608_v35, 2  ;;  %v2617_v36 = vrot.slane %v2609_v28, 2  ;;  %v2638_v26 = vrot.slane %v2630_v29, 3 }
 0x245   :  { %v2639_v4 = vrot.slane %v2631_v16, 3  ;;  %v4849_v58 = vadd.f32 %v2566_v54, %v2552_v22  ;;  %v2602_v32 = vadd.f32 %v2594_v51, %v2580_v14  ;;  %v2603_v38 = vadd.f32 %v2595_v27, %v2581_v47 }
 0x246   :  { %v4851_v1 = vadd.f32 %v2567_v62, %v2553_v57  ;;  %v2652_v10 = vmul.f32 %v4498_v43, %v4675_v0  ;;  %v2653_v30 = vmul.f32 %v4498_v43, %v4677_v48  ;;  %v2674_v15 = vmul.f32 %v4501_v18, %v4675_v0 }
 0x247   :  { %v2675_v46 = vmul.f32 %v4501_v18, %v4677_v48  ;;  %v2624_v9 = vadd.f32 %v2616_v3, %v2602_v32  ;;  %v2625_v37 = vadd.f32 %v2617_v36, %v2603_v38  ;;  %v2696_v54 = vmul.f32 %v4504_v59, %v4675_v0 }
 0x248   :  { %v2697_v62 = vmul.f32 %v4504_v59, %v4677_v48  ;;  %v2660_v14 = vrot.slane %v2652_v10, 4  ;;  %v2661_v47 = vrot.slane %v2653_v30, 4  ;;  %v2682_v13 = vrot.slane %v2674_v15, 5 }
 0x249   :  { %v2683_v42 = vrot.slane %v2675_v46, 5  ;;  %v2646_v35 = vadd.f32 %v2638_v26, %v2624_v9  ;;  %v2647_v28 = vadd.f32 %v2639_v4, %v2625_v37  ;;  %v2704_v29 = vrot.slane %v2696_v54, 6 }
 0x24a   :  { %v2705_v16 = vrot.slane %v2697_v62, 6  ;;  %v2718_v22 = vmul.f32 %v4507_v31, %v4675_v0  ;;  %v2719_v57 = vmul.f32 %v4507_v31, %v4677_v48  ;;  %v2740_v51 = vmul.f32 %v4512_v6, %v4675_v0 }
 0x24b   :  { %v2741_v27 = vmul.f32 %v4512_v6, %v4677_v48  ;;  %v2668_v10 = vadd.f32 %v2660_v14, %v2646_v35  ;;  %v2669_v30 = vadd.f32 %v2661_v47, %v2647_v28  ;;  %v2746_v3 = vmul.f32 %v4515_v7, %v4675_v0  ;;  %v6611_v14 = vld [vmem:[#allocation91_spill] sm:$0xff] }
 0x24c   :  { %v2747_v36 = vmul.f32 %v4515_v7, %v4677_v48  ;;  %v2726_v26 = vrot.slane %v2718_v22, 7  ;;  %v2727_v4 = vrot.slane %v2719_v57, 7  ;;  %v2768_v32 = vmul.f32 %v4518_v24, %v4675_v0 }
 0x24d   :  { %v2769_v38 = vmul.f32 %v4518_v24, %v4677_v48  ;;  %v2690_v15 = vadd.f32 %v2682_v13, %v2668_v10  ;;  %v2691_v46 = vadd.f32 %v2683_v42, %v2669_v30  ;;  %v2754_v9 = vrot.slane %v2746_v3, 1  ;;  %v6612_v24 = vld [vmem:[#allocation92_spill] sm:$0xff] }
 0x24e   :  { %v2755_v37 = vrot.slane %v2747_v36, 1  ;;  %v2776_v54 = vrot.slane %v2768_v32, 2  ;;  %v2790_v47 = vmul.f32 %v6611_v14, %v4675_v0  ;;  %v2791_v35 = vmul.f32 %v6611_v14, %v4677_v48  ;;  %v6620_v14 = vld [vmem:[#allocation100_spill] sm:$0xff] }
 0x24f   :  { %v2777_v62 = vrot.slane %v2769_v38, 2  ;;  %v2712_v28 = vadd.f32 %v2704_v29, %v2690_v15  ;;  %v2713_v22 = vadd.f32 %v2705_v16, %v2691_v46  ;;  %v2762_v57 = vadd.f32 %v2754_v9, %v2740_v51  ;;  %v6613_v29 = vld [vmem:[#allocation93_spill] sm:$0xff]  ;;  %v6614_v46 = vld [vmem:[#allocation94_spill] sm:$0xff] }
 0x250   :  { %v2763_v6 = vadd.f32 %v2755_v37, %v2741_v27  ;;  %v2798_v7 = vrot.slane %v2790_v47, 3  ;;  %v2799_v31 = vrot.slane %v2791_v35, 3  ;;  %v2812_v13 = vmul.f32 %v6612_v24, %v4675_v0 }
 0x251   :  { %v2813_v42 = vmul.f32 %v6612_v24, %v4677_v48  ;;  %v4889_v10 = vadd.f32 %v2726_v26, %v2712_v28  ;;  %v4891_v30 = vadd.f32 %v2727_v4, %v2713_v22  ;;  %v2784_v3 = vadd.f32 %v2776_v54, %v2762_v57  ;;  %v6616_v57 = vld [vmem:[#allocation96_spill] sm:$0xff] }
 0x252   :  { %v2785_v36 = vadd.f32 %v2777_v62, %v2763_v6  ;;  %v2820_v32 = vrot.slane %v2812_v13, 4  ;;  %v2834_v16 = vmul.f32 %v6613_v29, %v4675_v0  ;;  %v2835_v51 = vmul.f32 %v6613_v29, %v4677_v48  ;;  %v6615_v6 = vld [vmem:[#allocation95_spill] sm:$0xff] }
 0x253   :  { %v2821_v38 = vrot.slane %v2813_v42, 4  ;;  %v2806_v27 = vadd.f32 %v2798_v7, %v2784_v3  ;;  %v2856_v9 = vmul.f32 %v6614_v46, %v4675_v0  ;;  %v2857_v26 = vmul.f32 %v6614_v46, %v4677_v48 }
 0x254   :  { %v2807_v15 = vadd.f32 %v2799_v31, %v2785_v36  ;;  %v2842_v4 = vrot.slane %v2834_v16, 5  ;;  %v2843_v37 = vrot.slane %v2835_v51, 5  ;;  %v2878_v54 = vmul.f32 %v6615_v6, %v4675_v0  ;;  %v6617_v16 = vld [vmem:[#allocation97_spill] sm:$0xff] }
 0x255   :  { %v2879_v62 = vmul.f32 %v6615_v6, %v4677_v48  ;;  %v2828_v47 = vadd.f32 %v2820_v32, %v2806_v27  ;;  %v2864_v28 = vrot.slane %v2856_v9, 6  ;;  %v2865_v22 = vrot.slane %v2857_v26, 6  ;;  %v6618_v32 = vld [vmem:[#allocation98_spill] sm:$0xff] }
 0x256   :  { %v2829_v35 = vadd.f32 %v2821_v38, %v2807_v15  ;;  %v2886_v7 = vrot.slane %v2878_v54, 7  ;;  %v2900_v13 = vmul.f32 %v6616_v57, %v4675_v0  ;;  %v2901_v42 = vmul.f32 %v6616_v57, %v4677_v48  ;;  %v6619_v15 = vld [vmem:[#allocation99_spill] sm:$0xff] }
 0x257   :  { %v2887_v31 = vrot.slane %v2879_v62, 7  ;;  %v2850_v3 = vadd.f32 %v2842_v4, %v2828_v47  ;;  %v2906_v51 = vmul.f32 %v6617_v16, %v4675_v0  ;;  %v2907_v6 = vmul.f32 %v6617_v16, %v4677_v48 }
 0x258   :  { %v2851_v36 = vadd.f32 %v2843_v37, %v2829_v35  ;;  %v2928_v38 = vmul.f32 %v6618_v32, %v4675_v0  ;;  %v2929_v27 = vmul.f32 %v6618_v32, %v4677_v48  ;;  %v2950_v9 = vmul.f32 %v6619_v15, %v4675_v0 }
 0x259   :  { %v2951_v26 = vmul.f32 %v6619_v15, %v4677_v48  ;;  %v2872_v4 = vadd.f32 %v2864_v28, %v2850_v3  ;;  %v2914_v54 = vrot.slane %v2906_v51, 1  ;;  %v2915_v62 = vrot.slane %v2907_v6, 1  ;;  %v6621_v28 = vld [vmem:[#allocation101_spill] sm:$0xff] }
 0x25a   :  { %v2873_v37 = vadd.f32 %v2865_v22, %v2851_v36  ;;  %v2936_v47 = vrot.slane %v2928_v38, 2  ;;  %v2937_v35 = vrot.slane %v2929_v27, 2  ;;  %v2958_v57 = vrot.slane %v2950_v9, 3 }
 0x25b   :  { %v2959_v16 = vrot.slane %v2951_v26, 3  ;;  %v4921_v46 = vadd.f32 %v2886_v7, %v2872_v4  ;;  %v2922_v24 = vadd.f32 %v2914_v54, %v2900_v13  ;;  %v2923_v32 = vadd.f32 %v2915_v62, %v2901_v42  ;;  %v6622_v7 = vld [vmem:[#allocation102_spill] sm:$0xff]  ;;  %v6623_v54 = vld [vmem:[#allocation103_spill] sm:$0xff] }
 0x25c   :  { %v4923_v29 = vadd.f32 %v2887_v31, %v2873_v37  ;;  %v2972_v59 = vmul.f32 %v6620_v14, %v4675_v0  ;;  %v2973_v15 = vmul.f32 %v6620_v14, %v4677_v48  ;;  %v2994_v22 = vmul.f32 %v6621_v28, %v4675_v0 }
 0x25d   :  { %v2995_v6 = vmul.f32 %v6621_v28, %v4677_v48  ;;  %v2944_v3 = vadd.f32 %v2936_v47, %v2922_v24  ;;  %v2945_v36 = vadd.f32 %v2937_v35, %v2923_v32  ;;  %v3016_v31 = vmul.f32 %v6622_v7, %v4675_v0  ;;  %v6624_v32 = vld [vmem:[#allocation104_spill] sm:$0xff] }
 0x25e   :  { %v3017_v13 = vmul.f32 %v6622_v7, %v4677_v48  ;;  %v2980_v42 = vrot.slane %v2972_v59, 4  ;;  %v2981_v51 = vrot.slane %v2973_v15, 4  ;;  %v3002_v38 = vrot.slane %v2994_v22, 5  ;;  %v6625_v22 = vld [vmem:[#allocation105_spill] sm:$0xff] }
 0x25f   :  { %v3003_v27 = vrot.slane %v2995_v6, 5  ;;  %v2966_v9 = vadd.f32 %v2958_v57, %v2944_v3  ;;  %v2967_v26 = vadd.f32 %v2959_v16, %v2945_v36  ;;  %v3024_v4 = vrot.slane %v3016_v31, 6  ;;  %v6626_v36 = vld [vmem:[#allocation106_spill] sm:$0xff] }
 0x260   :  { %v3025_v37 = vrot.slane %v3017_v13, 6  ;;  %v3038_v62 = vmul.f32 %v6623_v54, %v4675_v0  ;;  %v3039_v24 = vmul.f32 %v6623_v54, %v4677_v48  ;;  %v3060_v47 = vmul.f32 %v6624_v32, %v4675_v0 }
 0x261   :  { %v3061_v35 = vmul.f32 %v6624_v32, %v4677_v48  ;;  %v2988_v59 = vadd.f32 %v2980_v42, %v2966_v9  ;;  %v2989_v15 = vadd.f32 %v2981_v51, %v2967_v26  ;;  %v3066_v57 = vmul.f32 %v6625_v22, %v4675_v0  ;;  %v6627_v9 = vld [vmem:[#allocation107_spill] sm:$0xff] }
 0x262   :  { %v3067_v16 = vmul.f32 %v6625_v22, %v4677_v48  ;;  %v3046_v6 = vrot.slane %v3038_v62, 7  ;;  %v3047_v3 = vrot.slane %v3039_v24, 7  ;;  %v3088_v31 = vmul.f32 %v6626_v36, %v4675_v0 }
 0x263   :  { %v3089_v13 = vmul.f32 %v6626_v36, %v4677_v48  ;;  %v3010_v54 = vadd.f32 %v3002_v38, %v2988_v59  ;;  %v3011_v7 = vadd.f32 %v3003_v27, %v2989_v15  ;;  %v3074_v28 = vrot.slane %v3066_v57, 1  ;;  %v6628_v36 = vld [vmem:[#allocation108_spill] sm:$0xff] }
 0x264   :  { %v3075_v32 = vrot.slane %v3067_v16, 1  ;;  %v3096_v42 = vrot.slane %v3088_v31, 2  ;;  %v3110_v26 = vmul.f32 %v6627_v9, %v4675_v0  ;;  %v3111_v22 = vmul.f32 %v6627_v9, %v4677_v48  ;;  %v6629_v9 = vld [vmem:[#allocation109_spill] sm:$0xff] }
 0x265   :  { %v3097_v51 = vrot.slane %v3089_v13, 2  ;;  %v3032_v62 = vadd.f32 %v3024_v4, %v3010_v54  ;;  %v3033_v24 = vadd.f32 %v3025_v37, %v3011_v7  ;;  %v3082_v14 = vadd.f32 %v3074_v28, %v3060_v47  ;;  %v6630_v54 = vld [vmem:[#allocation110_spill] sm:$0xff] }
 0x266   :  { %v3083_v18 = vadd.f32 %v3075_v32, %v3061_v35  ;;  %v3118_v43 = vrot.slane %v3110_v26, 3  ;;  %v3119_v17 = vrot.slane %v3111_v22, 3  ;;  %v3132_v38 = vmul.f32 %v6628_v36, %v4675_v0 }
 0x267   :  { %v3133_v27 = vmul.f32 %v6628_v36, %v4677_v48  ;;  %v3054_v59 = vadd.f32 %v3046_v6, %v3032_v62  ;;  %v3055_v15 = vadd.f32 %v3047_v3, %v3033_v24  ;;  %v3104_v57 = vadd.f32 %v3096_v42, %v3082_v14 }
 0x268   :  { %v3105_v16 = vadd.f32 %v3097_v51, %v3083_v18  ;;  %v3140_v31 = vrot.slane %v3132_v38, 4  ;;  %v3154_v4 = vmul.f32 %v6629_v9, %v4675_v0  ;;  %v3155_v28 = vmul.f32 %v6629_v9, %v4677_v48  ;;  %v6631_v18 = vld [vmem:[#allocation111_spill] sm:$0xff] }
 0x269   :  { %v3141_v13 = vrot.slane %v3133_v27, 4  ;;  %v3126_v7 = vadd.f32 %v3118_v43, %v3104_v57  ;;  %v3176_v32 = vmul.f32 %v6630_v54, %v4675_v0  ;;  %v3177_v47 = vmul.f32 %v6630_v54, %v4677_v48 }
 0x26a   :  { %v3127_v37 = vadd.f32 %v3119_v17, %v3105_v16  ;;  %v3162_v35 = vrot.slane %v3154_v4, 5  ;;  %v3163_v22 = vrot.slane %v3155_v28, 5  ;;  %v3198_v14 = vmul.f32 %v6631_v18, %v4675_v0 }
 0x26b   :  { %v3199_v6 = vmul.f32 %v6631_v18, %v4677_v48  ;;  %v3148_v3 = vadd.f32 %v3140_v31, %v3126_v7  ;;  %v3184_v51 = vrot.slane %v3176_v32, 6  ;;  %v3185_v26 = vrot.slane %v3177_v47, 6 }
 0x26c   :  { %v3149_v42 = vadd.f32 %v3141_v13, %v3127_v37  ;;  %v3206_v43 = vrot.slane %v3198_v14, 7  ;;  %v3306_v62 = vrot.slane %v4777_v60, 7  ;;  %v3307_v24 = vrot.slane %v4779_v49, 7 }
 0x26d   :  { %v3207_v17 = vrot.slane %v3199_v6, 7  ;;  %v3170_v38 = vadd.f32 %v3162_v35, %v3148_v3  ;;  %v3318_v57 = vrot.slane %v4817_v25, 6  ;;  %v3319_v16 = vrot.slane %v4819_v41, 6 }
 0x26e   :  { %v3171_v27 = vadd.f32 %v3163_v22, %v3149_v42  ;;  %v3330_v4 = vrot.slane %v4849_v58, 5  ;;  %v3331_v28 = vrot.slane %v4851_v1, 5  ;;  %v3342_v31 = vrot.slane %v4889_v10, 4  ;;  %v6633_v42 = vld [vmem:[#allocation113_spill] sm:$0xff] }
 0x26f   :  { %v3343_v13 = vrot.slane %v4891_v30, 4  ;;  %v3192_v7 = vadd.f32 %v3184_v51, %v3170_v38  ;;  %v3354_v60 = vrot.slane %v4921_v46, 3  ;;  %v3355_v49 = vrot.slane %v4923_v29, 3  ;;  %v6632_v29 = vld [vmem:[#allocation112_spill] sm:$0xff] }
 0x270   :  { %v3193_v37 = vadd.f32 %v3185_v26, %v3171_v27  ;;  %v3366_v32 = vrot.slane %v3054_v59, 2  ;;  %v3367_v47 = vrot.slane %v3055_v15, 2  ;;  %v3414_v25 = vsel %vm573_vm0, %v4749_v39, %v3306_v62  ;;  %v6634_v62 = vld [vmem:[#allocation114_spill] sm:$0xff] }
 0x271   :  { %v3415_v41 = vsel %vm573_vm0, %v4751_v21, %v3307_v24  ;;  %v3214_v58 = vadd.f32 %v3206_v43, %v3192_v7  ;;  %v3418_v10 = vsel %vm578_vm1, %v3414_v25, %v3318_v57  ;;  %v660_v59 = vmul.f32 %v6632_v29, %v4675_v0  ;;  %v6637_v7 = vld [vmem:[#allocation115_spill] sm:$0xff] }
 0x272   :  { %v3215_v1 = vadd.f32 %v3207_v17, %v3193_v37  ;;  %v3419_v30 = vsel %vm578_vm1, %v3415_v41, %v3319_v16  ;;  %v3422_v35 = vsel %vm583_vm2, %v3418_v10, %v3330_v4  ;;  %v661_v15 = vmul.f32 %v6632_v29, %v4677_v48 }
 0x273   :  { %v3423_v46 = vsel %vm583_vm2, %v3419_v30, %v3331_v28  ;;  %v3378_v39 = vrot.slane %v3214_v58, 1  ;;  %v3426_v21 = vsel %vm588_vm3, %v3422_v35, %v3342_v31  ;;  %v666_v51 = vmul.f32 %v6633_v42, %v4675_v0 }
 0x274   :  { %v3379_v22 = vrot.slane %v3215_v1, 1  ;;  %v3427_v14 = vsel %vm588_vm3, %v3423_v46, %v3343_v13  ;;  %v3430_v6 = vsel %vm593_vm4, %v3426_v21, %v3354_v60  ;;  %v667_v26 = vmul.f32 %v6633_v42, %v4677_v48  ;;  %v6639_v1 = vld [vmem:[#allocation117_spill] sm:$0xff] }
 0x275   :  { %v3431_v3 = vsel %vm593_vm4, %v3427_v14, %v3355_v49  ;;  %v3434_v43 = vsel %vm598_vm5, %v3430_v6, %v3366_v32  ;;  %v688_v24 = vmul.f32 %v6634_v62, %v4675_v0  ;;  %v689_v38 = vmul.f32 %v6634_v62, %v4677_v48  ;;  %v6640_v14 = vld [vmem:[#allocation118_spill] sm:$0xff] }
 0x276   :  { %v3435_v17 = vsel %vm598_vm5, %v3431_v3, %v3367_v47  ;;  %v5010_v27 = vsel %vm603_vm6, %v3434_v43, %v3378_v39  ;;  %v674_v16 = vrot.slane %v666_v51, 1  ;;  %v675_v4 = vrot.slane %v667_v26, 1  ;;  %v6638_v47 = vld [vmem:[#allocation116_spill] sm:$0xff]  ;;  %v6641_v43 = vld [vmem:[#allocation119_spill] sm:$0xff] }
 0x277   :  { %6635 = vst [vmem:[#allocation112_spill] sm:$0xff] %v5010_v27  ;;  %v5013_v57 = vsel %vm603_vm6, %v3435_v17, %v3379_v22  ;;  %v696_v31 = vrot.slane %v688_v24, 2  ;;  %v697_v13 = vrot.slane %v689_v38, 2  ;;  %v710_v37 = vmul.f32 %v6637_v7, %v4675_v0 }
 0x278   :  { %6636 = vst [vmem:[#allocation113_spill] sm:$0xff] %v5013_v57  ;;  %v3447_v28 = vadd.f32 %v5013_v57, %v5010_v27  ;;  %v682_v60 = vadd.f32 %v674_v16, %v660_v59  ;;  %v683_v49 = vadd.f32 %v675_v4, %v661_v15  ;;  %v711_v32 = vmul.f32 %v6637_v7, %v4677_v48  ;;  %v6642_v16 = vld [vmem:[#allocation120_spill] sm:$0xff] }
 0x279   :  { %v732_v25 = vmul.f32 %v6638_v47, %v4675_v0  ;;  %v718_v41 = vrot.slane %v710_v37, 3  ;;  %v733_v58 = vmul.f32 %v6638_v47, %v4677_v48  ;;  %v754_v10 = vmul.f32 %v6639_v1, %v4675_v0 }
 0x27a   :  { %3448 = vadd.xlane.f32.xlu0 %v3447_v28  ;;  %v755_v30 = vmul.f32 %v6639_v1, %v4677_v48  ;;  %v704_v35 = vadd.f32 %v696_v31, %v682_v60  ;;  %v705_v46 = vadd.f32 %v697_v13, %v683_v49  ;;  %v719_v59 = vrot.slane %v711_v32, 3  ;;  %v6643_v32 = vld [vmem:[#allocation121_spill] sm:$0xff] }
 0x27b   :  { %v740_v15 = vrot.slane %v732_v25, 4  ;;  %v741_v39 = vrot.slane %v733_v58, 4  ;;  %v762_v22 = vrot.slane %v754_v10, 5  ;;  %v776_v6 = vmul.f32 %v6640_v14, %v4675_v0  ;;  %v6644_v58 = vld [vmem:[#allocation122_spill] sm:$0xff] }
 0x27c   :  { %v763_v21 = vrot.slane %v755_v30, 5  ;;  %v726_v3 = vadd.f32 %v718_v41, %v704_v35  ;;  %v727_v51 = vadd.f32 %v719_v59, %v705_v46  ;;  %v777_v26 = vmul.f32 %v6640_v14, %v4677_v48  ;;  %v6645_v59 = vld [vmem:[#allocation123_spill] sm:$0xff] }
 0x27d   :  { %v798_v17 = vmul.f32 %v6641_v43, %v4675_v0  ;;  %v784_v24 = vrot.slane %v776_v6, 6  ;;  %v799_v38 = vmul.f32 %v6641_v43, %v4677_v48  ;;  %v820_v4 = vmul.f32 %v6642_v16, %v4675_v0 }
 0x27e   :  { %v821_v28 = vmul.f32 %v6642_v16, %v4677_v48  ;;  %v748_v31 = vadd.f32 %v740_v15, %v726_v3  ;;  %v749_v13 = vadd.f32 %v741_v39, %v727_v51  ;;  %v785_v37 = vrot.slane %v777_v26, 6 }
 0x27f   :  { %v806_v60 = vrot.slane %v798_v17, 7  ;;  %v807_v49 = vrot.slane %v799_v38, 7  ;;  %v826_v25 = vmul.f32 %v6643_v32, %v4675_v0  ;;  %v827_v41 = vmul.f32 %v6643_v32, %v4677_v48 }
 0x280   :  { %v848_v10 = vmul.f32 %v6644_v58, %v4675_v0  ;;  %v770_v30 = vadd.f32 %v762_v22, %v748_v31  ;;  %v771_v35 = vadd.f32 %v763_v21, %v749_v13  ;;  %v849_v46 = vmul.f32 %v6644_v58, %v4677_v48  ;;  %v6646_v21 = vld [vmem:[#allocation124_spill] sm:$0xff] }
 0x281   :  { %v870_v15 = vmul.f32 %v6645_v59, %v4675_v0  ;;  %v834_v39 = vrot.slane %v826_v25, 1  ;;  %v835_v6 = vrot.slane %v827_v41, 1  ;;  %v871_v51 = vmul.f32 %v6645_v59, %v4677_v48  ;;  %v6647_v41 = vld [vmem:[#allocation125_spill] sm:$0xff] }
 0x282   :  { %v856_v3 = vrot.slane %v848_v10, 2  ;;  %v792_v26 = vadd.f32 %v784_v24, %v770_v30  ;;  %v793_v17 = vadd.f32 %v785_v37, %v771_v35  ;;  %v857_v38 = vrot.slane %v849_v46, 2  ;;  %v6648_v46 = vld [vmem:[#allocation126_spill] sm:$0xff] }
 0x283   :  { %v878_v57 = vrot.slane %v870_v15, 3  ;;  %v842_v27 = vadd.f32 %v834_v39, %v820_v4  ;;  %v843_v18 = vadd.f32 %v835_v6, %v821_v28  ;;  %v879_v22 = vrot.slane %v871_v51, 3  ;;  %v6649_v51 = vld [vmem:[#allocation127_spill] sm:$0xff] }
 0x284   :  { %v892_v31 = vmul.f32 %v6646_v21, %v4675_v0  ;;  %v5055_v13 = vadd.f32 %v806_v60, %v792_v26  ;;  %v5057_v54 = vadd.f32 %v807_v49, %v793_v17  ;;  %v893_v25 = vmul.f32 %v6646_v21, %v4677_v48  ;;  %v6650_v17 = vld [vmem:[#allocation128_spill] sm:$0xff] }
 0x285   :  { %v914_v10 = vmul.f32 %v6647_v41, %v4675_v0  ;;  %v864_v24 = vadd.f32 %v856_v3, %v842_v27  ;;  %v865_v37 = vadd.f32 %v857_v38, %v843_v18  ;;  %v915_v4 = vmul.f32 %v6647_v41, %v4677_v48 }
 0x286   :  { %v900_v30 = vrot.slane %v892_v31, 4  ;;  %v901_v28 = vrot.slane %v893_v25, 4  ;;  %v936_v60 = vmul.f32 %v6648_v46, %v4675_v0  ;;  %v937_v49 = vmul.f32 %v6648_v46, %v4677_v48 }
 0x287   :  { %v922_v35 = vrot.slane %v914_v10, 5  ;;  %v886_v15 = vadd.f32 %v878_v57, %v864_v24  ;;  %v887_v39 = vadd.f32 %v879_v22, %v865_v37  ;;  %v923_v6 = vrot.slane %v915_v4, 5  ;;  %v6651_v22 = vld [vmem:[#allocation129_spill] sm:$0xff]  ;;  %v6652_v4 = vld [vmem:[#allocation130_spill] sm:$0xff] }
 0x288   :  { %v958_v26 = vmul.f32 %v6649_v51, %v4675_v0  ;;  %v944_v27 = vrot.slane %v936_v60, 6  ;;  %v945_v18 = vrot.slane %v937_v49, 6  ;;  %v959_v3 = vmul.f32 %v6649_v51, %v4677_v48 }
 0x289   :  { %v980_v38 = vmul.f32 %v6650_v17, %v4675_v0  ;;  %v908_v31 = vadd.f32 %v900_v30, %v886_v15  ;;  %v909_v25 = vadd.f32 %v901_v28, %v887_v39  ;;  %v981_v9 = vmul.f32 %v6650_v17, %v4677_v48  ;;  %v6653_v28 = vld [vmem:[#allocation131_spill] sm:$0xff] }
 0x28a   :  { %v966_v10 = vrot.slane %v958_v26, 7  ;;  %v967_v57 = vrot.slane %v959_v3, 7  ;;  %v986_v24 = vmul.f32 %v6651_v22, %v4675_v0  ;;  %v987_v37 = vmul.f32 %v6651_v22, %v4677_v48 }
 0x28b   :  { %v1008_v60 = vmul.f32 %v6652_v4, %v4675_v0  ;;  %v930_v49 = vadd.f32 %v922_v35, %v908_v31  ;;  %v931_v36 = vadd.f32 %v923_v6, %v909_v25  ;;  %v1009_v30 = vmul.f32 %v6652_v4, %v4677_v48  ;;  %v6654_v6 = vld [vmem:[#allocation132_spill] sm:$0xff] }
 0x28c   :  { %v1030_v15 = vmul.f32 %v6653_v28, %v4675_v0  ;;  %v994_v39 = vrot.slane %v986_v24, 1  ;;  %v995_v26 = vrot.slane %v987_v37, 1  ;;  %v1031_v19 = vmul.f32 %v6653_v28, %v4677_v48  ;;  %v6655_v37 = vld [vmem:[#allocation133_spill] sm:$0xff] }
 0x28d   :  { %v1016_v3 = vrot.slane %v1008_v60, 2  ;;  %v952_v5 = vadd.f32 %v944_v27, %v930_v49  ;;  %v953_v12 = vadd.f32 %v945_v18, %v931_v36  ;;  %v1017_v56 = vrot.slane %v1009_v30, 2  ;;  %v6656_v49 = vld [vmem:[#allocation134_spill] sm:$0xff] }
 0x28e   :  { %v1038_v55 = vrot.slane %v1030_v15, 3  ;;  %v1002_v63 = vadd.f32 %v994_v39, %v980_v38  ;;  %v1003_v11 = vadd.f32 %v995_v26, %v981_v9  ;;  %v1039_v35 = vrot.slane %v1031_v19, 3  ;;  %v6658_v26 = vld [vmem:[#allocation136_spill] sm:$0xff] }
 0x28f   :  { %v1052_v31 = vmul.f32 %v6654_v6, %v4675_v0  ;;  %v5091_v25 = vadd.f32 %v966_v10, %v952_v5  ;;  %v5093_v53 = vadd.f32 %v967_v57, %v953_v12  ;;  %v1053_v24 = vmul.f32 %v6654_v6, %v4677_v48 }
 0x290   :  { %v1074_v60 = vmul.f32 %v6655_v37, %v4675_v0  ;;  %v1024_v27 = vadd.f32 %v1016_v3, %v1002_v63  ;;  %v1025_v36 = vadd.f32 %v1017_v56, %v1003_v11  ;;  %v1075_v9 = vmul.f32 %v6655_v37, %v4677_v48  ;;  %v6657_v63 = vld [vmem:[#allocation135_spill] sm:$0xff] }
 0x291   :  { %v1060_v18 = vrot.slane %v1052_v31, 4  ;;  %v1061_v19 = vrot.slane %v1053_v24, 4  ;;  %v1096_v5 = vmul.f32 %v6656_v49, %v4675_v0  ;;  %v1097_v12 = vmul.f32 %v6656_v49, %v4677_v48 }
 0x292   :  { %v1082_v38 = vrot.slane %v1074_v60, 5  ;;  %v1046_v10 = vadd.f32 %v1038_v55, %v1024_v27  ;;  %v1047_v57 = vadd.f32 %v1039_v35, %v1025_v36  ;;  %v1083_v30 = vrot.slane %v1075_v9, 5  ;;  %v6659_v27 = vld [vmem:[#allocation137_spill] sm:$0xff] }
 0x293   :  { %v1118_v11 = vmul.f32 %v6657_v63, %v4675_v0  ;;  %v1104_v56 = vrot.slane %v1096_v5, 6  ;;  %v1105_v15 = vrot.slane %v1097_v12, 6  ;;  %v1119_v39 = vmul.f32 %v6657_v63, %v4677_v48  ;;  %v6660_v5 = vld [vmem:[#allocation140_spill] sm:$0xff] }
 0x294   :  { %v1140_v3 = vmul.f32 %v6658_v26, %v4675_v0  ;;  %v1068_v31 = vadd.f32 %v1060_v18, %v1046_v10  ;;  %v1069_v24 = vadd.f32 %v1061_v19, %v1047_v57  ;;  %v1141_v35 = vmul.f32 %v6658_v26, %v4677_v48  ;;  %v6661_v19 = vld [vmem:[#allocation141_spill] sm:$0xff] }
 0x295   :  { %v1126_v55 = vrot.slane %v1118_v11, 7  ;;  %v1127_v60 = vrot.slane %v1119_v39, 7  ;;  %v1146_v36 = vmul.f32 %v6659_v27, %v4675_v0  ;;  %v1147_v9 = vmul.f32 %v6659_v27, %v4677_v48 }
 0x296   :  { %v1168_v12 = vmul.f32 %v6660_v5, %v4675_v0  ;;  %v1090_v34 = vadd.f32 %v1082_v38, %v1068_v31  ;;  %v1091_v33 = vadd.f32 %v1083_v30, %v1069_v24  ;;  %v1169_v18 = vmul.f32 %v6660_v5, %v4677_v48 }
 0x297   :  { %v1190_v10 = vmul.f32 %v6661_v19, %v4675_v0  ;;  %v1154_v57 = vrot.slane %v1146_v36, 1  ;;  %v1155_v11 = vrot.slane %v1147_v9, 1  ;;  %v1191_v45 = vmul.f32 %v6661_v19, %v4677_v48 }
 0x298   :  { %v1176_v39 = vrot.slane %v1168_v12, 2  ;;  %v1112_v52 = vadd.f32 %v1104_v56, %v1090_v34  ;;  %v1113_v8 = vadd.f32 %v1105_v15, %v1091_v33  ;;  %v1177_v38 = vrot.slane %v1169_v18, 2 }
 0x299   :  { %v1198_v30 = vrot.slane %v1190_v10, 3  ;;  %v1162_v31 = vadd.f32 %v1154_v57, %v1140_v3  ;;  %v1163_v24 = vadd.f32 %v1155_v11, %v1141_v35  ;;  %v1199_v23 = vrot.slane %v1191_v45, 3 }
 0x29a   :  { %v5138_v20 = vstv %s5105_s18  ;;  %v5142_v36 = vadd.f32 %v1126_v55, %v1112_v52  ;;  %v5144_v9 = vadd.f32 %v1127_v60, %v1113_v8  ;;  %v5151_v3 = vstv %s5109_s19  ;;  %s5384_s18 = sld [smem:[#allocation2 + $0x57]] }
 0x29b   :  { %6662 = vst [vmem:[#allocation114_spill] sm:$0xff] %v5138_v20  ;;  %v1212_v34 = vmul.f32 %v5138_v20, %v4675_v0  ;;  %v1213_v33 = vmul.f32 %v5138_v20, %v4677_v48  ;;  %v1184_v56 = vadd.f32 %v1176_v39, %v1162_v31  ;;  %v1185_v15 = vadd.f32 %v1177_v38, %v1163_v24  ;;  %s5390_s19 = sld [smem:[#allocation2 + $0x67]] }
 0x29c   :  { %6663 = vst [vmem:[#allocation115_spill] sm:$0xff] %v5151_v3  ;;  %v5154_v45 = vstv %s5115_s24  ;;  %v1234_v8 = vmul.f32 %v5151_v3, %v4675_v0  ;;  %v1235_v35 = vmul.f32 %v5151_v3, %v4677_v48  ;;  %v5169_v39 = vstv %s5125_s27  ;;  %s5402_s24 = sld [smem:[#allocation2 + $0x77]] }
 0x29d   :  { %6664 = vst [vmem:[#allocation116_spill] sm:$0xff] %v5154_v45  ;;  %v1220_v52 = vrot.slane %v1212_v34, 4  ;;  %v1221_v55 = vrot.slane %v1213_v33, 4  ;;  %v1206_v60 = vadd.f32 %v1198_v30, %v1184_v56  ;;  %v1207_v12 = vadd.f32 %v1199_v23, %v1185_v15  ;;  %6665 = vst [vmem:[#allocation117_spill] sm:$0xff] %v5169_v39  ;;  %s5404_s27 = sld [smem:[#allocation2 + $0x87]] }
 0x29e   :  { %v1256_v18 = vmul.f32 %v5154_v45, %v4675_v0  ;;  %v1257_v10 = vmul.f32 %v5154_v45, %v4677_v48  ;;  %v1242_v57 = vrot.slane %v1234_v8, 5  ;;  %v1243_v11 = vrot.slane %v1235_v35, 5 }
 0x29f   :  { %v5172_v38 = vstv %s5131_s4  ;;  %v1228_v31 = vadd.f32 %v1220_v52, %v1206_v60  ;;  %v1229_v24 = vadd.f32 %v1221_v55, %v1207_v12  ;;  %v1278_v34 = vmul.f32 %v5169_v39, %v4675_v0  ;;  %s5428_s4 = sld [smem:[#allocation2 + $0x97]] }
 0x2a0   :  { %6666 = vst [vmem:[#allocation118_spill] sm:$0xff] %v5172_v38  ;;  %v1264_v30 = vrot.slane %v1256_v18, 6  ;;  %v1265_v23 = vrot.slane %v1257_v10, 6  ;;  %v1279_v33 = vmul.f32 %v5169_v39, %v4677_v48  ;;  %v1300_v56 = vmul.f32 %v5172_v38, %v4675_v0 }
 0x2a1   :  { %v1301_v15 = vmul.f32 %v5172_v38, %v4677_v48  ;;  %v1250_v8 = vadd.f32 %v1242_v57, %v1228_v31  ;;  %v1251_v52 = vadd.f32 %v1243_v11, %v1229_v24  ;;  %v5187_v55 = vstv %s5135_s8 }
 0x2a2   :  { %6667 = vst [vmem:[#allocation119_spill] sm:$0xff] %v5187_v55  ;;  %v5190_v35 = vstv %s5140_s15  ;;  %v1286_v60 = vrot.slane %v1278_v34, 7  ;;  %v1287_v12 = vrot.slane %v1279_v33, 7  ;;  %v1306_v18 = vmul.f32 %v5187_v55, %v4675_v0 }
 0x2a3   :  { %6668 = vst [vmem:[#allocation120_spill] sm:$0xff] %v5190_v35  ;;  %v1307_v10 = vmul.f32 %v5187_v55, %v4677_v48  ;;  %v1272_v2 = vadd.f32 %v1264_v30, %v1250_v8  ;;  %v1273_v40 = vadd.f32 %v1265_v23, %v1251_v52  ;;  %v1328_v57 = vmul.f32 %v5190_v35, %v4675_v0 }
 0x2a4   :  { %v1329_v11 = vmul.f32 %v5190_v35, %v4677_v48  ;;  %v1314_v31 = vrot.slane %v1306_v18, 1  ;;  %v5205_v34 = vstv %s5156_s16  ;;  %v5208_v33 = vstv %s5162_s10  ;;  %s6800_s16 = sld [smem:[#allocation152_spill]] }
 0x2a5   :  { %v1315_v24 = vrot.slane %v1307_v10, 1  ;;  %6669 = vst [vmem:[#allocation121_spill] sm:$0xff] %v5205_v34  ;;  %6670 = vst [vmem:[#allocation122_spill] sm:$0xff] %v5208_v33  ;;  %v5210_v61 = vadd.f32 %v1286_v60, %v1272_v2  ;;  %v5212_v30 = vadd.f32 %v1287_v12, %v1273_v40  ;;  %v1336_v23 = vrot.slane %v1328_v57, 2 }
 0x2a6   :  { %v1337_v8 = vrot.slane %v1329_v11, 2  ;;  %v1322_v52 = vadd.f32 %v1314_v31, %v1300_v56  ;;  %v1350_v18 = vmul.f32 %v5205_v34, %v4675_v0  ;;  %v1351_v10 = vmul.f32 %v5205_v34, %v4677_v48 }
 0x2a7   :  { %v1323_v44 = vadd.f32 %v1315_v24, %v1301_v15  ;;  %v1372_v2 = vmul.f32 %v5208_v33, %v4675_v0  ;;  %v1373_v40 = vmul.f32 %v5208_v33, %v4677_v48  ;;  %v5227_v60 = vstv %s5174_s26 }
 0x2a8   :  { %6671 = vst [vmem:[#allocation123_spill] sm:$0xff] %v5227_v60  ;;  %v5230_v12 = vstv %s5176_s28  ;;  %v1344_v56 = vadd.f32 %v1336_v23, %v1322_v52  ;;  %v1358_v57 = vrot.slane %v1350_v18, 3  ;;  %v1359_v11 = vrot.slane %v1351_v10, 3 }
 0x2a9   :  { %6672 = vst [vmem:[#allocation124_spill] sm:$0xff] %v5230_v12  ;;  %v1345_v15 = vadd.f32 %v1337_v8, %v1323_v44  ;;  %v1380_v31 = vrot.slane %v1372_v2, 4  ;;  %v1381_v24 = vrot.slane %v1373_v40, 4  ;;  %v1394_v50 = vmul.f32 %v5227_v60, %v4675_v0 }
 0x2aa   :  { %v1395_v33 = vmul.f32 %v5227_v60, %v4677_v48  ;;  %v1366_v34 = vadd.f32 %v1358_v57, %v1344_v56  ;;  %v1416_v44 = vmul.f32 %v5230_v12, %v4675_v0  ;;  %v1417_v23 = vmul.f32 %v5230_v12, %v4677_v48 }
 0x2ab   :  { %v1367_v35 = vadd.f32 %v1359_v11, %v1345_v15  ;;  %v1402_v8 = vrot.slane %v1394_v50, 5  ;;  %v5245_v18 = vstv %s5196_s1  ;;  %v5248_v10 = vstv %s5202_s14  ;;  %s6802_s14 = sld [smem:[#allocation153_spill]] }
 0x2ac   :  { %v1403_v52 = vrot.slane %v1395_v33, 5  ;;  %6673 = vst [vmem:[#allocation125_spill] sm:$0xff] %v5245_v18  ;;  %6674 = vst [vmem:[#allocation126_spill] sm:$0xff] %v5248_v10  ;;  %v1388_v2 = vadd.f32 %v1380_v31, %v1366_v34  ;;  %v1424_v56 = vrot.slane %v1416_v44, 6  ;;  %v1425_v15 = vrot.slane %v1417_v23, 6 }
 0x2ad   :  { %v1389_v40 = vadd.f32 %v1381_v24, %v1367_v35  ;;  %v1438_v57 = vmul.f32 %v5245_v18, %v4675_v0  ;;  %v1439_v50 = vmul.f32 %v5245_v18, %v4677_v48  ;;  %v1460_v33 = vmul.f32 %v5248_v10, %v4675_v0 }
 0x2ae   :  { %v1461_v11 = vmul.f32 %v5248_v10, %v4677_v48  ;;  %v1410_v12 = vadd.f32 %v1402_v8, %v1388_v2  ;;  %v5263_v35 = vstv %s5214_s30  ;;  %v5266_v31 = vstv %s5220_s25 }
 0x2af   :  { %v1411_v34 = vadd.f32 %v1403_v52, %v1389_v40  ;;  %6675 = vst [vmem:[#allocation127_spill] sm:$0xff] %v5263_v35  ;;  %6676 = vst [vmem:[#allocation128_spill] sm:$0xff] %v5266_v31  ;;  %v1446_v24 = vrot.slane %v1438_v57, 7  ;;  %v1447_v44 = vrot.slane %v1439_v50, 7  ;;  %v1466_v23 = vmul.f32 %v5263_v35, %v4675_v0 }
 0x2b0   :  { %v1467_v18 = vmul.f32 %v5263_v35, %v4677_v48  ;;  %v1432_v60 = vadd.f32 %v1424_v56, %v1410_v12  ;;  %v1488_v8 = vmul.f32 %v5266_v31, %v4675_v0  ;;  %v1489_v52 = vmul.f32 %v5266_v31, %v4677_v48 }
 0x2b1   :  { %v1433_v10 = vadd.f32 %v1425_v15, %v1411_v34  ;;  %v1474_v2 = vrot.slane %v1466_v23, 1  ;;  %v5281_v57 = vstv %s5232_s5  ;;  %v5284_v50 = vstv %s5238_s0 }
 0x2b2   :  { %v1475_v40 = vrot.slane %v1467_v18, 1  ;;  %6677 = vst [vmem:[#allocation129_spill] sm:$0xff] %v5281_v57  ;;  %6678 = vst [vmem:[#allocation130_spill] sm:$0xff] %v5284_v50  ;;  %v5286_v35 = vadd.f32 %v1446_v24, %v1432_v60  ;;  %v1496_v56 = vrot.slane %v1488_v8, 2  ;;  %v1497_v15 = vrot.slane %v1489_v52, 2 }
 0x2b3   :  { %v5288_v12 = vadd.f32 %v1447_v44, %v1433_v10  ;;  %v1482_v34 = vadd.f32 %v1474_v2, %v1460_v33  ;;  %v1510_v23 = vmul.f32 %v5281_v57, %v4675_v0  ;;  %v1511_v18 = vmul.f32 %v5281_v57, %v4677_v48 }
 0x2b4   :  { %v1483_v31 = vadd.f32 %v1475_v40, %v1461_v11  ;;  %v1532_v60 = vmul.f32 %v5284_v50, %v4675_v0  ;;  %v1533_v10 = vmul.f32 %v5284_v50, %v4677_v48  ;;  %v5303_v24 = vstv %s5250_s23 }
 0x2b5   :  { %6679 = vst [vmem:[#allocation131_spill] sm:$0xff] %v5303_v24  ;;  %v5306_v44 = vstv %s5252_s17  ;;  %v1504_v33 = vadd.f32 %v1496_v56, %v1482_v34  ;;  %v1518_v8 = vrot.slane %v1510_v23, 3  ;;  %v1519_v52 = vrot.slane %v1511_v18, 3 }
 0x2b6   :  { %6680 = vst [vmem:[#allocation132_spill] sm:$0xff] %v5306_v44  ;;  %v1505_v11 = vadd.f32 %v1497_v15, %v1483_v31  ;;  %v1540_v2 = vrot.slane %v1532_v60, 4  ;;  %v1541_v40 = vrot.slane %v1533_v10, 4  ;;  %v1554_v57 = vmul.f32 %v5303_v24, %v4675_v0 }
 0x2b7   :  { %v1555_v50 = vmul.f32 %v5303_v24, %v4677_v48  ;;  %v1526_v55 = vadd.f32 %v1518_v8, %v1504_v33  ;;  %v1576_v31 = vmul.f32 %v5306_v44, %v4675_v0  ;;  %v1577_v56 = vmul.f32 %v5306_v44, %v4677_v48 }
 0x2b8   :  { %v1527_v38 = vadd.f32 %v1519_v52, %v1505_v11  ;;  %v1562_v15 = vrot.slane %v1554_v57, 5  ;;  %v5321_v23 = vstv %s5272_s7  ;;  %v5324_v18 = vstv %s5278_s29 }
 0x2b9   :  { %v1563_v34 = vrot.slane %v1555_v50, 5  ;;  %6681 = vst [vmem:[#allocation133_spill] sm:$0xff] %v5321_v23  ;;  %6682 = vst [vmem:[#allocation134_spill] sm:$0xff] %v5324_v18  ;;  %v1548_v60 = vadd.f32 %v1540_v2, %v1526_v55  ;;  %v1584_v33 = vrot.slane %v1576_v31, 6  ;;  %v1585_v11 = vrot.slane %v1577_v56, 6 }
 0x2ba   :  { %v1549_v10 = vadd.f32 %v1541_v40, %v1527_v38  ;;  %v1598_v8 = vmul.f32 %v5321_v23, %v4675_v0  ;;  %v1599_v57 = vmul.f32 %v5321_v23, %v4677_v48  ;;  %v1620_v50 = vmul.f32 %v5324_v18, %v4675_v0 }
 0x2bb   :  { %v1621_v52 = vmul.f32 %v5324_v18, %v4677_v48  ;;  %v1570_v44 = vadd.f32 %v1562_v15, %v1548_v60  ;;  %v5339_v38 = vstv %s5290_s9  ;;  %v5342_v2 = vstv %s5296_s11 }
 0x2bc   :  { %v1571_v55 = vadd.f32 %v1563_v34, %v1549_v10  ;;  %6683 = vst [vmem:[#allocation135_spill] sm:$0xff] %v5339_v38  ;;  %6684 = vst [vmem:[#allocation136_spill] sm:$0xff] %v5342_v2  ;;  %v1606_v40 = vrot.slane %v1598_v8, 7  ;;  %v1607_v31 = vrot.slane %v1599_v57, 7  ;;  %v1626_v56 = vmul.f32 %v5339_v38, %v4675_v0 }
 0x2bd   :  { %v1627_v23 = vmul.f32 %v5339_v38, %v4677_v48  ;;  %v1592_v24 = vadd.f32 %v1584_v33, %v1570_v44  ;;  %v1648_v15 = vmul.f32 %v5342_v2, %v4675_v0  ;;  %v1649_v34 = vmul.f32 %v5342_v2, %v4677_v48 }
 0x2be   :  { %v1593_v18 = vadd.f32 %v1585_v11, %v1571_v55  ;;  %v1634_v60 = vrot.slane %v1626_v56, 1  ;;  %v5357_v8 = vstv %s5308_s12  ;;  %v5360_v57 = vstv %s5314_s6 }
 0x2bf   :  { %v1635_v10 = vrot.slane %v1627_v23, 1  ;;  %6685 = vst [vmem:[#allocation137_spill] sm:$0xff] %v5357_v8  ;;  %6686 = vst [vmem:[#allocation142_spill] sm:$0xff] %v5360_v57  ;;  %v5362_v38 = vadd.f32 %v1606_v40, %v1592_v24  ;;  %v1656_v33 = vrot.slane %v1648_v15, 2  ;;  %v1657_v11 = vrot.slane %v1649_v34, 2 }
 0x2c0   :  { %v5364_v44 = vadd.f32 %v1607_v31, %v1593_v18  ;;  %v1642_v55 = vadd.f32 %v1634_v60, %v1620_v50  ;;  %v1670_v56 = vmul.f32 %v5357_v8, %v4675_v0  ;;  %v1671_v23 = vmul.f32 %v5357_v8, %v4677_v48 }
 0x2c1   :  { %v1643_v2 = vadd.f32 %v1635_v10, %v1621_v52  ;;  %v1692_v24 = vmul.f32 %v5360_v57, %v4675_v0  ;;  %v1693_v18 = vmul.f32 %v5360_v57, %v4677_v48  ;;  %v5379_v40 = vstv %s5326_s13 }
 0x2c2   :  { %6687 = vst [vmem:[#allocation143_spill] sm:$0xff] %v5379_v40  ;;  %v5382_v31 = vstv %s5328_s20  ;;  %v1664_v50 = vadd.f32 %v1656_v33, %v1642_v55  ;;  %v1678_v15 = vrot.slane %v1670_v56, 3  ;;  %v1679_v34 = vrot.slane %v1671_v23, 3 }
 0x2c3   :  { %6688 = vst [vmem:[#allocation144_spill] sm:$0xff] %v5382_v31  ;;  %v1665_v52 = vadd.f32 %v1657_v11, %v1643_v2  ;;  %v1700_v60 = vrot.slane %v1692_v24, 4  ;;  %v1701_v10 = vrot.slane %v1693_v18, 4  ;;  %v1714_v8 = vmul.f32 %v5379_v40, %v4675_v0 }
 0x2c4   :  { %v1715_v57 = vmul.f32 %v5379_v40, %v4677_v48  ;;  %v1686_v39 = vadd.f32 %v1678_v15, %v1664_v50  ;;  %v1736_v2 = vmul.f32 %v5382_v31, %v4675_v0  ;;  %v1737_v33 = vmul.f32 %v5382_v31, %v4677_v48 }
 0x2c5   :  { %v1687_v45 = vadd.f32 %v1679_v34, %v1665_v52  ;;  %v1722_v11 = vrot.slane %v1714_v8, 5  ;;  %v5397_v56 = vstv %s5348_s21  ;;  %v5400_v23 = vstv %s5354_s22 }
 0x2c6   :  { %v1723_v55 = vrot.slane %v1715_v57, 5  ;;  %6689 = vst [vmem:[#allocation145_spill] sm:$0xff] %v5397_v56  ;;  %6690 = vst [vmem:[#allocation146_spill] sm:$0xff] %v5400_v23  ;;  %v1708_v24 = vadd.f32 %v1700_v60, %v1686_v39  ;;  %v1744_v50 = vrot.slane %v1736_v2, 6  ;;  %v1745_v52 = vrot.slane %v1737_v33, 6 }
 0x2c7   :  { %v1709_v18 = vadd.f32 %v1701_v10, %v1687_v45  ;;  %v1758_v15 = vmul.f32 %v5397_v56, %v4675_v0  ;;  %v1759_v8 = vmul.f32 %v5397_v56, %v4677_v48  ;;  %v1780_v57 = vmul.f32 %v5400_v23, %v4675_v0 }
 0x2c8   :  { %v1781_v34 = vmul.f32 %v5400_v23, %v4677_v48  ;;  %v1730_v31 = vadd.f32 %v1722_v11, %v1708_v24  ;;  %v5415_v39 = vstv %s5366_s2  ;;  %v5418_v60 = vstv %s5372_s3 }
 0x2c9   :  { %v1731_v45 = vadd.f32 %v1723_v55, %v1709_v18  ;;  %6691 = vst [vmem:[#allocation147_spill] sm:$0xff] %v5415_v39  ;;  %6692 = vst [vmem:[#allocation148_spill] sm:$0xff] %v5418_v60  ;;  %v1766_v10 = vrot.slane %v1758_v15, 7  ;;  %v1767_v2 = vrot.slane %v1759_v8, 7  ;;  %v1786_v33 = vmul.f32 %v5415_v39, %v4675_v0 }
 0x2ca   :  { %v1787_v56 = vmul.f32 %v5415_v39, %v4677_v48  ;;  %v1752_v40 = vadd.f32 %v1744_v50, %v1730_v31  ;;  %v1808_v23 = vmul.f32 %v5418_v60, %v4675_v0  ;;  %v1809_v11 = vmul.f32 %v5418_v60, %v4677_v48 }
 0x2cb   :  { %v1753_v3 = vadd.f32 %v1745_v52, %v1731_v45  ;;  %v1794_v55 = vrot.slane %v1786_v33, 1  ;;  %v5431_v18 = vstv %s5384_s18  ;;  %v5434_v15 = vstv %s5390_s19 }
 0x2cc   :  { %v1795_v24 = vrot.slane %v1787_v56, 1  ;;  %6693 = vst [vmem:[#allocation149_spill] sm:$0xff] %v5431_v18  ;;  %6694 = vst [vmem:[#allocation150_spill] sm:$0xff] %v5434_v15  ;;  %v5436_v8 = vadd.f32 %v1766_v10, %v1752_v40  ;;  %v1816_v50 = vrot.slane %v1808_v23, 2  ;;  %v1817_v52 = vrot.slane %v1809_v11, 2 }
 0x2cd   :  { %v5438_v31 = vadd.f32 %v1767_v2, %v1753_v3  ;;  %v1802_v45 = vadd.f32 %v1794_v55, %v1780_v57  ;;  %v1830_v60 = vmul.f32 %v5431_v18, %v4675_v0  ;;  %v1831_v20 = vmul.f32 %v5431_v18, %v4677_v48 }
 0x2ce   :  { %v1803_v39 = vadd.f32 %v1795_v24, %v1781_v34  ;;  %v1852_v56 = vmul.f32 %v5434_v15, %v4675_v0  ;;  %v1853_v33 = vmul.f32 %v5434_v15, %v4677_v48  ;;  %v5449_v40 = vstv %s5402_s24 }
 0x2cf   :  { %v5452_v3 = vstv %s5404_s27  ;;  %v1824_v23 = vadd.f32 %v1816_v50, %v1802_v45  ;;  %v1838_v34 = vrot.slane %v1830_v60, 3  ;;  %v1839_v10 = vrot.slane %v1831_v20, 3 }
 0x2d0   :  { %6695 = vst [vmem:[#allocation151_spill] sm:$0xff] %v5452_v3  ;;  %v1825_v57 = vadd.f32 %v1817_v52, %v1803_v39  ;;  %v1860_v2 = vrot.slane %v1852_v56, 4  ;;  %v1861_v11 = vrot.slane %v1853_v33, 4  ;;  %v1874_v55 = vmul.f32 %v5449_v40, %v4675_v0 }
 0x2d1   :  { %v1875_v24 = vmul.f32 %v5449_v40, %v4677_v48  ;;  %v1846_v18 = vadd.f32 %v1838_v34, %v1824_v23  ;;  %v1896_v15 = vmul.f32 %v5452_v3, %v4675_v0  ;;  %v1897_v5 = vmul.f32 %v5452_v3, %v4677_v48 }
 0x2d2   :  { %v1847_v19 = vadd.f32 %v1839_v10, %v1825_v57  ;;  %v1882_v50 = vrot.slane %v1874_v55, 5  ;;  %v5463_v60 = vstv %s5428_s4  ;;  %v3222_v20 = vrot.slane %v5091_v25, 7 }
 0x2d3   :  { %v1883_v39 = vrot.slane %v1875_v24, 5  ;;  %v1868_v52 = vadd.f32 %v1860_v2, %v1846_v18  ;;  %v1904_v56 = vrot.slane %v1896_v15, 6  ;;  %v1905_v33 = vrot.slane %v1897_v5, 6 }
 0x2d4   :  { %v1869_v45 = vadd.f32 %v1861_v11, %v1847_v19  ;;  %v1918_v23 = vmul.f32 %v5463_v60, %v4675_v0  ;;  %v1919_v57 = vmul.f32 %v5463_v60, %v4677_v48  ;;  %v3223_v34 = vrot.slane %v5093_v53, 7 }
 0x2d5   :  { %v3234_v10 = vrot.slane %v5142_v36, 6  ;;  %v1890_v55 = vadd.f32 %v1882_v50, %v1868_v52  ;;  %v3235_v3 = vrot.slane %v5144_v9, 6  ;;  %v3246_v25 = vrot.slane %v5210_v61, 5  ;;  %v6696_v52 = vld [vmem:[#allocation138_spill] sm:$0xff] }
 0x2d6   :  { %v1891_v24 = vadd.f32 %v1883_v39, %v1869_v45  ;;  %v1926_v18 = vrot.slane %v1918_v23, 7  ;;  %v1927_v19 = vrot.slane %v1919_v57, 7  ;;  %v3247_v5 = vrot.slane %v5212_v30, 5 }
 0x2d7   :  { %v3258_v15 = vrot.slane %v5286_v35, 4  ;;  %v1912_v0 = vadd.f32 %v1904_v56, %v1890_v55  ;;  %v3259_v48 = vrot.slane %v5288_v12, 4  ;;  %v3270_v53 = vrot.slane %v5362_v38, 3 }
 0x2d8   :  { %v1913_v2 = vadd.f32 %v1905_v33, %v1891_v24  ;;  %v3271_v36 = vrot.slane %v5364_v44, 3  ;;  %v3282_v11 = vrot.slane %v5436_v8, 2  ;;  %v3283_v9 = vrot.slane %v5438_v31, 2  ;;  %v6697_v8 = vld [vmem:[#allocation139_spill] sm:$0xff] }
 0x2d9   :  { %v3386_v61 = vsel %vm573_vm0, %v5055_v13, %v3222_v20  ;;  %v1934_v50 = vadd.f32 %v1926_v18, %v1912_v0  ;;  %v3387_v30 = vsel %vm573_vm0, %v5057_v54, %v3223_v34  ;;  %v662_v44 = vmul.f32 %v6632_v29, %v6696_v52 }
 0x2da   :  { %v1935_v39 = vadd.f32 %v1927_v19, %v1913_v2  ;;  %v3390_v35 = vsel %vm578_vm1, %v3386_v61, %v3234_v10  ;;  %v3391_v12 = vsel %vm578_vm1, %v3387_v30, %v3235_v3  ;;  %v663_v31 = vmul.f32 %v6632_v29, %v6697_v8 }
 0x2db   :  { %v3394_v38 = vsel %vm583_vm2, %v3390_v35, %v3246_v25  ;;  %v3294_v45 = vrot.slane %v1934_v50, 1  ;;  %v3395_v13 = vsel %vm583_vm2, %v3391_v12, %v3247_v5  ;;  %v668_v3 = vmul.f32 %v6633_v42, %v6696_v52 }
 0x2dc   :  { %v3295_v56 = vrot.slane %v1935_v39, 1  ;;  %v3398_v20 = vsel %vm588_vm3, %v3394_v38, %v3258_v15  ;;  %v3399_v54 = vsel %vm588_vm3, %v3395_v13, %v3259_v48  ;;  %v669_v23 = vmul.f32 %v6633_v42, %v6697_v8 }
 0x2dd   :  { %v3402_v33 = vsel %vm593_vm4, %v3398_v20, %v3270_v53  ;;  %v3403_v57 = vsel %vm593_vm4, %v3399_v54, %v3271_v36  ;;  %v690_v34 = vmul.f32 %v6634_v62, %v6696_v52  ;;  %v691_v10 = vmul.f32 %v6634_v62, %v6697_v8 }
 0x2de   :  { %v3406_v29 = vsel %vm598_vm5, %v3402_v33, %v3282_v11  ;;  %v3407_v55 = vsel %vm598_vm5, %v3403_v57, %v3283_v9  ;;  %v676_v25 = vrot.slane %v668_v3, 1  ;;  %v677_v18 = vrot.slane %v669_v23, 1 }
 0x2df   :  { %v5508_v24 = vsel %vm603_vm6, %v3406_v29, %v3294_v45  ;;  %v5511_v19 = vsel %vm603_vm6, %v3407_v55, %v3295_v56  ;;  %v698_v42 = vrot.slane %v690_v34, 2  ;;  %v699_v5 = vrot.slane %v691_v10, 2 }
 0x2e0   :  { %v712_v15 = vmul.f32 %v6637_v7, %v6696_v52  ;;  %v3444_v0 = vadd.f32 %v5511_v19, %v5508_v24  ;;  %v684_v2 = vadd.f32 %v676_v25, %v662_v44  ;;  %v685_v62 = vadd.f32 %v677_v18, %v663_v31 }
 0x2e1   :  { %v713_v48 = vmul.f32 %v6637_v7, %v6697_v8  ;;  %v734_v36 = vmul.f32 %v6638_v47, %v6696_v52  ;;  %v735_v11 = vmul.f32 %v6638_v47, %v6697_v8  ;;  %v756_v9 = vmul.f32 %v6639_v1, %v6696_v52 }
 0x2e2   :  { %v720_v53 = vrot.slane %v712_v15, 3  ;;  %3445 = vadd.xlane.f32.xlu1 %v3444_v0  ;;  %v706_v61 = vadd.f32 %v698_v42, %v684_v2  ;;  %v707_v50 = vadd.f32 %v699_v5, %v685_v62  ;;  %v757_v30 = vmul.f32 %v6639_v1, %v6697_v8 }
 0x2e3   :  { %v721_v39 = vrot.slane %v713_v48, 3  ;;  %v742_v35 = vrot.slane %v734_v36, 4  ;;  %v743_v12 = vrot.slane %v735_v11, 4  ;;  %v764_v7 = vrot.slane %v756_v9, 5 }
 0x2e4   :  { %v778_v38 = vmul.f32 %v6640_v14, %v6696_v52  ;;  %v728_v44 = vadd.f32 %v720_v53, %v706_v61  ;;  %v765_v45 = vrot.slane %v757_v30, 5  ;;  %v779_v47 = vmul.f32 %v6640_v14, %v6697_v8 }
 0x2e5   :  { %v729_v31 = vadd.f32 %v721_v39, %v707_v50  ;;  %v800_v13 = vmul.f32 %v6641_v43, %v6696_v52  ;;  %v801_v20 = vmul.f32 %v6641_v43, %v6697_v8  ;;  %v822_v1 = vmul.f32 %v6642_v16, %v6696_v52 }
 0x2e6   :  { %v786_v56 = vrot.slane %v778_v38, 6  ;;  %v750_v54 = vadd.f32 %v742_v35, %v728_v44  ;;  %v787_v3 = vrot.slane %v779_v47, 6  ;;  %v823_v23 = vmul.f32 %v6642_v16, %v6697_v8 }
 0x2e7   :  { %v751_v33 = vadd.f32 %v743_v12, %v729_v31  ;;  %v808_v57 = vrot.slane %v800_v13, 7  ;;  %v809_v29 = vrot.slane %v801_v20, 7  ;;  %v828_v14 = vmul.f32 %v6643_v32, %v6696_v52 }
 0x2e8   :  { %v829_v34 = vmul.f32 %v6643_v32, %v6697_v8  ;;  %v772_v10 = vadd.f32 %v764_v7, %v750_v54  ;;  %v850_v43 = vmul.f32 %v6644_v58, %v6696_v52  ;;  %v851_v25 = vmul.f32 %v6644_v58, %v6697_v8 }
 0x2e9   :  { %v773_v55 = vadd.f32 %v765_v45, %v751_v33  ;;  %v836_v18 = vrot.slane %v828_v14, 1  ;;  %v872_v16 = vmul.f32 %v6645_v59, %v6696_v52  ;;  %v873_v5 = vmul.f32 %v6645_v59, %v6697_v8 }
 0x2ea   :  { %v837_v42 = vrot.slane %v829_v34, 1  ;;  %v794_v15 = vadd.f32 %v786_v56, %v772_v10  ;;  %v858_v2 = vrot.slane %v850_v43, 2  ;;  %v859_v32 = vrot.slane %v851_v25, 2 }
 0x2eb   :  { %v795_v0 = vadd.f32 %v787_v3, %v773_v55  ;;  %v844_v62 = vadd.f32 %v836_v18, %v822_v1  ;;  %v880_v53 = vrot.slane %v872_v16, 3  ;;  %v881_v36 = vrot.slane %v873_v5, 3 }
 0x2ec   :  { %v845_v48 = vadd.f32 %v837_v42, %v823_v23  ;;  %v5551_v11 = vadd.f32 %v808_v57, %v794_v15  ;;  %v894_v58 = vmul.f32 %v6646_v21, %v6696_v52  ;;  %v895_v61 = vmul.f32 %v6646_v21, %v6697_v8 }
 0x2ed   :  { %v5553_v9 = vadd.f32 %v809_v29, %v795_v0  ;;  %v866_v50 = vadd.f32 %v858_v2, %v844_v62  ;;  %v916_v39 = vmul.f32 %v6647_v41, %v6696_v52  ;;  %v917_v30 = vmul.f32 %v6647_v41, %v6697_v8 }
 0x2ee   :  { %v867_v59 = vadd.f32 %v859_v32, %v845_v48  ;;  %v902_v35 = vrot.slane %v894_v58, 4  ;;  %v903_v12 = vrot.slane %v895_v61, 4  ;;  %v938_v7 = vmul.f32 %v6648_v46, %v6696_v52 }
 0x2ef   :  { %v939_v38 = vmul.f32 %v6648_v46, %v6697_v8  ;;  %v888_v44 = vadd.f32 %v880_v53, %v866_v50  ;;  %v924_v45 = vrot.slane %v916_v39, 5  ;;  %v925_v21 = vrot.slane %v917_v30, 5 }
 0x2f0   :  { %v889_v31 = vadd.f32 %v881_v36, %v867_v59  ;;  %v946_v47 = vrot.slane %v938_v7, 6  ;;  %v960_v13 = vmul.f32 %v6649_v51, %v6696_v52  ;;  %v961_v41 = vmul.f32 %v6649_v51, %v6697_v8 }
 0x2f1   :  { %v947_v56 = vrot.slane %v939_v38, 6  ;;  %v910_v20 = vadd.f32 %v902_v35, %v888_v44  ;;  %v982_v54 = vmul.f32 %v6650_v17, %v6696_v52  ;;  %v983_v46 = vmul.f32 %v6650_v17, %v6697_v8 }
 0x2f2   :  { %v911_v1 = vadd.f32 %v903_v12, %v889_v31  ;;  %v968_v33 = vrot.slane %v960_v13, 7  ;;  %v969_v3 = vrot.slane %v961_v41, 7  ;;  %v988_v23 = vmul.f32 %v6651_v22, %v6696_v52 }
 0x2f3   :  { %v989_v57 = vmul.f32 %v6651_v22, %v6697_v8  ;;  %v932_v29 = vadd.f32 %v924_v45, %v910_v20  ;;  %v1010_v51 = vmul.f32 %v6652_v4, %v6696_v52  ;;  %v1011_v34 = vmul.f32 %v6652_v4, %v6697_v8 }
 0x2f4   :  { %v933_v14 = vadd.f32 %v925_v21, %v911_v1  ;;  %v996_v10 = vrot.slane %v988_v23, 1  ;;  %v1032_v17 = vmul.f32 %v6653_v28, %v6696_v52  ;;  %v1033_v43 = vmul.f32 %v6653_v28, %v6697_v8 }
 0x2f5   :  { %v997_v55 = vrot.slane %v989_v57, 1  ;;  %v954_v25 = vadd.f32 %v946_v47, %v932_v29  ;;  %v1018_v42 = vrot.slane %v1010_v51, 2  ;;  %v1019_v22 = vrot.slane %v1011_v34, 2 }
 0x2f6   :  { %v955_v18 = vadd.f32 %v947_v56, %v933_v14  ;;  %v1004_v16 = vadd.f32 %v996_v10, %v982_v54  ;;  %v1040_v15 = vrot.slane %v1032_v17, 3  ;;  %v1041_v0 = vrot.slane %v1033_v43, 3 }
 0x2f7   :  { %v1005_v5 = vadd.f32 %v997_v55, %v983_v46  ;;  %v5587_v2 = vadd.f32 %v968_v33, %v954_v25  ;;  %v1054_v4 = vmul.f32 %v6654_v6, %v6696_v52  ;;  %v1055_v62 = vmul.f32 %v6654_v6, %v6697_v8  ;;  %v6700_v25 = vld [vmem:[#allocation114_spill] sm:$0xff] }
 0x2f8   :  { %v5589_v32 = vadd.f32 %v969_v3, %v955_v18  ;;  %v1026_v48 = vadd.f32 %v1018_v42, %v1004_v16  ;;  %v1076_v53 = vmul.f32 %v6655_v37, %v6696_v52  ;;  %v1077_v36 = vmul.f32 %v6655_v37, %v6697_v8 }
 0x2f9   :  { %v1027_v28 = vadd.f32 %v1019_v22, %v1005_v5  ;;  %v1062_v58 = vrot.slane %v1054_v4, 4  ;;  %v1063_v61 = vrot.slane %v1055_v62, 4  ;;  %v1098_v50 = vmul.f32 %v6656_v49, %v6696_v52  ;;  %v6701_v5 = vld [vmem:[#allocation115_spill] sm:$0xff] }
 0x2fa   :  { %v1099_v59 = vmul.f32 %v6656_v49, %v6697_v8  ;;  %v1048_v39 = vadd.f32 %v1040_v15, %v1026_v48  ;;  %v1084_v35 = vrot.slane %v1076_v53, 5  ;;  %v1085_v6 = vrot.slane %v1077_v36, 5  ;;  %v6702_v48 = vld [vmem:[#allocation116_spill] sm:$0xff] }
 0x2fb   :  { %v1049_v30 = vadd.f32 %v1041_v0, %v1027_v28  ;;  %v1106_v12 = vrot.slane %v1098_v50, 6  ;;  %v1120_v38 = vmul.f32 %v6657_v63, %v6696_v52  ;;  %v1121_v37 = vmul.f32 %v6657_v63, %v6697_v8  ;;  %v6698_v63 = vld [vmem:[#allocation140_spill] sm:$0xff] }
 0x2fc   :  { %v1107_v7 = vrot.slane %v1099_v59, 6  ;;  %v1070_v44 = vadd.f32 %v1062_v58, %v1048_v39  ;;  %v1142_v45 = vmul.f32 %v6658_v26, %v6696_v52  ;;  %v1143_v49 = vmul.f32 %v6658_v26, %v6697_v8  ;;  %v6699_v26 = vld [vmem:[#allocation141_spill] sm:$0xff] }
 0x2fd   :  { %v1071_v31 = vadd.f32 %v1063_v61, %v1049_v30  ;;  %v1128_v21 = vrot.slane %v1120_v38, 7  ;;  %v1129_v47 = vrot.slane %v1121_v37, 7  ;;  %v1148_v56 = vmul.f32 %v6659_v27, %v6696_v52  ;;  %v6703_v30 = vld [vmem:[#allocation117_spill] sm:$0xff]  ;;  %v6704_v38 = vld [vmem:[#allocation118_spill] sm:$0xff] }
 0x2fe   :  { %v1149_v13 = vmul.f32 %v6659_v27, %v6697_v8  ;;  %v1092_v41 = vadd.f32 %v1084_v35, %v1070_v44  ;;  %v1170_v1 = vmul.f32 %v6698_v63, %v6696_v52  ;;  %v1171_v54 = vmul.f32 %v6698_v63, %v6697_v8 }
 0x2ff   :  { %v1093_v20 = vadd.f32 %v1085_v6, %v1071_v31  ;;  %v1156_v46 = vrot.slane %v1148_v56, 1  ;;  %v1192_v3 = vmul.f32 %v6699_v26, %v6696_v52  ;;  %v1193_v23 = vmul.f32 %v6699_v26, %v6697_v8 }
 0x300   :  { %v1157_v33 = vrot.slane %v1149_v13, 1  ;;  %v1114_v57 = vadd.f32 %v1106_v12, %v1092_v41  ;;  %v1178_v14 = vrot.slane %v1170_v1, 2  ;;  %v1179_v27 = vrot.slane %v1171_v54, 2  ;;  %v6706_v41 = vld [vmem:[#allocation120_spill] sm:$0xff] }
 0x301   :  { %v1115_v29 = vadd.f32 %v1107_v7, %v1093_v20  ;;  %v1164_v51 = vadd.f32 %v1156_v46, %v1142_v45  ;;  %v1200_v10 = vrot.slane %v1192_v3, 3  ;;  %v1201_v55 = vrot.slane %v1193_v23, 3  ;;  %v6707_v46 = vld [vmem:[#allocation121_spill] sm:$0xff] }
 0x302   :  { %v1165_v34 = vadd.f32 %v1157_v33, %v1143_v49  ;;  %v5623_v17 = vadd.f32 %v1128_v21, %v1114_v57  ;;  %v1214_v18 = vmul.f32 %v6700_v25, %v6696_v52  ;;  %v1215_v42 = vmul.f32 %v6700_v25, %v6697_v8  ;;  %v6705_v49 = vld [vmem:[#allocation119_spill] sm:$0xff]  ;;  %v6708_v25 = vld [vmem:[#allocation122_spill] sm:$0xff] }
 0x303   :  { %v5625_v43 = vadd.f32 %v1129_v47, %v1115_v29  ;;  %v1186_v22 = vadd.f32 %v1178_v14, %v1164_v51  ;;  %v1236_v15 = vmul.f32 %v6701_v5, %v6696_v52  ;;  %v1237_v0 = vmul.f32 %v6701_v5, %v6697_v8  ;;  %v6709_v5 = vld [vmem:[#allocation123_spill] sm:$0xff] }
 0x304   :  { %v1187_v16 = vadd.f32 %v1179_v27, %v1165_v34  ;;  %v1222_v4 = vrot.slane %v1214_v18, 4  ;;  %v1223_v62 = vrot.slane %v1215_v42, 4  ;;  %v1258_v28 = vmul.f32 %v6702_v48, %v6696_v52 }
 0x305   :  { %v1259_v53 = vmul.f32 %v6702_v48, %v6697_v8  ;;  %v1208_v36 = vadd.f32 %v1200_v10, %v1186_v22  ;;  %v1244_v61 = vrot.slane %v1236_v15, 5  ;;  %v1245_v50 = vrot.slane %v1237_v0, 5  ;;  %v6710_v48 = vld [vmem:[#allocation124_spill] sm:$0xff] }
 0x306   :  { %v1209_v58 = vadd.f32 %v1201_v55, %v1187_v16  ;;  %v1266_v59 = vrot.slane %v1258_v28, 6  ;;  %v1280_v35 = vmul.f32 %v6703_v30, %v6696_v52  ;;  %v1281_v6 = vmul.f32 %v6703_v30, %v6697_v8  ;;  %v6711_v30 = vld [vmem:[#allocation125_spill] sm:$0xff] }
 0x307   :  { %v1267_v39 = vrot.slane %v1259_v53, 6  ;;  %v1230_v12 = vadd.f32 %v1222_v4, %v1208_v36  ;;  %v1302_v37 = vmul.f32 %v6704_v38, %v6696_v52  ;;  %v1303_v44 = vmul.f32 %v6704_v38, %v6697_v8  ;;  %v6712_v38 = vld [vmem:[#allocation126_spill] sm:$0xff] }
 0x308   :  { %v1231_v7 = vadd.f32 %v1223_v62, %v1209_v58  ;;  %v1288_v31 = vrot.slane %v1280_v35, 7  ;;  %v1289_v45 = vrot.slane %v1281_v6, 7  ;;  %v1308_v21 = vmul.f32 %v6705_v49, %v6696_v52 }
 0x309   :  { %v1309_v47 = vmul.f32 %v6705_v49, %v6697_v8  ;;  %v1252_v56 = vadd.f32 %v1244_v61, %v1230_v12  ;;  %v1330_v20 = vmul.f32 %v6706_v41, %v6696_v52  ;;  %v1331_v63 = vmul.f32 %v6706_v41, %v6697_v8  ;;  %v6713_v49 = vld [vmem:[#allocation127_spill] sm:$0xff]  ;;  %v6714_v41 = vld [vmem:[#allocation128_spill] sm:$0xff] }
 0x30a   :  { %v1253_v13 = vadd.f32 %v1245_v50, %v1231_v7  ;;  %v1316_v1 = vrot.slane %v1308_v21, 1  ;;  %v1352_v33 = vmul.f32 %v6707_v46, %v6696_v52  ;;  %v1353_v26 = vmul.f32 %v6707_v46, %v6697_v8  ;;  %v6715_v46 = vld [vmem:[#allocation129_spill] sm:$0xff] }
 0x30b   :  { %v1317_v54 = vrot.slane %v1309_v47, 1  ;;  %v1274_v3 = vadd.f32 %v1266_v59, %v1252_v56  ;;  %v1338_v57 = vrot.slane %v1330_v20, 2  ;;  %v1339_v29 = vrot.slane %v1331_v63, 2 }
 0x30c   :  { %v1275_v23 = vadd.f32 %v1267_v39, %v1253_v13  ;;  %v1324_v14 = vadd.f32 %v1316_v1, %v1302_v37  ;;  %v1360_v51 = vrot.slane %v1352_v33, 3  ;;  %v1361_v34 = vrot.slane %v1353_v26, 3 }
 0x30d   :  { %v1325_v27 = vadd.f32 %v1317_v54, %v1303_v44  ;;  %v5659_v10 = vadd.f32 %v1288_v31, %v1274_v3  ;;  %v1374_v18 = vmul.f32 %v6708_v25, %v6696_v52  ;;  %v1375_v42 = vmul.f32 %v6708_v25, %v6697_v8 }
 0x30e   :  { %v5661_v55 = vadd.f32 %v1289_v45, %v1275_v23  ;;  %v1346_v22 = vadd.f32 %v1338_v57, %v1324_v14  ;;  %v1396_v15 = vmul.f32 %v6709_v5, %v6696_v52  ;;  %v1397_v0 = vmul.f32 %v6709_v5, %v6697_v8 }
 0x30f   :  { %v1347_v16 = vadd.f32 %v1339_v29, %v1325_v27  ;;  %v1382_v4 = vrot.slane %v1374_v18, 4  ;;  %v1383_v62 = vrot.slane %v1375_v42, 4  ;;  %v1418_v28 = vmul.f32 %v6710_v48, %v6696_v52  ;;  %v6716_v42 = vld [vmem:[#allocation130_spill] sm:$0xff] }
 0x310   :  { %v1419_v53 = vmul.f32 %v6710_v48, %v6697_v8  ;;  %v1368_v36 = vadd.f32 %v1360_v51, %v1346_v22  ;;  %v1404_v61 = vrot.slane %v1396_v15, 5  ;;  %v1405_v50 = vrot.slane %v1397_v0, 5  ;;  %v6717_v0 = vld [vmem:[#allocation131_spill] sm:$0xff] }
 0x311   :  { %v1369_v58 = vadd.f32 %v1361_v34, %v1347_v16  ;;  %v1426_v59 = vrot.slane %v1418_v28, 6  ;;  %v1440_v35 = vmul.f32 %v6711_v30, %v6696_v52  ;;  %v1441_v6 = vmul.f32 %v6711_v30, %v6697_v8 }
 0x312   :  { %v1427_v39 = vrot.slane %v1419_v53, 6  ;;  %v1390_v12 = vadd.f32 %v1382_v4, %v1368_v36  ;;  %v1462_v37 = vmul.f32 %v6712_v38, %v6696_v52  ;;  %v1463_v44 = vmul.f32 %v6712_v38, %v6697_v8  ;;  %v6718_v53 = vld [vmem:[#allocation132_spill] sm:$0xff] }
 0x313   :  { %v1391_v7 = vadd.f32 %v1383_v62, %v1369_v58  ;;  %v1448_v31 = vrot.slane %v1440_v35, 7  ;;  %v1449_v45 = vrot.slane %v1441_v6, 7  ;;  %v1468_v21 = vmul.f32 %v6713_v49, %v6696_v52  ;;  %v6719_v6 = vld [vmem:[#allocation133_spill] sm:$0xff] }
 0x314   :  { %v1469_v47 = vmul.f32 %v6713_v49, %v6697_v8  ;;  %v1412_v56 = vadd.f32 %v1404_v61, %v1390_v12  ;;  %v1490_v20 = vmul.f32 %v6714_v41, %v6696_v52  ;;  %v1491_v63 = vmul.f32 %v6714_v41, %v6697_v8 }
 0x315   :  { %v1413_v13 = vadd.f32 %v1405_v50, %v1391_v7  ;;  %v1476_v1 = vrot.slane %v1468_v21, 1  ;;  %v1512_v33 = vmul.f32 %v6715_v46, %v6696_v52  ;;  %v1513_v26 = vmul.f32 %v6715_v46, %v6697_v8 }
 0x316   :  { %v1477_v54 = vrot.slane %v1469_v47, 1  ;;  %v1434_v3 = vadd.f32 %v1426_v59, %v1412_v56  ;;  %v1498_v57 = vrot.slane %v1490_v20, 2  ;;  %v1499_v29 = vrot.slane %v1491_v63, 2  ;;  %v6721_v47 = vld [vmem:[#allocation135_spill] sm:$0xff]  ;;  %v6722_v63 = vld [vmem:[#allocation136_spill] sm:$0xff] }
 0x317   :  { %v1435_v23 = vadd.f32 %v1427_v39, %v1413_v13  ;;  %v1484_v14 = vadd.f32 %v1476_v1, %v1462_v37  ;;  %v1520_v51 = vrot.slane %v1512_v33, 3  ;;  %v1521_v34 = vrot.slane %v1513_v26, 3  ;;  %v6723_v26 = vld [vmem:[#allocation137_spill] sm:$0xff] }
 0x318   :  { %v1485_v27 = vadd.f32 %v1477_v54, %v1463_v44  ;;  %v5695_v25 = vadd.f32 %v1448_v31, %v1434_v3  ;;  %v1534_v22 = vmul.f32 %v6716_v42, %v6696_v52  ;;  %v1535_v16 = vmul.f32 %v6716_v42, %v6697_v8  ;;  %v6720_v44 = vld [vmem:[#allocation134_spill] sm:$0xff] }
 0x319   :  { %v5697_v18 = vadd.f32 %v1449_v45, %v1435_v23  ;;  %v1506_v5 = vadd.f32 %v1498_v57, %v1484_v14  ;;  %v1556_v4 = vmul.f32 %v6717_v0, %v6696_v52  ;;  %v1557_v62 = vmul.f32 %v6717_v0, %v6697_v8 }
 0x31a   :  { %v1507_v15 = vadd.f32 %v1499_v29, %v1485_v27  ;;  %v1542_v48 = vrot.slane %v1534_v22, 4  ;;  %v1543_v28 = vrot.slane %v1535_v16, 4  ;;  %v1578_v36 = vmul.f32 %v6718_v53, %v6696_v52 }
 0x31b   :  { %v1579_v58 = vmul.f32 %v6718_v53, %v6697_v8  ;;  %v1528_v61 = vadd.f32 %v1520_v51, %v1506_v5  ;;  %v1564_v59 = vrot.slane %v1556_v4, 5  ;;  %v1565_v39 = vrot.slane %v1557_v62, 5 }
 0x31c   :  { %v1529_v50 = vadd.f32 %v1521_v34, %v1507_v15  ;;  %v1586_v30 = vrot.slane %v1578_v36, 6  ;;  %v1600_v12 = vmul.f32 %v6719_v6, %v6696_v52  ;;  %v1601_v7 = vmul.f32 %v6719_v6, %v6697_v8  ;;  %v6724_v15 = vld [vmem:[#allocation142_spill] sm:$0xff] }
 0x31d   :  { %v1587_v35 = vrot.slane %v1579_v58, 6  ;;  %v1550_v38 = vadd.f32 %v1542_v48, %v1528_v61  ;;  %v1622_v31 = vmul.f32 %v6720_v44, %v6696_v52  ;;  %v1623_v45 = vmul.f32 %v6720_v44, %v6697_v8 }
 0x31e   :  { %v1551_v37 = vadd.f32 %v1543_v28, %v1529_v50  ;;  %v1608_v49 = vrot.slane %v1600_v12, 7  ;;  %v1609_v21 = vrot.slane %v1601_v7, 7  ;;  %v1628_v56 = vmul.f32 %v6721_v47, %v6696_v52  ;;  %v6725_v28 = vld [vmem:[#allocation143_spill] sm:$0xff]  ;;  %v6726_v50 = vld [vmem:[#allocation144_spill] sm:$0xff] }
 0x31f   :  { %v1629_v13 = vmul.f32 %v6721_v47, %v6697_v8  ;;  %v1572_v41 = vadd.f32 %v1564_v59, %v1550_v38  ;;  %v1650_v1 = vmul.f32 %v6722_v63, %v6696_v52  ;;  %v1651_v54 = vmul.f32 %v6722_v63, %v6697_v8 }
 0x320   :  { %v1573_v20 = vadd.f32 %v1565_v39, %v1551_v37  ;;  %v1636_v46 = vrot.slane %v1628_v56, 1  ;;  %v1672_v3 = vmul.f32 %v6723_v26, %v6696_v52  ;;  %v1673_v23 = vmul.f32 %v6723_v26, %v6697_v8  ;;  %v6727_v37 = vld [vmem:[#allocation145_spill] sm:$0xff] }
 0x321   :  { %v1637_v33 = vrot.slane %v1629_v13, 1  ;;  %v1594_v57 = vadd.f32 %v1586_v30, %v1572_v41  ;;  %v1658_v14 = vrot.slane %v1650_v1, 2  ;;  %v1659_v27 = vrot.slane %v1651_v54, 2 }
 0x322   :  { %v1595_v29 = vadd.f32 %v1587_v35, %v1573_v20  ;;  %v1644_v51 = vadd.f32 %v1636_v46, %v1622_v31  ;;  %v1680_v42 = vrot.slane %v1672_v3, 3  ;;  %v1681_v22 = vrot.slane %v1673_v23, 3  ;;  %v6729_v20 = vld [vmem:[#allocation147_spill] sm:$0xff] }
 0x323   :  { %v1645_v34 = vadd.f32 %v1637_v33, %v1623_v45  ;;  %v5731_v16 = vadd.f32 %v1608_v49, %v1594_v57  ;;  %v1694_v0 = vmul.f32 %v6724_v15, %v6696_v52  ;;  %v1695_v4 = vmul.f32 %v6724_v15, %v6697_v8  ;;  %v6730_v33 = vld [vmem:[#allocation148_spill] sm:$0xff] }
 0x324   :  { %v5733_v5 = vadd.f32 %v1609_v21, %v1595_v29  ;;  %v1666_v62 = vadd.f32 %v1658_v14, %v1644_v51  ;;  %v1716_v53 = vmul.f32 %v6725_v28, %v6696_v52  ;;  %v1717_v36 = vmul.f32 %v6725_v28, %v6697_v8  ;;  %v6728_v21 = vld [vmem:[#allocation146_spill] sm:$0xff]  ;;  %v6731_v29 = vld [vmem:[#allocation149_spill] sm:$0xff] }
 0x325   :  { %v1667_v48 = vadd.f32 %v1659_v27, %v1645_v34  ;;  %v1702_v58 = vrot.slane %v1694_v0, 4  ;;  %v1703_v61 = vrot.slane %v1695_v4, 4  ;;  %v1738_v59 = vmul.f32 %v6726_v50, %v6696_v52 }
 0x326   :  { %v1739_v39 = vmul.f32 %v6726_v50, %v6697_v8  ;;  %v1688_v30 = vadd.f32 %v1680_v42, %v1666_v62  ;;  %v1724_v6 = vrot.slane %v1716_v53, 5  ;;  %v1725_v12 = vrot.slane %v1717_v36, 5  ;;  %v6732_v53 = vld [vmem:[#allocation150_spill] sm:$0xff] }
 0x327   :  { %v1689_v35 = vadd.f32 %v1681_v22, %v1667_v48  ;;  %v1746_v7 = vrot.slane %v1738_v59, 6  ;;  %v1760_v44 = vmul.f32 %v6727_v37, %v6696_v52  ;;  %v1761_v31 = vmul.f32 %v6727_v37, %v6697_v8 }
 0x328   :  { %v1747_v38 = vrot.slane %v1739_v39, 6  ;;  %v1710_v45 = vadd.f32 %v1702_v58, %v1688_v30  ;;  %v1782_v47 = vmul.f32 %v6728_v21, %v6696_v52  ;;  %v1783_v56 = vmul.f32 %v6728_v21, %v6697_v8 }
 0x329   :  { %v1711_v49 = vadd.f32 %v1703_v61, %v1689_v35  ;;  %v1768_v13 = vrot.slane %v1760_v44, 7  ;;  %v1769_v41 = vrot.slane %v1761_v31, 7  ;;  %v1788_v63 = vmul.f32 %v6729_v20, %v6696_v52 }
 0x32a   :  { %v1789_v1 = vmul.f32 %v6729_v20, %v6697_v8  ;;  %v1732_v54 = vadd.f32 %v1724_v6, %v1710_v45  ;;  %v1810_v26 = vmul.f32 %v6730_v33, %v6696_v52  ;;  %v1811_v3 = vmul.f32 %v6730_v33, %v6697_v8  ;;  %v6733_v6 = vld [vmem:[#allocation151_spill] sm:$0xff] }
 0x32b   :  { %v1733_v46 = vadd.f32 %v1725_v12, %v1711_v49  ;;  %v1796_v23 = vrot.slane %v1788_v63, 1  ;;  %v1832_v14 = vmul.f32 %v6731_v29, %v6696_v52  ;;  %v1833_v27 = vmul.f32 %v6731_v29, %v6697_v8 }
 0x32c   :  { %v1797_v57 = vrot.slane %v1789_v1, 1  ;;  %v1754_v51 = vadd.f32 %v1746_v7, %v1732_v54  ;;  %v1818_v42 = vrot.slane %v1810_v26, 2  ;;  %v1819_v22 = vrot.slane %v1811_v3, 2 }
 0x32d   :  { %v1755_v34 = vadd.f32 %v1747_v38, %v1733_v46  ;;  %v1804_v15 = vadd.f32 %v1796_v23, %v1782_v47  ;;  %v1840_v4 = vrot.slane %v1832_v14, 3  ;;  %v1841_v62 = vrot.slane %v1833_v27, 3 }
 0x32e   :  { %v1805_v0 = vadd.f32 %v1797_v57, %v1783_v56  ;;  %v1776_v48 = vadd.f32 %v1768_v13, %v1754_v51  ;;  %v1854_v36 = vmul.f32 %v6732_v53, %v6696_v52  ;;  %v1855_v58 = vmul.f32 %v6732_v53, %v6697_v8 }
 0x32f   :  { %v1777_v28 = vadd.f32 %v1769_v41, %v1755_v34  ;;  %v1826_v61 = vadd.f32 %v1818_v42, %v1804_v15  ;;  %v1876_v59 = vmul.f32 %v5449_v40, %v6696_v52  ;;  %v1877_v39 = vmul.f32 %v5449_v40, %v6697_v8 }
 0x330   :  { %v1827_v50 = vadd.f32 %v1819_v22, %v1805_v0  ;;  %v1862_v30 = vrot.slane %v1854_v36, 4  ;;  %v1863_v35 = vrot.slane %v1855_v58, 4  ;;  %v1898_v12 = vmul.f32 %v6733_v6, %v6696_v52 }
 0x331   :  { %v1899_v7 = vmul.f32 %v6733_v6, %v6697_v8  ;;  %v1848_v38 = vadd.f32 %v1840_v4, %v1826_v61  ;;  %v1884_v44 = vrot.slane %v1876_v59, 5  ;;  %v1885_v31 = vrot.slane %v1877_v39, 5 }
 0x332   :  { %v1849_v37 = vadd.f32 %v1841_v62, %v1827_v50  ;;  %v1906_v45 = vrot.slane %v1898_v12, 6  ;;  %v1920_v21 = vmul.f32 %v5463_v60, %v6696_v52  ;;  %v1921_v40 = vmul.f32 %v5463_v60, %v6697_v8  ;;  %v6736_v50 = vld [vmem:[#allocation49_spill] sm:$0xff] }
 0x333   :  { %v1907_v49 = vrot.slane %v1899_v7, 6  ;;  %v1870_v47 = vadd.f32 %v1862_v30, %v1848_v38  ;;  %v3224_v13 = vrot.slane %v5587_v2, 7  ;;  %v3225_v41 = vrot.slane %v5589_v32, 7 }
 0x334   :  { %v1871_v56 = vadd.f32 %v1863_v35, %v1849_v37  ;;  %v1928_v20 = vrot.slane %v1920_v21, 7  ;;  %v1929_v63 = vrot.slane %v1921_v40, 7  ;;  %v3236_v1 = vrot.slane %v5623_v17, 6 }
 0x335   :  { %v3237_v54 = vrot.slane %v5625_v43, 6  ;;  %v1892_v46 = vadd.f32 %v1884_v44, %v1870_v47  ;;  %v3248_v26 = vrot.slane %v5659_v10, 5  ;;  %v3249_v3 = vrot.slane %v5661_v55, 5  ;;  %v6734_v55 = vld [vmem:[#allocation47_spill] sm:$0xff]  ;;  %v6737_v44 = vld [vmem:[#allocation50_spill] sm:$0xff]  ;;  %v6739_v47 = vld [vmem:[#allocation52_spill] sm:$0xff] }
 0x336   :  { %v1893_v33 = vadd.f32 %v1885_v31, %v1871_v56  ;;  %v3260_v60 = vrot.slane %v5695_v25, 4  ;;  %v3261_v23 = vrot.slane %v5697_v18, 4  ;;  %v3272_v2 = vrot.slane %v5731_v16, 3 }
 0x337   :  { %v3273_v32 = vrot.slane %v5733_v5, 3  ;;  %v1914_v57 = vadd.f32 %v1906_v45, %v1892_v46  ;;  %v3284_v14 = vrot.slane %v1776_v48, 2  ;;  %v3285_v17 = vrot.slane %v1777_v28, 2 }
 0x338   :  { %v1915_v29 = vadd.f32 %v1907_v49, %v1893_v33  ;;  %v3388_v43 = vsel %vm573_vm0, %v5551_v11, %v3224_v13  ;;  %v3389_v10 = vsel %vm573_vm0, %v5553_v9, %v3225_v41  ;;  %v1942_v27 = vmul.f32 %v6734_v55, %v6696_v52  ;;  %v6735_v11 = vld [vmem:[#allocation48_spill] sm:$0xff]  ;;  %v6738_v49 = vld [vmem:[#allocation51_spill] sm:$0xff] }
 0x339   :  { %v1943_v25 = vmul.f32 %v6734_v55, %v6697_v8  ;;  %v1936_v18 = vadd.f32 %v1928_v20, %v1914_v57  ;;  %v3392_v5 = vsel %vm578_vm1, %v3388_v43, %v3236_v1  ;;  %v3393_v51 = vsel %vm578_vm1, %v3389_v10, %v3237_v54  ;;  %v6742_v10 = vld [vmem:[#allocation56_spill] sm:$0xff] }
 0x33a   :  { %v1937_v16 = vadd.f32 %v1929_v63, %v1915_v29  ;;  %v3396_v34 = vsel %vm583_vm2, %v3392_v5, %v3248_v26  ;;  %v3397_v42 = vsel %vm583_vm2, %v3393_v51, %v3249_v3  ;;  %v1948_v22 = vmul.f32 %v6735_v11, %v6696_v52  ;;  %v6740_v3 = vld [vmem:[#allocation53_spill] sm:$0xff]  ;;  %v6741_v29 = vld [vmem:[#allocation54_spill] sm:$0xff] }
 0x33b   :  { %v1949_v9 = vmul.f32 %v6735_v11, %v6697_v8  ;;  %v3296_v15 = vrot.slane %v1936_v18, 1  ;;  %v3400_v4 = vsel %vm588_vm3, %v3396_v34, %v3260_v60  ;;  %v3401_v62 = vsel %vm588_vm3, %v3397_v42, %v3261_v23  ;;  %v6744_v5 = vld [vmem:[#allocation58_spill] sm:$0xff] }
 0x33c   :  { %v3297_v0 = vrot.slane %v1937_v16, 1  ;;  %v3404_v48 = vsel %vm593_vm4, %v3400_v4, %v3272_v2  ;;  %v3405_v28 = vsel %vm593_vm4, %v3401_v62, %v3273_v32  ;;  %v1956_v53 = vrot.slane %v1948_v22, 1 }
 0x33d   :  { %v1957_v36 = vrot.slane %v1949_v9, 1  ;;  %v3408_v58 = vsel %vm598_vm5, %v3404_v48, %v3284_v14  ;;  %v3409_v61 = vsel %vm598_vm5, %v3405_v28, %v3285_v17  ;;  %v1970_v59 = vmul.f32 %v6736_v50, %v6696_v52  ;;  %v6745_v9 = vld [vmem:[#allocation59_spill] sm:$0xff] }
 0x33e   :  { %v1971_v39 = vmul.f32 %v6736_v50, %v6697_v8  ;;  %v5820_v30 = vsel %vm603_vm6, %v3408_v58, %v3296_v15  ;;  %v5823_v35 = vsel %vm603_vm6, %v3409_v61, %v3297_v0  ;;  %v1964_v6 = vadd.f32 %v1956_v53, %v1942_v27  ;;  %v6743_v27 = vld [vmem:[#allocation57_spill] sm:$0xff] }
 0x33f   :  { %v1965_v12 = vadd.f32 %v1957_v36, %v1943_v25  ;;  %v3450_v7 = vadd.f32 %v5823_v35, %v5820_v30  ;;  %v1978_v38 = vrot.slane %v1970_v59, 2  ;;  %v1992_v31 = vmul.f32 %v6737_v44, %v6696_v52  ;;  %v6746_v59 = vld [vmem:[#allocation60_spill] sm:$0xff] }
 0x340   :  { %v1979_v37 = vrot.slane %v1971_v39, 2  ;;  %v1993_v45 = vmul.f32 %v6737_v44, %v6697_v8  ;;  %v2014_v21 = vmul.f32 %v6738_v49, %v6696_v52  ;;  %v2015_v40 = vmul.f32 %v6738_v49, %v6697_v8 }
 0x341   :  { %v2036_v56 = vmul.f32 %v6739_v47, %v6696_v52  ;;  %3451 = vadd.xlane.f32.xlu1 %v3450_v7  ;;  %v1986_v13 = vadd.f32 %v1978_v38, %v1964_v6  ;;  %v2000_v20 = vrot.slane %v1992_v31, 3  ;;  %v2037_v63 = vmul.f32 %v6739_v47, %v6697_v8  ;;  %v6747_v38 = vld [vmem:[#allocation61_spill] sm:$0xff] }
 0x342   :  { %v1987_v41 = vadd.f32 %v1979_v37, %v1965_v12  ;;  %v2001_v1 = vrot.slane %v1993_v45, 3  ;;  %v2022_v46 = vrot.slane %v2014_v21, 4  ;;  %v2023_v26 = vrot.slane %v2015_v40, 4  ;;  %v6748_v21 = vld [vmem:[#allocation62_spill] sm:$0xff] }
 0x343   :  { %v2008_v54 = vadd.f32 %v2000_v20, %v1986_v13  ;;  %v2058_v60 = vmul.f32 %v6740_v3, %v6696_v52  ;;  %v2059_v23 = vmul.f32 %v6740_v3, %v6697_v8  ;;  %v2044_v32 = vrot.slane %v2036_v56, 5  ;;  %v6749_v3 = vld [vmem:[#allocation63_spill] sm:$0xff] }
 0x344   :  { %v2009_v33 = vadd.f32 %v2001_v1, %v1987_v41  ;;  %v2045_v57 = vrot.slane %v2037_v63, 5  ;;  %v2080_v14 = vmul.f32 %v6741_v29, %v6696_v52  ;;  %v5847_v43 = vmul.f32 %v6741_v29, %v6697_v8 }
 0x345   :  { %v2030_v2 = vadd.f32 %v2022_v46, %v2008_v54  ;;  %v2102_v55 = vmul.f32 %v6742_v10, %v6696_v52  ;;  %v2108_v25 = vmul.f32 %v6743_v27, %v6696_v52  ;;  %v2109_v16 = vmul.f32 %v6743_v27, %v6697_v8 }
 0x346   :  { %v2031_v17 = vadd.f32 %v2023_v26, %v2009_v33  ;;  %v2130_v51 = vmul.f32 %v6744_v5, %v6696_v52  ;;  %v2131_v34 = vmul.f32 %v6744_v5, %v6697_v8  ;;  %v2066_v42 = vrot.slane %v2058_v60, 6  ;;  %v6753_v5 = vld [vmem:[#allocation67_spill] sm:$0xff] }
 0x347   :  { %v2052_v18 = vadd.f32 %v2044_v32, %v2030_v2  ;;  %v2067_v11 = vrot.slane %v2059_v23, 6  ;;  %v2116_v22 = vrot.slane %v2108_v25, 1  ;;  %v2152_v15 = vmul.f32 %v6745_v9, %v6696_v52  ;;  %v6752_v25 = vld [vmem:[#allocation64_spill] sm:$0xff] }
 0x348   :  { %v2088_v0 = vrot.slane %v2080_v14, 7  ;;  %v2103_v4 = vmul.f32 %v6742_v10, %v6697_v8  ;;  %v2117_v62 = vrot.slane %v2109_v16, 1  ;;  %v2153_v48 = vmul.f32 %v6745_v9, %v6697_v8 }
 0x349   :  { %v2053_v28 = vadd.f32 %v2045_v57, %v2031_v17  ;;  %v2074_v53 = vadd.f32 %v2066_v42, %v2052_v18  ;;  %v2124_v36 = vadd.f32 %v2116_v22, %v2102_v55  ;;  %v2138_v58 = vrot.slane %v2130_v51, 2  ;;  %v6750_v57 = vld [vmem:[#allocation65_spill] sm:$0xff] }
 0x34a   :  { %v2125_v61 = vadd.f32 %v2117_v62, %v2103_v4  ;;  %v2139_v50 = vrot.slane %v2131_v34, 2  ;;  %v2174_v39 = vmul.f32 %v6746_v59, %v6696_v52  ;;  %v2175_v6 = vmul.f32 %v6746_v59, %v6697_v8 }
 0x34b   :  { %v2146_v12 = vadd.f32 %v2138_v58, %v2124_v36  ;;  %v2160_v7 = vrot.slane %v2152_v15, 3  ;;  %v2196_v37 = vmul.f32 %v6747_v38, %v6696_v52  ;;  %v2197_v44 = vmul.f32 %v6747_v38, %v6697_v8  ;;  %v6756_v38 = vld [vmem:[#allocation70_spill] sm:$0xff] }
 0x34c   :  { %v2089_v31 = vrot.slane %v5847_v43, 7  ;;  %v2147_v45 = vadd.f32 %v2139_v50, %v2125_v61  ;;  %v2161_v49 = vrot.slane %v2153_v48, 3  ;;  %v2218_v40 = vmul.f32 %v6748_v21, %v6696_v52  ;;  %v6751_v43 = vld [vmem:[#allocation66_spill] sm:$0xff]  ;;  %v6755_v50 = vld [vmem:[#allocation69_spill] sm:$0xff] }
 0x34d   :  { %v2075_v47 = vadd.f32 %v2067_v11, %v2053_v28  ;;  %v2168_v56 = vadd.f32 %v2160_v7, %v2146_v12  ;;  %v2182_v13 = vrot.slane %v2174_v39, 4  ;;  %v2219_v41 = vmul.f32 %v6748_v21, %v6697_v8  ;;  %v6754_v28 = vld [vmem:[#allocation68_spill] sm:$0xff] }
 0x34e   :  { %v5878_v20 = vadd.f32 %v2088_v0, %v2074_v53  ;;  %v2169_v63 = vadd.f32 %v2161_v49, %v2147_v45  ;;  %v2183_v1 = vrot.slane %v2175_v6, 4  ;;  %v2204_v54 = vrot.slane %v2196_v37, 5 }
 0x34f   :  { %v2190_v46 = vadd.f32 %v2182_v13, %v2168_v56  ;;  %v2205_v33 = vrot.slane %v2197_v44, 5  ;;  %v2226_v26 = vrot.slane %v2218_v40, 6  ;;  %v2240_v60 = vmul.f32 %v6749_v3, %v6696_v52 }
 0x350   :  { %v2191_v23 = vadd.f32 %v2183_v1, %v2169_v63  ;;  %v2227_v2 = vrot.slane %v2219_v41, 6  ;;  %v2241_v32 = vmul.f32 %v6749_v3, %v6697_v8  ;;  %v2268_v29 = vmul.f32 %v6750_v57, %v6696_v52  ;;  %v6758_v3 = vld [vmem:[#allocation73_spill] sm:$0xff] }
 0x351   :  { %v2212_v14 = vadd.f32 %v2204_v54, %v2190_v46  ;;  %v2269_v17 = vmul.f32 %v6750_v57, %v6697_v8  ;;  %v2290_v10 = vmul.f32 %v6751_v43, %v6696_v52  ;;  %v2291_v55 = vmul.f32 %v6751_v43, %v6697_v8  ;;  %v6757_v46 = vld [vmem:[#allocation71_spill] sm:$0xff] }
 0x352   :  { %v2213_v27 = vadd.f32 %v2205_v33, %v2191_v23  ;;  %v2262_v18 = vmul.f32 %v6752_v25, %v6696_v52  ;;  %v2276_v16 = vrot.slane %v2268_v29, 1  ;;  %v2312_v51 = vmul.f32 %v6753_v5, %v6696_v52 }
 0x353   :  { %v2248_v34 = vrot.slane %v2240_v60, 7  ;;  %v2263_v42 = vmul.f32 %v6752_v25, %v6697_v8  ;;  %v2277_v11 = vrot.slane %v2269_v17, 1  ;;  %v2313_v22 = vmul.f32 %v6753_v5, %v6697_v8  ;;  %v6760_v17 = vld [vmem:[#allocation72_spill] sm:$0xff] }
 0x354   :  { %v2234_v9 = vadd.f32 %v2226_v26, %v2212_v14  ;;  %v2284_v15 = vadd.f32 %v2276_v16, %v2262_v18  ;;  %v2298_v0 = vrot.slane %v2290_v10, 2  ;;  %v2299_v4 = vrot.slane %v2291_v55, 2  ;;  %v6761_v55 = vld [vmem:[#allocation75_spill] sm:$0xff] }
 0x355   :  { %v2235_v62 = vadd.f32 %v2227_v2, %v2213_v27  ;;  %v2285_v48 = vadd.f32 %v2277_v11, %v2263_v42  ;;  %v2334_v53 = vmul.f32 %v6754_v28, %v6696_v52  ;;  %v2335_v36 = vmul.f32 %v6754_v28, %v6697_v8  ;;  %v6763_v28 = vld [vmem:[#allocation77_spill] sm:$0xff] }
 0x356   :  { %v2306_v58 = vadd.f32 %v2298_v0, %v2284_v15  ;;  %v2320_v61 = vrot.slane %v2312_v51, 3  ;;  %v2356_v59 = vmul.f32 %v6755_v50, %v6696_v52  ;;  %v2357_v39 = vmul.f32 %v6755_v50, %v6697_v8  ;;  %v6762_v15 = vld [vmem:[#allocation76_spill] sm:$0xff] }
 0x357   :  { %v2249_v6 = vrot.slane %v2241_v32, 7  ;;  %v2307_v12 = vadd.f32 %v2299_v4, %v2285_v48  ;;  %v2321_v7 = vrot.slane %v2313_v22, 3  ;;  %v2378_v37 = vmul.f32 %v6756_v38, %v6696_v52  ;;  %v6759_v32 = vld [vmem:[#allocation74_spill] sm:$0xff] }
 0x358   :  { %v5910_v44 = vadd.f32 %v2089_v31, %v2075_v47  ;;  %v5912_v45 = vadd.f32 %v2248_v34, %v2234_v9  ;;  %v2328_v49 = vadd.f32 %v2320_v61, %v2306_v58  ;;  %v2342_v21 = vrot.slane %v2334_v53, 4 }
 0x359   :  { %v5914_v40 = vadd.f32 %v2249_v6, %v2235_v62  ;;  %v2329_v56 = vadd.f32 %v2321_v7, %v2307_v12  ;;  %v2343_v13 = vrot.slane %v2335_v36, 4  ;;  %v2379_v41 = vmul.f32 %v6756_v38, %v6697_v8 }
 0x35a   :  { %v2350_v63 = vadd.f32 %v2342_v21, %v2328_v49  ;;  %v2364_v1 = vrot.slane %v2356_v59, 5  ;;  %v2365_v54 = vrot.slane %v2357_v39, 5  ;;  %v2400_v33 = vmul.f32 %v6757_v46, %v6696_v52  ;;  %v6764_v59 = vld [vmem:[#allocation78_spill] sm:$0xff] }
 0x35b   :  { %v2351_v26 = vadd.f32 %v2343_v13, %v2329_v56  ;;  %v2386_v31 = vrot.slane %v2378_v37, 6  ;;  %v5922_v47 = vmul.f32 %v6757_v46, %v6697_v8  ;;  %v2428_v60 = vmul.f32 %v6758_v3, %v6696_v52 }
 0x35c   :  { %v2372_v23 = vadd.f32 %v2364_v1, %v2350_v63  ;;  %v2429_v2 = vmul.f32 %v6758_v3, %v6697_v8  ;;  %v2450_v57 = vmul.f32 %v6759_v32, %v6696_v52  ;;  %v2451_v29 = vmul.f32 %v6759_v32, %v6697_v8  ;;  %v6765_v1 = vld [vmem:[#allocation79_spill] sm:$0xff] }
 0x35d   :  { %v2387_v14 = vrot.slane %v2379_v41, 6  ;;  %v2422_v43 = vmul.f32 %v6760_v17, %v6696_v52  ;;  %v2436_v10 = vrot.slane %v2428_v60, 1  ;;  %v2472_v27 = vmul.f32 %v6761_v55, %v6696_v52 }
 0x35e   :  { %v2408_v25 = vrot.slane %v2400_v33, 7  ;;  %v2423_v18 = vmul.f32 %v6760_v17, %v6697_v8  ;;  %v2437_v16 = vrot.slane %v2429_v2, 1  ;;  %v2473_v5 = vmul.f32 %v6761_v55, %v6697_v8 }
 0x35f   :  { %v2373_v51 = vadd.f32 %v2365_v54, %v2351_v26  ;;  %v2394_v34 = vadd.f32 %v2386_v31, %v2372_v23  ;;  %v2444_v42 = vadd.f32 %v2436_v10, %v2422_v43  ;;  %v2458_v11 = vrot.slane %v2450_v57, 2  ;;  %v6766_v31 = vld [vmem:[#allocation81_spill] sm:$0xff]  ;;  %v6767_v23 = vld [vmem:[#allocation82_spill] sm:$0xff]  ;;  %v6769_v43 = vld [vmem:[#allocation83_spill] sm:$0xff] }
 0x360   :  { %v2445_v22 = vadd.f32 %v2437_v16, %v2423_v18  ;;  %v2459_v9 = vrot.slane %v2451_v29, 2  ;;  %v2494_v0 = vmul.f32 %v6762_v15, %v6696_v52  ;;  %v2495_v4 = vmul.f32 %v6762_v15, %v6697_v8  ;;  %v6768_v29 = vld [vmem:[#allocation80_spill] sm:$0xff] }
 0x361   :  { %v2466_v62 = vadd.f32 %v2458_v11, %v2444_v42  ;;  %v2480_v48 = vrot.slane %v2472_v27, 3  ;;  %v2516_v53 = vmul.f32 %v6763_v28, %v6696_v52  ;;  %v2517_v36 = vmul.f32 %v6763_v28, %v6697_v8 }
 0x362   :  { %v2409_v58 = vrot.slane %v5922_v47, 7  ;;  %v2467_v61 = vadd.f32 %v2459_v9, %v2445_v22  ;;  %v2481_v50 = vrot.slane %v2473_v5, 3  ;;  %v2538_v39 = vmul.f32 %v6764_v59, %v6696_v52  ;;  %v6770_v22 = vld [vmem:[#allocation84_spill] sm:$0xff] }
 0x363   :  { %v2395_v6 = vadd.f32 %v2387_v14, %v2373_v51  ;;  %v2488_v12 = vadd.f32 %v2480_v48, %v2466_v62  ;;  %v2502_v7 = vrot.slane %v2494_v0, 4  ;;  %v2539_v38 = vmul.f32 %v6764_v59, %v6697_v8  ;;  %v6771_v62 = vld [vmem:[#allocation85_spill] sm:$0xff] }
 0x364   :  { %v5953_v37 = vadd.f32 %v2408_v25, %v2394_v34  ;;  %v2489_v49 = vadd.f32 %v2481_v50, %v2467_v61  ;;  %v2503_v21 = vrot.slane %v2495_v4, 4  ;;  %v2524_v56 = vrot.slane %v2516_v53, 5  ;;  %v6772_v50 = vld [vmem:[#allocation86_spill] sm:$0xff] }
 0x365   :  { %v2510_v13 = vadd.f32 %v2502_v7, %v2488_v12  ;;  %v2525_v41 = vrot.slane %v2517_v36, 5  ;;  %v2546_v63 = vrot.slane %v2538_v39, 6  ;;  %v2560_v54 = vmul.f32 %v6765_v1, %v6696_v52 }
 0x366   :  { %v2511_v46 = vadd.f32 %v2503_v21, %v2489_v49  ;;  %v2547_v33 = vrot.slane %v2539_v38, 6  ;;  %v2561_v26 = vmul.f32 %v6765_v1, %v6697_v8  ;;  %v2588_v47 = vmul.f32 %v6766_v31, %v6696_v52 }
 0x367   :  { %v2532_v3 = vadd.f32 %v2524_v56, %v2510_v13  ;;  %v2589_v60 = vmul.f32 %v6766_v31, %v6697_v8  ;;  %v2610_v2 = vmul.f32 %v6767_v23, %v6696_v52  ;;  %v2611_v32 = vmul.f32 %v6767_v23, %v6697_v8 }
 0x368   :  { %v2533_v57 = vadd.f32 %v2525_v41, %v2511_v46  ;;  %v2582_v14 = vmul.f32 %v6768_v29, %v6696_v52  ;;  %v2596_v17 = vrot.slane %v2588_v47, 1  ;;  %v2632_v10 = vmul.f32 %v6769_v43, %v6696_v52 }
 0x369   :  { %v2568_v55 = vrot.slane %v2560_v54, 7  ;;  %v2583_v27 = vmul.f32 %v6768_v29, %v6697_v8  ;;  %v2597_v25 = vrot.slane %v2589_v60, 1  ;;  %v2633_v18 = vmul.f32 %v6769_v43, %v6697_v8  ;;  %v6773_v54 = vld [vmem:[#allocation87_spill] sm:$0xff]  ;;  %v6775_v60 = vld [vmem:[#allocation90_spill] sm:$0xff] }
 0x36a   :  { %v2554_v16 = vadd.f32 %v2546_v63, %v2532_v3  ;;  %v2604_v5 = vadd.f32 %v2596_v17, %v2582_v14  ;;  %v2618_v51 = vrot.slane %v2610_v2, 2  ;;  %v2619_v34 = vrot.slane %v2611_v32, 2  ;;  %v6777_v17 = vld [vmem:[#allocation91_spill] sm:$0xff] }
 0x36b   :  { %v2555_v42 = vadd.f32 %v2547_v33, %v2533_v57  ;;  %v2605_v11 = vadd.f32 %v2597_v25, %v2583_v27  ;;  %v2654_v9 = vmul.f32 %v6770_v22, %v6696_v52  ;;  %v2655_v15 = vmul.f32 %v6770_v22, %v6697_v8  ;;  %v6776_v57 = vld [vmem:[#allocation88_spill] sm:$0xff] }
 0x36c   :  { %v2626_v0 = vadd.f32 %v2618_v51, %v2604_v5  ;;  %v2640_v4 = vrot.slane %v2632_v10, 3  ;;  %v2676_v48 = vmul.f32 %v6771_v62, %v6696_v52  ;;  %v2677_v28 = vmul.f32 %v6771_v62, %v6697_v8 }
 0x36d   :  { %v2569_v53 = vrot.slane %v2561_v26, 7  ;;  %v2627_v36 = vadd.f32 %v2619_v34, %v2605_v11  ;;  %v2641_v61 = vrot.slane %v2633_v18, 3  ;;  %v2698_v59 = vmul.f32 %v6772_v50, %v6696_v52  ;;  %v6774_v26 = vld [vmem:[#allocation89_spill] sm:$0xff]  ;;  %v6778_v11 = vld [vmem:[#allocation92_spill] sm:$0xff] }
 0x36e   :  { %v5985_v39 = vadd.f32 %v2409_v58, %v2395_v6  ;;  %v5987_v12 = vadd.f32 %v2568_v55, %v2554_v16  ;;  %v2648_v7 = vadd.f32 %v2640_v4, %v2626_v0  ;;  %v2662_v38 = vrot.slane %v2654_v9, 4  ;;  %v6779_v4 = vld [vmem:[#allocation93_spill] sm:$0xff] }
 0x36f   :  { %v5989_v49 = vadd.f32 %v2569_v53, %v2555_v42  ;;  %v2649_v21 = vadd.f32 %v2641_v61, %v2627_v36  ;;  %v2663_v56 = vrot.slane %v2655_v15, 4  ;;  %v2699_v13 = vmul.f32 %v6772_v50, %v6697_v8  ;;  %v6780_v61 = vld [vmem:[#allocation94_spill] sm:$0xff] }
 0x370   :  { %v2670_v41 = vadd.f32 %v2662_v38, %v2648_v7  ;;  %v2684_v63 = vrot.slane %v2676_v48, 5  ;;  %v2685_v1 = vrot.slane %v2677_v28, 5  ;;  %v2720_v46 = vmul.f32 %v6773_v54, %v6696_v52 }
 0x371   :  { %v2671_v33 = vadd.f32 %v2663_v56, %v2649_v21  ;;  %v2706_v58 = vrot.slane %v2698_v59, 6  ;;  %v5997_v6 = vmul.f32 %v6773_v54, %v6697_v8  ;;  %v2748_v31 = vmul.f32 %v6774_v26, %v6696_v52 }
 0x372   :  { %v2692_v47 = vadd.f32 %v2684_v63, %v2670_v41  ;;  %v2749_v3 = vmul.f32 %v6774_v26, %v6697_v8  ;;  %v2770_v23 = vmul.f32 %v6775_v60, %v6696_v52  ;;  %v2771_v2 = vmul.f32 %v6775_v60, %v6697_v8 }
 0x373   :  { %v2707_v32 = vrot.slane %v2699_v13, 6  ;;  %v2742_v29 = vmul.f32 %v6776_v57, %v6696_v52  ;;  %v2756_v14 = vrot.slane %v2748_v31, 1  ;;  %v2792_v43 = vmul.f32 %v6777_v17, %v6696_v52 }
 0x374   :  { %v2728_v10 = vrot.slane %v2720_v46, 7  ;;  %v2743_v55 = vmul.f32 %v6776_v57, %v6697_v8  ;;  %v2757_v27 = vrot.slane %v2749_v3, 1  ;;  %v2793_v25 = vmul.f32 %v6777_v17, %v6697_v8 }
 0x375   :  { %v2693_v18 = vadd.f32 %v2685_v1, %v2671_v33  ;;  %v2714_v16 = vadd.f32 %v2706_v58, %v2692_v47  ;;  %v2764_v5 = vadd.f32 %v2756_v14, %v2742_v29  ;;  %v2778_v51 = vrot.slane %v2770_v23, 2  ;;  %v6781_v33 = vld [vmem:[#allocation95_spill] sm:$0xff]  ;;  %v6782_v47 = vld [vmem:[#allocation97_spill] sm:$0xff]  ;;  %v6784_v14 = vld [vmem:[#allocation96_spill] sm:$0xff] }
 0x376   :  { %v2765_v34 = vadd.f32 %v2757_v27, %v2743_v55  ;;  %v2779_v42 = vrot.slane %v2771_v2, 2  ;;  %v2814_v22 = vmul.f32 %v6778_v11, %v6696_v52  ;;  %v2815_v9 = vmul.f32 %v6778_v11, %v6697_v8  ;;  %v6783_v2 = vld [vmem:[#allocation98_spill] sm:$0xff] }
 0x377   :  { %v2786_v15 = vadd.f32 %v2778_v51, %v2764_v5  ;;  %v2800_v0 = vrot.slane %v2792_v43, 3  ;;  %v2836_v62 = vmul.f32 %v6779_v4, %v6696_v52  ;;  %v2837_v48 = vmul.f32 %v6779_v4, %v6697_v8 }
 0x378   :  { %v2729_v28 = vrot.slane %v5997_v6, 7  ;;  %v2787_v53 = vadd.f32 %v2779_v42, %v2765_v34  ;;  %v2801_v36 = vrot.slane %v2793_v25, 3  ;;  %v2858_v50 = vmul.f32 %v6780_v61, %v6696_v52 }
 0x379   :  { %v2715_v59 = vadd.f32 %v2707_v32, %v2693_v18  ;;  %v2808_v7 = vadd.f32 %v2800_v0, %v2786_v15  ;;  %v2822_v38 = vrot.slane %v2814_v22, 4  ;;  %v2859_v21 = vmul.f32 %v6780_v61, %v6697_v8 }
 0x37a   :  { %v6028_v56 = vadd.f32 %v2728_v10, %v2714_v16  ;;  %v2809_v13 = vadd.f32 %v2801_v36, %v2787_v53  ;;  %v2823_v41 = vrot.slane %v2815_v9, 4  ;;  %v2844_v63 = vrot.slane %v2836_v62, 5  ;;  %v6785_v10 = vld [vmem:[#allocation99_spill] sm:$0xff]  ;;  %v6786_v9 = vld [vmem:[#allocation100_spill] sm:$0xff] }
 0x37b   :  { %v2830_v1 = vadd.f32 %v2822_v38, %v2808_v7  ;;  %v2845_v54 = vrot.slane %v2837_v48, 5  ;;  %v2866_v46 = vrot.slane %v2858_v50, 6  ;;  %v2880_v58 = vmul.f32 %v6781_v33, %v6696_v52  ;;  %v6787_v48 = vld [vmem:[#allocation101_spill] sm:$0xff]  ;;  %v6788_v38 = vld [vmem:[#allocation102_spill] sm:$0xff] }
 0x37c   :  { %v2831_v6 = vadd.f32 %v2823_v41, %v2809_v13  ;;  %v2867_v26 = vrot.slane %v2859_v21, 6  ;;  %v2881_v31 = vmul.f32 %v6781_v33, %v6697_v8  ;;  %v2908_v3 = vmul.f32 %v6782_v47, %v6696_v52 }
 0x37d   :  { %v2852_v60 = vadd.f32 %v2844_v63, %v2830_v1  ;;  %v2909_v23 = vmul.f32 %v6782_v47, %v6697_v8  ;;  %v2930_v32 = vmul.f32 %v6783_v2, %v6696_v52  ;;  %v2931_v57 = vmul.f32 %v6783_v2, %v6697_v8 }
 0x37e   :  { %v2853_v29 = vadd.f32 %v2845_v54, %v2831_v6  ;;  %v2902_v17 = vmul.f32 %v6784_v14, %v6696_v52  ;;  %v2916_v43 = vrot.slane %v2908_v3, 1  ;;  %v2952_v55 = vmul.f32 %v6785_v10, %v6696_v52 }
 0x37f   :  { %v2888_v27 = vrot.slane %v2880_v58, 7  ;;  %v2903_v25 = vmul.f32 %v6784_v14, %v6697_v8  ;;  %v2917_v18 = vrot.slane %v2909_v23, 1  ;;  %v2953_v16 = vmul.f32 %v6785_v10, %v6697_v8  ;;  %v6790_v23 = vld [vmem:[#allocation105_spill] sm:$0xff]  ;;  %v6792_v10 = vld [vmem:[#allocation104_spill] sm:$0xff] }
 0x380   :  { %v2874_v5 = vadd.f32 %v2866_v46, %v2852_v60  ;;  %v2924_v51 = vadd.f32 %v2916_v43, %v2902_v17  ;;  %v2938_v34 = vrot.slane %v2930_v32, 2  ;;  %v2939_v42 = vrot.slane %v2931_v57, 2  ;;  %v6789_v60 = vld [vmem:[#allocation103_spill] sm:$0xff] }
 0x381   :  { %v2875_v11 = vadd.f32 %v2867_v26, %v2853_v29  ;;  %v2925_v22 = vadd.f32 %v2917_v18, %v2903_v25  ;;  %v2974_v15 = vmul.f32 %v6786_v9, %v6696_v52  ;;  %v2975_v0 = vmul.f32 %v6786_v9, %v6697_v8  ;;  %v6791_v29 = vld [vmem:[#allocation106_spill] sm:$0xff]  ;;  %v6793_v25 = vld [vmem:[#allocation107_spill] sm:$0xff] }
 0x382   :  { %v2946_v4 = vadd.f32 %v2938_v34, %v2924_v51  ;;  %v2960_v62 = vrot.slane %v2952_v55, 3  ;;  %v2996_v53 = vmul.f32 %v6787_v48, %v6696_v52  ;;  %v2997_v36 = vmul.f32 %v6787_v48, %v6697_v8 }
 0x383   :  { %v2889_v61 = vrot.slane %v2881_v31, 7  ;;  %v2947_v50 = vadd.f32 %v2939_v42, %v2925_v22  ;;  %v2961_v7 = vrot.slane %v2953_v16, 3  ;;  %v3018_v21 = vmul.f32 %v6788_v38, %v6696_v52 }
 0x384   :  { %v6060_v13 = vadd.f32 %v2729_v28, %v2715_v59  ;;  %v6062_v41 = vadd.f32 %v2888_v27, %v2874_v5  ;;  %v2968_v63 = vadd.f32 %v2960_v62, %v2946_v4  ;;  %v2982_v1 = vrot.slane %v2974_v15, 4  ;;  %v6794_v4 = vld [vmem:[#allocation108_spill] sm:$0xff] }
 0x385   :  { %v6064_v54 = vadd.f32 %v2889_v61, %v2875_v11  ;;  %v2969_v46 = vadd.f32 %v2961_v7, %v2947_v50  ;;  %v2983_v33 = vrot.slane %v2975_v0, 4  ;;  %v3004_v58 = vrot.slane %v2996_v53, 5  ;;  %v6795_v50 = vld [vmem:[#allocation109_spill] sm:$0xff] }
 0x386   :  { %v2990_v6 = vadd.f32 %v2982_v1, %v2968_v63  ;;  %v3005_v26 = vrot.slane %v2997_v36, 5  ;;  %v3019_v31 = vmul.f32 %v6788_v38, %v6697_v8  ;;  %v3026_v47 = vrot.slane %v3018_v21, 6 }
 0x387   :  { %v2991_v3 = vadd.f32 %v2983_v33, %v2969_v46  ;;  %v3040_v28 = vmul.f32 %v6789_v60, %v6696_v52  ;;  %v3041_v59 = vmul.f32 %v6789_v60, %v6697_v8  ;;  %v3068_v2 = vmul.f32 %v6790_v23, %v6696_v52 }
 0x388   :  { %v3012_v32 = vadd.f32 %v3004_v58, %v2990_v6  ;;  %v3069_v57 = vmul.f32 %v6790_v23, %v6697_v8  ;;  %v3090_v14 = vmul.f32 %v6791_v29, %v6696_v52  ;;  %v3091_v17 = vmul.f32 %v6791_v29, %v6697_v8  ;;  %v6796_v6 = vld [vmem:[#allocation110_spill] sm:$0xff] }
 0x389   :  { %v3013_v43 = vadd.f32 %v3005_v26, %v2991_v3  ;;  %v3062_v55 = vmul.f32 %v6792_v10, %v6696_v52  ;;  %v3076_v27 = vrot.slane %v3068_v2, 1  ;;  %v3112_v18 = vmul.f32 %v6793_v25, %v6696_v52  ;;  %v6797_v3 = vld [vmem:[#allocation111_spill] sm:$0xff] }
 0x38a   :  { %v3027_v16 = vrot.slane %v3019_v31, 6  ;;  %v3063_v5 = vmul.f32 %v6792_v10, %v6697_v8  ;;  %v3077_v51 = vrot.slane %v3069_v57, 1  ;;  %v3113_v34 = vmul.f32 %v6793_v25, %v6697_v8 }
 0x38b   :  { %v3034_v42 = vadd.f32 %v3026_v47, %v3012_v32  ;;  %v3048_v11 = vrot.slane %v3040_v28, 7  ;;  %v3084_v22 = vadd.f32 %v3076_v27, %v3062_v55  ;;  %v3098_v9 = vrot.slane %v3090_v14, 2 }
 0x38c   :  { %v3085_v15 = vadd.f32 %v3077_v51, %v3063_v5  ;;  %v3099_v0 = vrot.slane %v3091_v17, 2  ;;  %v3134_v62 = vmul.f32 %v6794_v4, %v6696_v52  ;;  %v3135_v48 = vmul.f32 %v6794_v4, %v6697_v8 }
 0x38d   :  { %v3035_v53 = vadd.f32 %v3027_v16, %v3013_v43  ;;  %v3106_v36 = vadd.f32 %v3098_v9, %v3084_v22  ;;  %v3120_v61 = vrot.slane %v3112_v18, 3  ;;  %v3156_v7 = vmul.f32 %v6795_v50, %v6696_v52 }
 0x38e   :  { %v3049_v38 = vrot.slane %v3041_v59, 7  ;;  %v3107_v21 = vadd.f32 %v3099_v0, %v3085_v15  ;;  %v3121_v63 = vrot.slane %v3113_v34, 3  ;;  %v3157_v1 = vmul.f32 %v6795_v50, %v6697_v8 }
 0x38f   :  { %v3128_v46 = vadd.f32 %v3120_v61, %v3106_v36  ;;  %v3142_v33 = vrot.slane %v3134_v62, 4  ;;  %v3143_v58 = vrot.slane %v3135_v48, 4  ;;  %v3178_v26 = vmul.f32 %v6796_v6, %v6696_v52 }
 0x390   :  { %v3129_v31 = vadd.f32 %v3121_v63, %v3107_v21  ;;  %v3179_v47 = vmul.f32 %v6796_v6, %v6697_v8  ;;  %v3200_v60 = vmul.f32 %v6797_v3, %v6696_v52  ;;  %v3201_v28 = vmul.f32 %v6797_v3, %v6697_v8 }
 0x391   :  { %v3056_v59 = vadd.f32 %v3048_v11, %v3034_v42  ;;  %v3057_v23 = vadd.f32 %v3049_v38, %v3035_v53  ;;  %v3150_v2 = vadd.f32 %v3142_v33, %v3128_v46  ;;  %v3164_v32 = vrot.slane %v3156_v7, 5  ;;  %v3446_v7 = vpop.xlane.xlu1 %3445 }
 0x392   :  { %v3151_v57 = vadd.f32 %v3143_v58, %v3129_v31  ;;  %v3165_v29 = vrot.slane %v3157_v1, 5  ;;  %v3308_v14 = vrot.slane %v5912_v45, 7  ;;  %v3309_v17 = vrot.slane %v5914_v40, 7 }
 0x393   :  { %v3172_v43 = vadd.f32 %v3164_v32, %v3150_v2  ;;  %v3186_v10 = vrot.slane %v3178_v26, 6  ;;  %v3320_v55 = vrot.slane %v5953_v37, 6  ;;  %v3321_v27 = vrot.slane %v5985_v39, 6  ;;  %v3449_v26 = vpop.xlane.xlu0 %3448 }
 0x394   :  { %v3173_v52 = vadd.f32 %v3165_v29, %v3151_v57  ;;  %v3187_v25 = vrot.slane %v3179_v47, 6  ;;  %v3208_v18 = vrot.slane %v3200_v60, 7  ;;  %v3209_v8 = vrot.slane %v3201_v28, 7  ;;  %v6798_v28 = vld [vmem:[#allocation112_spill] sm:$0xff] }
 0x395   :  { %v3194_v16 = vadd.f32 %v3186_v10, %v3172_v43  ;;  %v3332_v5 = vrot.slane %v5987_v12, 5  ;;  %v3333_v51 = vrot.slane %v5989_v49, 5  ;;  %v3344_v34 = vrot.slane %v6028_v56, 4 }
 0x396   :  { %v3195_v45 = vadd.f32 %v3187_v25, %v3173_v52  ;;  %v3345_v40 = vrot.slane %v6060_v13, 4  ;;  %v3416_v42 = vsel %vm573_vm0, %v5878_v20, %v3308_v14  ;;  %v3417_v37 = vsel %vm573_vm0, %v5910_v44, %v3309_v17 }
 0x397   :  { %v3216_v39 = vadd.f32 %v3208_v18, %v3194_v16  ;;  %v3356_v11 = vrot.slane %v6062_v41, 3  ;;  %v3420_v22 = vsel %vm578_vm1, %v3416_v42, %v3320_v55  ;;  %v3421_v12 = vsel %vm578_vm1, %v3417_v37, %v3321_v27 }
 0x398   :  { %v3217_v9 = vadd.f32 %v3209_v8, %v3195_v45  ;;  %v3357_v49 = vrot.slane %v6064_v54, 3  ;;  %v3424_v56 = vsel %vm583_vm2, %v3420_v22, %v3332_v5  ;;  %v3425_v13 = vsel %vm583_vm2, %v3421_v12, %v3333_v51 }
 0x399   :  { %v3368_v15 = vrot.slane %v3056_v59, 2  ;;  %v3369_v0 = vrot.slane %v3057_v23, 2  ;;  %v3428_v20 = vsel %vm588_vm3, %v3424_v56, %v3344_v34  ;;  %v3429_v44 = vsel %vm588_vm3, %v3425_v13, %v3345_v40  ;;  %v6799_v59 = vld [vmem:[#allocation113_spill] sm:$0xff] }
 0x39a   :  { %v3380_v4 = vrot.slane %v3216_v39, 1  ;;  %v3381_v62 = vrot.slane %v3217_v9, 1  ;;  %v3432_v41 = vsel %vm593_vm4, %v3428_v20, %v3356_v11  ;;  %v3433_v48 = vsel %vm593_vm4, %v3429_v44, %v3357_v49  ;;  %v3442_v40 = vld [vmem:[%s6800_s16 + $0x8] sm:$0xff]  ;;  %v3443_v39 = vld [vmem:[%s6800_s16 + $0x10] sm:$0xff] }
 0x39b   :  { %v3436_v53 = vsel %vm598_vm5, %v3432_v41, %v3368_v15  ;;  %v3437_v54 = vsel %vm598_vm5, %v3433_v48, %v3369_v0  ;;  %v6801_v12 = vmov 1  }
 0x39c   :  { %v3440_v36 = vsel %vm603_vm6, %v3436_v53, %v3380_v4  ;;  %v3441_v61 = vsel %vm603_vm6, %v3437_v54, %v3381_v62 }
 0x39d   :  { %v3453_v50 = vadd.f32 %v3441_v61, %v3440_v36 }
 0x39f   :  { %3454 = vadd.xlane.f32.xlu1 %v3453_v50 }
 0x3ca   :  { %v3452_v38 = vpop.xlane.xlu1 %3451 }
 0x3cb   :  { %v3456_v21 = vadd.f32 %v3452_v38, %v3446_v7 }
 0x3cd   :  { %v3458_v63 = vmul.f32 0.001953125, %v3456_v21 }
 0x3cf   :  { %v6131_v1 = vsub.f32 %v5508_v24, %v3458_v63  ;;  %v6134_v46 = vsub.f32 %v5511_v19, %v3458_v63  ;;  %v3464_v60 = vsub.f32 %v5820_v30, %v3458_v63  ;;  %v3465_v19 = vsub.f32 %v5823_v35, %v3458_v63 }
 0x3d1   :  { %v3468_v33 = vmul.f32 %v6131_v1, %v6131_v1  ;;  %v3469_v58 = vmul.f32 %v6134_v46, %v6134_v46  ;;  %v3472_v57 = vmul.f32 %v3464_v60, %v3464_v60  ;;  %v3473_v14 = vmul.f32 %v3465_v19, %v3465_v19 }
 0x3d3   :  { %v3476_v6 = vadd.f32 %v3469_v58, %v3468_v33  ;;  %v3482_v10 = vadd.f32 %v3473_v14, %v3472_v57 }
 0x3d5   :  { %3477 = vadd.xlane.f32.xlu1 %v3476_v6 }
 0x428   :  { %v3455_v31 = vpop.xlane.xlu1 %3454 }
 0x429   :  { %v3457_v47 = vadd.f32 %v3455_v31, %v3449_v26 }
 0x42b   :  { %v3459_v3 = vmul.f32 0.001953125, %v3457_v47 }
 0x42d   :  { %v3462_v24 = vsub.f32 %v6798_v28, %v3459_v3  ;;  %v3463_v23 = vsub.f32 %v6799_v59, %v3459_v3  ;;  %v3466_v17 = vsub.f32 %v3440_v36, %v3459_v3  ;;  %v3467_v43 = vsub.f32 %v3441_v61, %v3459_v3 }
 0x42f   :  { %v3470_v2 = vmul.f32 %v3462_v24, %v3462_v24  ;;  %v3471_v32 = vmul.f32 %v3463_v23, %v3463_v23  ;;  %v3474_v55 = vmul.f32 %v3466_v17, %v3466_v17  ;;  %v3475_v27 = vmul.f32 %v3467_v43, %v3467_v43 }
 0x431   :  { %v3479_v29 = vadd.f32 %v3471_v32, %v3470_v2  ;;  %v3485_v52 = vadd.f32 %v3475_v27, %v3474_v55 }
 0x433   :  { %3480 = vadd.xlane.f32.xlu1 %v3479_v29 }
 0x437   :  { %3483 = vadd.xlane.f32.xlu1 %v3482_v10 }
 0x43b   :  { %3486 = vadd.xlane.f32.xlu1 %v3485_v52 }
 0x45e   :  { %v3478_v30 = vpop.xlane.xlu1 %3477 }
 0x4bc   :  { %v3481_v25 = vpop.xlane.xlu1 %3480 }
 0x4c0   :  { %v3484_v18 = vpop.xlane.xlu1 %3483 }
 0x4c1   :  { %v3488_v8 = vadd.f32 %v3484_v18, %v3478_v30 }
 0x4c3   :  { %v3490_v16 = vmul.f32 0.001953125, %v3488_v8 }
 0x4c4   :  { %v3487_v35 = vpop.xlane.xlu1 %3486 }
 0x4c5   :  { %v3492_v5 = vadd.f32 1e-05, %v3490_v16  ;;  %v3489_v51 = vadd.f32 %v3487_v35, %v3481_v25 }
 0x4c7   :  { %3772 = vrsqrt.f32 %v3492_v5  ;;  %v3491_v34 = vmul.f32 0.001953125, %v3489_v51 }
 0x4c9   :  { %v3493_v45 = vadd.f32 1e-05, %v3491_v34 }
 0x4cb   :  { %3774 = vrsqrt.f32 %v3493_v45 }
 0x4d4   :  { %v3773_v42 = vpop.eup %3772 }
 0x4d5   :  { %v3496_v37 = vmul.f32 %v3773_v42, %v3442_v40 }
 0x4d7   :  { %3500 = vperm.xlu0 %3765, %v3496_v37  }
 0x4d8   :  { %v3775_v11 = vpop.eup %3774 }
 0x4d9   :  { %v3497_v22 = vmul.f32 %v3775_v11, %v3443_v39 }
 0x4db   :  { %3505 = vperm.xlu1 %3767, %v3497_v22   ;;  %3769 = vset.pattern.permute.xlu0 %v6801_v12 }
 0x4dc   :  { %3523 = vperm.xlu0 %3769, %v3443_v39  }
 0x4df   :  { %3768 = vset.pattern.permute.xlu1 %v6801_v12 }
 0x4e0   :  { %3518 = vperm.xlu1 %3768, %v3442_v40  }
 0x552   :  { %v3501_v9 = vpop.permute.xlu0 %3500 }
 0x553   :  { %v3508_v48 = vmul.f32 %v3501_v9, %v6131_v1  ;;  %v3509_v53 = vmul.f32 %v3501_v9, %v6134_v46  ;;  %v3512_v54 = vmul.f32 %v3501_v9, %v3464_v60  ;;  %v3513_v36 = vmul.f32 %v3501_v9, %v3465_v19 }
 0x556   :  { %v3506_v49 = vpop.permute.xlu1 %3505 }
 0x557   :  { %v3524_v56 = vpop.permute.xlu0 %3523  ;;  %v3510_v13 = vmul.f32 %v3506_v49, %v3462_v24  ;;  %v3511_v15 = vmul.f32 %v3506_v49, %v3463_v23  ;;  %v3514_v0 = vmul.f32 %v3506_v49, %v3466_v17  ;;  %v3515_v20 = vmul.f32 %v3506_v49, %v3467_v43 }
 0x559   :  { %v3528_v44 = vadd.f32 %v3524_v56, %v3510_v13  ;;  %v3529_v4 = vadd.f32 %v3524_v56, %v3511_v15  ;;  %v3532_v62 = vadd.f32 %v3524_v56, %v3514_v0  ;;  %v3533_v41 = vadd.f32 %v3524_v56, %v3515_v20 }
 0x55b   :  { %v3536_v61 = vmax.f32 %v3528_v44, 0.0  ;;  %v3537_v50 = vmax.f32 %v3529_v4, 0.0  ;;  %v3540_v7 = vmax.f32 %v3532_v62, 0.0  ;;  %v3541_v38 = vmax.f32 %v3533_v41, 0.0  ;;  %v3519_v21 = vpop.permute.xlu1 %3518 }
 0x55c   :  { %v3526_v63 = vadd.f32 %v3519_v21, %v3508_v48  ;;  %v3527_v33 = vadd.f32 %v3519_v21, %v3509_v53  ;;  %v3530_v58 = vadd.f32 %v3519_v21, %v3512_v54  ;;  %v3531_v6 = vadd.f32 %v3519_v21, %v3513_v36 }
 0x55d   :  { %3544 = vst [vmem:[%s6802_s14 + $0x10] sm:$0xff] %v3536_v61  ;;  %3545 = vst [vmem:[%s6802_s14 + $0x18] sm:$0xff] %v3537_v50 }
 0x55e   :  { %3548 = vst [vmem:[%s6802_s14 + $0x30] sm:$0xff] %v3540_v7  ;;  %3549 = vst [vmem:[%s6802_s14 + $0x38] sm:$0xff] %v3541_v38  ;;  %v3534_v1 = vmax.f32 %v3526_v63, 0.0  ;;  %v3535_v46 = vmax.f32 %v3527_v33, 0.0  ;;  %v3538_v26 = vmax.f32 %v3530_v58, 0.0  ;;  %v3539_v31 = vmax.f32 %v3531_v6, 0.0 }
 0x560   :  { %3542 = vst [vmem:[%s6802_s14] sm:$0xff] %v3534_v1  ;;  %3543 = vst [vmem:[%s6802_s14 + $0x8] sm:$0xff] %v3535_v46 }
 0x561   :  { %3546 = vst [vmem:[%s6802_s14 + $0x20] sm:$0xff] %v3538_v26  ;;  %3547 = vst [vmem:[%s6802_s14 + $0x28] sm:$0xff] %v3539_v31 }
 0x562   :  { %3554 = vsyncpa [#allocation3], 1 }

</bundles_post_ra>
